<compile_context>
chip_gen: v7x
topology: tpu7x:2x2x1
jax: 0.10.0
libtpu: 0.0.40
codegen_flags: <defaults>
</compile_context>

<pallas_src>
import numpy as np
import jax
import jax.numpy as jnp
from jax.experimental import pallas as pl
from jax.experimental.pallas import tpu as pltpu


def _round_up(n, m):
    return ((n + m - 1) // m) * m


def _pad128(n):
    return _round_up(n, 128)


def _fold_conv_bn(key, c_in, c_out, eps=1e-5):
    """Deterministic Conv1d(k=1) + BatchNorm1d(eval) params, folded to (W^T, b)."""
    kw, kb, kg, kbeta, km, kv = jax.random.split(key, 6)
    w = jax.random.normal(kw, (c_out, c_in), jnp.float32) * 0.05
    b = jax.random.normal(kb, (c_out,), jnp.float32) * 0.05
    gamma = 1.0 + 0.1 * jax.random.normal(kg, (c_out,), jnp.float32)
    beta = 0.1 * jax.random.normal(kbeta, (c_out,), jnp.float32)
    rmean = 0.1 * jax.random.normal(km, (c_out,), jnp.float32)
    rvar = 1.0 + 0.1 * jnp.abs(jax.random.normal(kv, (c_out,), jnp.float32))
    s = gamma / jnp.sqrt(rvar + eps)
    w_folded = (w * s[:, None]).T                        # (c_in, c_out)
    b_folded = ((b - rmean) * s + beta).reshape(1, c_out)
    return w_folded.astype(jnp.float32), b_folded.astype(jnp.float32)


def make_raw_params(key, input_feat_chann, k_cls, k_reg):
    keys = jax.random.split(key, 7)
    return dict(
        conv1=_fold_conv_bn(keys[0], input_feat_chann, 1024),
        cls2=_fold_conv_bn(keys[1], 1024, 256),
        cls3=_fold_conv_bn(keys[2], 256, 128),
        cls4=_fold_conv_bn(keys[3], 128, k_cls),
        reg2=_fold_conv_bn(keys[4], 1024, 256),
        reg3=_fold_conv_bn(keys[5], 256, 128),
        reg4=_fold_conv_bn(keys[6], 128, k_reg),
    )


def fuse_params(raw, k_cls, k_reg):
    """Fuse the cls/reg heads into concatenated / block-diagonal bf16 weights."""
    w1, b1 = raw["conv1"]
    wc2, bc2 = raw["cls2"]
    wr2, br2 = raw["reg2"]
    wc3, bc3 = raw["cls3"]
    wr3, br3 = raw["reg3"]
    wc4, bc4 = raw["cls4"]
    wr4, br4 = raw["reg4"]
    k_cls_pad, k_reg_pad = _pad128(k_cls), _pad128(k_reg)

    # Level 2: simple concat (same input x feeds both heads).
    w2 = jnp.concatenate([wc2, wr2], axis=1)                       # (1024, 512)
    b2 = jnp.concatenate([bc2, br2], axis=1)                       # (1, 512)

    # Level 3: block-diagonal fuse.
    w3 = jnp.zeros((512, 256), jnp.float32)
    w3 = w3.at[:256, :128].set(wc3).at[256:, 128:].set(wr3)        # (512, 256)
    b3 = jnp.concatenate([bc3, br3], axis=1)                       # (1, 256)

    # Level 4: block-diagonal fuse, cls output padded to a lane-dense 128 cols.
    out_w = k_cls_pad + k_reg_pad
    w4 = jnp.zeros((256, out_w), jnp.float32)
    w4 = w4.at[:128, :k_cls].set(wc4)
    w4 = w4.at[128:, k_cls_pad:k_cls_pad + k_reg].set(wr4)         # (256, out_w)
    b4 = jnp.zeros((1, out_w), jnp.float32)
    b4 = b4.at[:, :k_cls].set(bc4[0])
    b4 = b4.at[:, k_cls_pad:k_cls_pad + k_reg].set(br4[0])

    bf16 = jnp.bfloat16
    return (w1.astype(bf16), b1, w2.astype(bf16), b2,
            w3.astype(bf16), b3, w4.astype(bf16), b4)


def _choose_tiles(B, N, C):
    """Pick (batch_tile, n_tile).

    n_tile: whole point axis if small, else a lane-dense multiple of 128 so the
    trailing 'arbitrary' grid axis bounds VMEM for realistic point counts.
    batch_tile: pushed toward MXU-native M (multiple of 8/16, capped at 256),
    bounded by a ~16 MiB per-input-buffer budget, preferring >= 2 steps on the
    parallel batch axis when B is large enough (v7x megacore).
    """
    n_tile = N if N <= 512 else 512
    budget_rows = max(8, ((16 << 20) // 4) // max(1, C * n_tile))
    max_bt = max(8, min(256, (budget_rows // 8) * 8))
    if B <= 8:
        return 8, n_tile
    bt = min(max_bt, _round_up(-(-B // 2), 16), _round_up(B, 8))
    bt = max(8, (bt // 8) * 8)
    return bt, n_tile


def pointnet2_two_stage_forward(xyz, fused_params, k_cls, k_reg_no_anchor):
    """xyz: (B, 256, num_points) float32 in the native PyTorch NCW layout."""
    w1, b1, w2, b2, w3, b3, w4, b4 = fused_params
    B, C, N = xyz.shape
    k_reg = k_cls * k_reg_no_anchor
    k_cls_pad = _pad128(k_cls)
    out_w = w4.shape[1]

    batch_tile, n_tile = _choose_tiles(B, N, C)

    x = xyz.astype(jnp.float32)
    n_pad = _round_up(N, n_tile)
    if n_pad != N:
        # -inf is the identity of max, so padded points never win the pool.
        x = jnp.pad(x, ((0, 0), (0, 0), (0, n_pad - N)),
                    constant_values=-jnp.inf)
    b_pad = _round_up(B, batch_tile)
    if b_pad != B:
        x = jnp.pad(x, ((0, b_pad - B), (0, 0), (0, 0)))

    grid = (b_pad // batch_tile, n_pad // n_tile)
    weight_args = (w1, b1, w2, b2, w3, b3, w4, b4)

    def kernel(x_ref, w1_ref, b1_ref, w2_ref, b2_ref, w3_ref, b3_ref,
               w4_ref, b4_ref, out_ref, mpx_ref, mp_acc):
        n = pl.program_id(1)

        # MaxPool1d(num_points): running max over the point (lane) axis.
        @pl.when(n == 0)
        def _():
            mp_acc[...] = jnp.full_like(mp_acc, -jnp.inf)

        mp_acc[...] = jnp.maximum(mp_acc[...], jnp.max(x_ref[...], axis=2))

        @pl.when(n == pl.num_programs(1) - 1)
        def _():
            mp = mp_acc[...]                                   # (TB, 256) f32
            mpx_ref[...] = mp

            def dense(a, w_ref, b_ref):
                y = jnp.dot(a, w_ref[...],
                            preferred_element_type=jnp.float32) + b_ref[...]
                return jnp.maximum(y, 0.0).astype(jnp.bfloat16)

            h = dense(mp.astype(jnp.bfloat16), w1_ref, b1_ref)    # (TB, 1024)
            h = dense(h, w2_ref, b2_ref)                          # (TB, 512)  cls|reg
            h = dense(h, w3_ref, b3_ref)                          # (TB, 256)  cls|reg
            y = jnp.dot(h, w4_ref[...],
                        preferred_element_type=jnp.float32) + b4_ref[...]

            # sigmoid on reg columns whose per-anchor index >= 7 (torch [:, :, 7:]).
            col = jax.lax.broadcasted_iota(jnp.int32, y.shape, 1)
            reg_col = col - k_cls_pad
            sig = ((reg_col >= 0) & (reg_col < k_reg)
                   & ((reg_col % k_reg_no_anchor) >= 7))
            out_ref[...] = jnp.where(sig, jax.nn.sigmoid(y), y)   # lane-dense store

    def pinned(arr):
        # Weights/biases: full array, same block every grid step -> stays in VMEM.
        nd = arr.ndim
        return pl.BlockSpec(arr.shape, lambda i, n, _nd=nd: (0,) * _nd)

    in_block_bytes = batch_tile * C * n_tile * 4
    weight_bytes = sum(int(p.size) * p.dtype.itemsize for p in weight_args)
    out_block_bytes = batch_tile * (out_w + C) * 4
    vmem_limit = 2 * in_block_bytes + 2 * weight_bytes + 2 * out_block_bytes \
        + batch_tile * C * 4 + (8 << 20)
    vmem_limit = int(min(max(vmem_limit, 32 << 20), 100 << 20))

    cost = pl.CostEstimate(
        flops=int(2 * b_pad * (C * 1024 + 1024 * 512 + 512 * 256 + 256 * out_w)),
        transcendentals=int(b_pad * out_w),
        bytes_accessed=int(x.size * 4 + weight_bytes + b_pad * (out_w + C) * 4))

    out, mpx = pl.pallas_call(
        kernel,
        grid=grid,
        in_specs=[pl.BlockSpec((batch_tile, C, n_tile), lambda i, n: (i, 0, n))]
                 + [pinned(p) for p in weight_args],
        out_specs=(pl.BlockSpec((batch_tile, out_w), lambda i, n: (i, 0)),
                   pl.BlockSpec((batch_tile, C), lambda i, n: (i, 0))),
        out_shape=(jax.ShapeDtypeStruct((b_pad, out_w), jnp.float32),
                   jax.ShapeDtypeStruct((b_pad, C), jnp.float32)),
        scratch_shapes=[pltpu.VMEM((batch_tile, C), jnp.float32)],
        compiler_params=pltpu.CompilerParams(
            dimension_semantics=("parallel", "arbitrary"),
            vmem_limit_bytes=vmem_limit),
        cost_estimate=cost,
    )(x, *weight_args)

    x_cls = out[:B, :k_cls]
    x_reg = out[:B, k_cls_pad:k_cls_pad + k_reg].reshape(B, k_cls, k_reg_no_anchor)
    mp_x = mpx[:B, :, None]
    return x_cls, x_reg, mp_x


def _reference_forward(xyz, raw, k_cls, k_reg_no_anchor):
    """Pure-JAX reference mirroring the PyTorch forward (eval-mode BN folded).

    Emulates the kernel's numerics (bf16 matmul inputs, f32 accumulation) so
    the comparison is tight and catches layout/fusion bugs.
    """
    def dense(a, wb, relu=True):
        w, b = wb
        y = jnp.dot(a.astype(jnp.bfloat16), w.astype(jnp.bfloat16),
                    preferred_element_type=jnp.float32) + b
        return jnp.maximum(y, 0.0) if relu else y

    B = xyz.shape[0]
    mp = jnp.max(xyz, axis=-1)                                     # (B, 256)
    x = dense(mp, raw["conv1"])
    xc = dense(x, raw["cls2"])
    xc = dense(xc, raw["cls3"])
    xc = dense(xc, raw["cls4"], relu=False)
    xr = dense(x, raw["reg2"])
    xr = dense(xr, raw["reg3"])
    xr = dense(xr, raw["reg4"], relu=False)
    xr = xr.reshape(B, k_cls, k_reg_no_anchor)
    xr = xr.at[:, :, 7:].set(jax.nn.sigmoid(xr[:, :, 7:]))
    return xc, xr, mp[..., None]


if __name__ == "__main__":
    # Small, module-consistent shapes.
    B = 2                 # number of grasp-region balls (batch)
    FEAT_C = 256          # per-point feature channels expected by self.conv
    NUM_POINTS = 32       # points per ball (MaxPool1d window)
    K_CLS = 16            # anchors per center
    K_REG_NO_ANCHOR = 8   # 7 pose residuals + 1 score (sigmoid on index >= 7)
    K_REG = K_CLS * K_REG_NO_ANCHOR

    root = jax.random.PRNGKey(0)
    k_in, k_par = jax.random.split(root)
    xyz = jax.random.normal(k_in, (B, FEAT_C, NUM_POINTS), jnp.float32)

    raw = make_raw_params(k_par, FEAT_C, K_CLS, K_REG)
    fused = fuse_params(raw, K_CLS, K_REG)

    x_cls, x_reg, mp_x = pointnet2_two_stage_forward(
        xyz, fused, K_CLS, K_REG_NO_ANCHOR)
    jax.block_until_ready((x_cls, x_reg, mp_x))

    r_cls, r_reg, r_mp = _reference_forward(xyz, raw, K_CLS, K_REG_NO_ANCHOR)

    assert x_cls.shape == (B, K_CLS)
    assert x_reg.shape == (B, K_CLS, K_REG_NO_ANCHOR)
    assert mp_x.shape == (B, FEAT_C, 1)
    np.testing.assert_allclose(np.asarray(x_cls), np.asarray(r_cls),
                               rtol=1e-2, atol=1e-2)
    np.testing.assert_allclose(np.asarray(x_reg), np.asarray(r_reg),
                               rtol=1e-2, atol=1e-2)
    np.testing.assert_allclose(np.asarray(mp_x), np.asarray(r_mp),
                               rtol=1e-6, atol=1e-6)

    print("KERNEL_OK")
</pallas_src>

<mosaic_0001>
module attributes {stable_mosaic.version = 11 : i64} {
  func.func @kernel(%arg0: i32, %arg1: i32, %arg2: memref<8x256x32xf32, #tpu.memory_space<vmem>>, %arg3: memref<256x1024xbf16, #tpu.memory_space<vmem>>, %arg4: memref<1x1024xf32, #tpu.memory_space<vmem>>, %arg5: memref<1024x512xbf16, #tpu.memory_space<vmem>>, %arg6: memref<1x512xf32, #tpu.memory_space<vmem>>, %arg7: memref<512x256xbf16, #tpu.memory_space<vmem>>, %arg8: memref<1x256xf32, #tpu.memory_space<vmem>>, %arg9: memref<256x256xbf16, #tpu.memory_space<vmem>>, %arg10: memref<1x256xf32, #tpu.memory_space<vmem>>, %arg11: memref<8x256xf32, #tpu.memory_space<vmem>>, %arg12: memref<8x256xf32, #tpu.memory_space<vmem>>, %arg13: memref<8x256xf32, #tpu.memory_space<vmem>>) attributes {dimension_semantics = [#tpu.dimension_semantics<parallel>, #tpu.dimension_semantics<arbitrary>], iteration_bounds = array<i64: 1, 1>, scalar_prefetch = 0 : i64, scratch_operands = 1 : i64, tpu.core_type = #tpu.core_type<tc>, window_params = [{transform_indices = @transform_0, window_bounds = array<i64: 8, 256, 32>}, {pipeline_mode = #tpu.pipeline_mode<synchronous>, transform_indices = @transform_1, window_bounds = array<i64: 256, 1024>}, {pipeline_mode = #tpu.pipeline_mode<synchronous>, transform_indices = @transform_2, window_bounds = array<i64: 1, 1024>}, {pipeline_mode = #tpu.pipeline_mode<synchronous>, transform_indices = @transform_3, window_bounds = array<i64: 1024, 512>}, {pipeline_mode = #tpu.pipeline_mode<synchronous>, transform_indices = @transform_4, window_bounds = array<i64: 1, 512>}, {pipeline_mode = #tpu.pipeline_mode<synchronous>, transform_indices = @transform_5, window_bounds = array<i64: 512, 256>}, {pipeline_mode = #tpu.pipeline_mode<synchronous>, transform_indices = @transform_6, window_bounds = array<i64: 1, 256>}, {pipeline_mode = #tpu.pipeline_mode<synchronous>, transform_indices = @transform_7, window_bounds = array<i64: 256, 256>}, {pipeline_mode = #tpu.pipeline_mode<synchronous>, transform_indices = @transform_8, window_bounds = array<i64: 1, 256>}, {transform_indices = @transform_9, window_bounds = array<i64: 8, 256>}, {transform_indices = @transform_10, window_bounds = array<i64: 8, 256>}]} {
    %c0_i32 = arith.constant 0 : i32
    %0 = arith.cmpi eq, %arg1, %c0_i32 : i32
    %1 = arith.extui %0 : i1 to i32
    %c0_i32_0 = arith.constant 0 : i32
    %2 = arith.cmpi ne, %1, %c0_i32_0 : i32
    scf.if %2 {
      %cst_9 = arith.constant 0xFF800000 : f32
      %11 = vector.broadcast %cst_9 : f32 to vector<8x256xf32>
      %c0_10 = arith.constant 0 : index
      %c0_11 = arith.constant 0 : index
      %12 = vector.load %arg13[%c0_10, %c0_11] : memref<8x256xf32, #tpu.memory_space<vmem>>, vector<8x256xf32>
      tpu.vector_store %arg13[%c0_10, %c0_11], %11 {strides = array<i32>} : memref<8x256xf32, #tpu.memory_space<vmem>>, vector<8x256xf32>,
    } else {
    }
    %c0 = arith.constant 0 : index
    %c0_1 = arith.constant 0 : index
    %3 = vector.load %arg13[%c0, %c0_1] : memref<8x256xf32, #tpu.memory_space<vmem>>, vector<8x256xf32>
    %c0_2 = arith.constant 0 : index
    %c0_3 = arith.constant 0 : index
    %c0_4 = arith.constant 0 : index
    %4 = vector.load %arg2[%c0_2, %c0_3, %c0_4] : memref<8x256x32xf32, #tpu.memory_space<vmem>>, vector<8x256x32xf32>
    %cst = arith.constant dense<0xFF800000> : vector<8x256xf32>
    %5 = vector.multi_reduction <maximumf>, %4, %cst [2] : vector<8x256x32xf32> to vector<8x256xf32>
    %6 = arith.maximumf %3, %5 : vector<8x256xf32>
    %c0_5 = arith.constant 0 : index
    %c0_6 = arith.constant 0 : index
    %7 = vector.load %arg13[%c0_5, %c0_6] : memref<8x256xf32, #tpu.memory_space<vmem>>, vector<8x256xf32>
    tpu.vector_store %arg13[%c0_5, %c0_6], %6 {strides = array<i32>} : memref<8x256xf32, #tpu.memory_space<vmem>>, vector<8x256xf32>,
    %c0_i32_7 = arith.constant 0 : i32
    %8 = arith.cmpi eq, %arg1, %c0_i32_7 : i32
    %9 = arith.extui %8 : i1 to i32
    %c0_i32_8 = arith.constant 0 : i32
    %10 = arith.cmpi ne, %9, %c0_i32_8 : i32
    scf.if %10 {
      %c0_9 = arith.constant 0 : index
      %c0_10 = arith.constant 0 : index
      %11 = vector.load %arg13[%c0_9, %c0_10] : memref<8x256xf32, #tpu.memory_space<vmem>>, vector<8x256xf32>
      %c0_11 = arith.constant 0 : index
      %c0_12 = arith.constant 0 : index
      %12 = vector.load %arg12[%c0_11, %c0_12] : memref<8x256xf32, #tpu.memory_space<vmem>>, vector<8x256xf32>
      tpu.vector_store %arg12[%c0_11, %c0_12], %11 {strides = array<i32>} : memref<8x256xf32, #tpu.memory_space<vmem>>, vector<8x256xf32>,
      %13 = arith.truncf %11 : vector<8x256xf32> to vector<8x256xbf16>
      %c0_13 = arith.constant 0 : index
      %c0_14 = arith.constant 0 : index
      %14 = vector.load %arg3[%c0_13, %c0_14] : memref<256x1024xbf16, #tpu.memory_space<vmem>>, vector<256x1024xbf16>
      %cst_15 = arith.constant dense<0.000000e+00> : vector<8x1024xf32>
      %15 = tpu.matmul %13, %14, %cst_15 {dimension_numbers = #tpu.dot_dimension_numbers<[1], [0], [0], [1], [0, 0, 1, 1], [], []>} : vector<8x256xbf16>, vector<256x1024xbf16>, vector<8x1024xf32> -> vector<8x1024xf32>
      %c0_16 = arith.constant 0 : index
      %c0_17 = arith.constant 0 : index
      %16 = vector.load %arg4[%c0_16, %c0_17] : memref<1x1024xf32, #tpu.memory_space<vmem>>, vector<1x1024xf32>
      %17 = vector.broadcast %16 : vector<1x1024xf32> to vector<8x1024xf32>
      %18 = arith.addf %15, %17 : vector<8x1024xf32>
      %cst_18 = arith.constant 0.000000e+00 : f32
      %19 = vector.broadcast %cst_18 : f32 to vector<8x1024xf32>
      %20 = arith.maximumf %18, %19 : vector<8x1024xf32>
      %21 = arith.truncf %20 : vector<8x1024xf32> to vector<8x1024xbf16>
      %c0_19 = arith.constant 0 : index
      %c0_20 = arith.constant 0 : index
      %22 = vector.load %arg5[%c0_19, %c0_20] : memref<1024x512xbf16, #tpu.memory_space<vmem>>, vector<1024x512xbf16>
      %cst_21 = arith.constant dense<0.000000e+00> : vector<8x512xf32>
      %23 = tpu.matmul %21, %22, %cst_21 {dimension_numbers = #tpu.dot_dimension_numbers<[1], [0], [0], [1], [0, 0, 1, 1], [], []>} : vector<8x1024xbf16>, vector<1024x512xbf16>, vector<8x512xf32> -> vector<8x512xf32>
      %c0_22 = arith.constant 0 : index
      %c0_23 = arith.constant 0 : index
      %24 = vector.load %arg6[%c0_22, %c0_23] : memref<1x512xf32, #tpu.memory_space<vmem>>, vector<1x512xf32>
      %25 = vector.broadcast %24 : vector<1x512xf32> to vector<8x512xf32>
      %26 = arith.addf %23, %25 : vector<8x512xf32>
      %cst_24 = arith.constant 0.000000e+00 : f32
      %27 = vector.broadcast %cst_24 : f32 to vector<8x512xf32>
      %28 = arith.maximumf %26, %27 : vector<8x512xf32>
      %29 = arith.truncf %28 : vector<8x512xf32> to vector<8x512xbf16>
      %c0_25 = arith.constant 0 : index
      %c0_26 = arith.constant 0 : index
      %30 = vector.load %arg7[%c0_25, %c0_26] : memref<512x256xbf16, #tpu.memory_space<vmem>>, vector<512x256xbf16>
      %cst_27 = arith.constant dense<0.000000e+00> : vector<8x256xf32>
      %31 = tpu.matmul %29, %30, %cst_27 {dimension_numbers = #tpu.dot_dimension_numbers<[1], [0], [0], [1], [0, 0, 1, 1], [], []>} : vector<8x512xbf16>, vector<512x256xbf16>, vector<8x256xf32> -> vector<8x256xf32>
      %c0_28 = arith.constant 0 : index
      %c0_29 = arith.constant 0 : index
      %32 = vector.load %arg8[%c0_28, %c0_29] : memref<1x256xf32, #tpu.memory_space<vmem>>, vector<1x256xf32>
      %33 = vector.broadcast %32 : vector<1x256xf32> to vector<8x256xf32>
      %34 = arith.addf %31, %33 : vector<8x256xf32>
      %cst_30 = arith.constant 0.000000e+00 : f32
      %35 = vector.broadcast %cst_30 : f32 to vector<8x256xf32>
      %36 = arith.maximumf %34, %35 : vector<8x256xf32>
      %37 = arith.truncf %36 : vector<8x256xf32> to vector<8x256xbf16>
      %c0_31 = arith.constant 0 : index
      %c0_32 = arith.constant 0 : index
      %38 = vector.load %arg9[%c0_31, %c0_32] : memref<256x256xbf16, #tpu.memory_space<vmem>>, vector<256x256xbf16>
      %cst_33 = arith.constant dense<0.000000e+00> : vector<8x256xf32>
      %39 = tpu.matmul %37, %38, %cst_33 {dimension_numbers = #tpu.dot_dimension_numbers<[1], [0], [0], [1], [0, 0, 1, 1], [], []>} : vector<8x256xbf16>, vector<256x256xbf16>, vector<8x256xf32> -> vector<8x256xf32>
      %c0_34 = arith.constant 0 : index
      %c0_35 = arith.constant 0 : index
      %40 = vector.load %arg10[%c0_34, %c0_35] : memref<1x256xf32, #tpu.memory_space<vmem>>, vector<1x256xf32>
      %41 = vector.broadcast %40 : vector<1x256xf32> to vector<8x256xf32>
      %42 = arith.addf %39, %41 : vector<8x256xf32>
      %43 = tpu.iota {dimensions = array<i32: 1>} : vector<8x256xi32>
      %c128_i32 = arith.constant 128 : i32
      %44 = vector.broadcast %c128_i32 : i32 to vector<8x256xi32>
      %45 = arith.subi %43, %44 : vector<8x256xi32>
      %c0_i32_36 = arith.constant 0 : i32
      %46 = vector.broadcast %c0_i32_36 : i32 to vector<8x256xi32>
      %47 = arith.cmpi sge, %45, %46 : vector<8x256xi32>
      %c128_i32_37 = arith.constant 128 : i32
      %48 = vector.broadcast %c128_i32_37 : i32 to vector<8x256xi32>
      %49 = arith.cmpi slt, %45, %48 : vector<8x256xi32>
      %50 = arith.andi %47, %49 : vector<8x256xi1>
      %c8_i32 = arith.constant 8 : i32
      %c0_i32_38 = arith.constant 0 : i32
      %51 = arith.cmpi eq, %c8_i32, %c0_i32_38 : i32
      %c1_i32 = arith.constant 1 : i32
      %52 = arith.select %51, %c1_i32, %c8_i32 : i32
      %53 = vector.broadcast %52 : i32 to vector<8x256xi32>
      %54 = arith.remsi %45, %53 : vector<8x256xi32>
      %c0_i32_39 = arith.constant 0 : i32
      %55 = vector.broadcast %c0_i32_39 : i32 to vector<8x256xi32>
      %56 = arith.cmpi ne, %54, %55 : vector<8x256xi32>
      %c0_i32_40 = arith.constant 0 : i32
      %57 = vector.broadcast %c0_i32_40 : i32 to vector<8x256xi32>
      %58 = arith.cmpi slt, %54, %57 : vector<8x256xi32>
      %c0_i32_41 = arith.constant 0 : i32
      %59 = arith.cmpi slt, %52, %c0_i32_41 : i32
      %60 = vector.broadcast %59 : i1 to vector<8x256xi1>
      %61 = vector.broadcast %60 : vector<8x256xi1> to vector<8x256xi1>
      %62 = arith.xori %58, %61 : vector<8x256xi1>
      %63 = arith.andi %62, %56 : vector<8x256xi1>
      %64 = vector.broadcast %52 : i32 to vector<8x256xi32>
      %65 = arith.addi %54, %64 : vector<8x256xi32>
      %66 = arith.select %63, %65, %54 : vector<8x256xi1>, vector<8x256xi32>
      %c7_i32 = arith.constant 7 : i32
      %67 = vector.broadcast %c7_i32 : i32 to vector<8x256xi32>
      %68 = arith.cmpi sge, %66, %67 : vector<8x256xi32>
      %69 = arith.andi %50, %68 : vector<8x256xi1>
      %70 = arith.negf %42 : vector<8x256xf32>
      %71 = math.exp %70 : vector<8x256xf32>
      %cst_42 = arith.constant 1.000000e+00 : f32
      %72 = vector.broadcast %cst_42 : f32 to vector<8x256xf32>
      %73 = arith.addf %72, %71 : vector<8x256xf32>
      %74 = arith.divf %72, %73 : vector<8x256xf32>
      %75 = arith.select %69, %74, %42 : vector<8x256xi1>, vector<8x256xf32>
      %c0_43 = arith.constant 0 : index
      %c0_44 = arith.constant 0 : index
      %76 = vector.load %arg11[%c0_43, %c0_44] : memref<8x256xf32, #tpu.memory_space<vmem>>, vector<8x256xf32>
      tpu.vector_store %arg11[%c0_43, %c0_44], %75 {strides = array<i32>} : memref<8x256xf32, #tpu.memory_space<vmem>>, vector<8x256xf32>,
    } else {
    }
    return
  }
  func.func @transform_0(%arg0: i32, %arg1: i32) -> (i32, i32, i32) {
    %c0_i32 = arith.constant 0 : i32
    %c0_i32_0 = arith.constant 0 : i32
    return %arg0, %c0_i32, %arg1 : i32, i32, i32
  }
  func.func @transform_1(%arg0: i32, %arg1: i32) -> (i32, i32) {
    %c0_i32 = arith.constant 0 : i32
    %c0_i32_0 = arith.constant 0 : i32
    %c0_i32_1 = arith.constant 0 : i32
    return %c0_i32, %c0_i32_0 : i32, i32
  }
  func.func @transform_2(%arg0: i32, %arg1: i32) -> (i32, i32) {
    %c0_i32 = arith.constant 0 : i32
    %c0_i32_0 = arith.constant 0 : i32
    %c0_i32_1 = arith.constant 0 : i32
    return %c0_i32, %c0_i32_0 : i32, i32
  }
  func.func @transform_3(%arg0: i32, %arg1: i32) -> (i32, i32) {
    %c0_i32 = arith.constant 0 : i32
    %c0_i32_0 = arith.constant 0 : i32
    %c0_i32_1 = arith.constant 0 : i32
    return %c0_i32, %c0_i32_0 : i32, i32
  }
  func.func @transform_4(%arg0: i32, %arg1: i32) -> (i32, i32) {
    %c0_i32 = arith.constant 0 : i32
    %c0_i32_0 = arith.constant 0 : i32
    %c0_i32_1 = arith.constant 0 : i32
    return %c0_i32, %c0_i32_0 : i32, i32
  }
  func.func @transform_5(%arg0: i32, %arg1: i32) -> (i32, i32) {
    %c0_i32 = arith.constant 0 : i32
    %c0_i32_0 = arith.constant 0 : i32
    %c0_i32_1 = arith.constant 0 : i32
    return %c0_i32, %c0_i32_0 : i32, i32
  }
  func.func @transform_6(%arg0: i32, %arg1: i32) -> (i32, i32) {
    %c0_i32 = arith.constant 0 : i32
    %c0_i32_0 = arith.constant 0 : i32
    %c0_i32_1 = arith.constant 0 : i32
    return %c0_i32, %c0_i32_0 : i32, i32
  }
  func.func @transform_7(%arg0: i32, %arg1: i32) -> (i32, i32) {
    %c0_i32 = arith.constant 0 : i32
    %c0_i32_0 = arith.constant 0 : i32
    %c0_i32_1 = arith.constant 0 : i32
    return %c0_i32, %c0_i32_0 : i32, i32
  }
  func.func @transform_8(%arg0: i32, %arg1: i32) -> (i32, i32) {
    %c0_i32 = arith.constant 0 : i32
    %c0_i32_0 = arith.constant 0 : i32
    %c0_i32_1 = arith.constant 0 : i32
    return %c0_i32, %c0_i32_0 : i32, i32
  }
  func.func @transform_9(%arg0: i32, %arg1: i32) -> (i32, i32) {
    %c0_i32 = arith.constant 0 : i32
    %c0_i32_0 = arith.constant 0 : i32
    return %arg0, %c0_i32 : i32, i32
  }
  func.func @transform_10(%arg0: i32, %arg1: i32) -> (i32, i32) {
    %c0_i32 = arith.constant 0 : i32
    %c0_i32_0 = arith.constant 0 : i32
    return %arg0, %c0_i32 : i32, i32
  }
}

</mosaic_0001>

<bundles_post_ra>
// kernel: tpu_custom_call.1
= control target key start
LH: loop header
LB: loop body
LE: loop exit
PB: predicated region body
PF: predicated region fallthrough
CT: control target
= control target key end

     0   :  { %16 = vsyncpa [#allocation4], 0  ;;  %s10862_s0 = inlined_call_operand.vmem [shape: f32[8,256,32], index: 0, kind: input, shape index: {}]   ;;  %s10863_s1 = inlined_call_operand.hbm [shape: bf16[256,1024], index: 1, kind: input, shape index: {}]   ;;  %s10864_s2 = inlined_call_operand.vmem [shape: f32[1,1024], index: 2, kind: input, shape index: {}]   ;;  %s10865_s3 = inlined_call_operand.vmem [shape: bf16[1024,512], index: 3, kind: input, shape index: {}]   ;;  %s10866_s4 = inlined_call_operand.hbm [shape: f32[1,512], index: 4, kind: input, shape index: {}]   ;;  %s10867_s5 = inlined_call_operand.vmem [shape: bf16[512,256], index: 5, kind: input, shape index: {}]   ;;  %s10868_s6 = inlined_call_operand.vmem [shape: f32[1,256], index: 6, kind: input, shape index: {}]   ;;  %s10869_s7 = inlined_call_operand.hbm [shape: bf16[256,256], index: 7, kind: input, shape index: {}]   ;;  %s10870_s8 = inlined_call_operand.vmem [shape: f32[1,256], index: 8, kind: input, shape index: {}]   ;;  %s10871_s9 = inlined_call_operand.hbm [shape: f32[8,256], index: 9, kind: output, shape index: {0}]   ;;  %s10872_s10 = inlined_call_operand.hbm [shape: f32[8,256], index: 10, kind: output, shape index: {1}]  }
   0x1   :  { %17 = vsyncpa [#allocation7], 0 }
   0x2   :  { %18 = vsyncpa [#allocation5], 0 }
   0x3   :  { %19 = vsyncpa [#allocation11], 0  ;;  %s7564_s13 = smov [#allocation6]   ;;  %s7565_s15 = smov [#allocation3]  }
   0x4   :  { %s44_s14 = sshll.u32 %s7564_s13, 4  ;;  %s27_s16 = sshll.u32 %s7565_s15, 4  ;;  %s45_s14 = int_to_ptr.vmem [resolvable:$true] %s44_s14  ;;  %s7628_s16 = int_to_ptr.vmem [resolvable:$true] %s27_s16 }
   0x5   :  { %s7446_s19 = scalar_lea.hbm %s10866_s4, 64 }
   0x6   :  { %p7447_p0 = scmp.ne.s32.totalorder %s10866_s4, %s7446_s19  ;;  %p7450_p1 = scmp.lt.u32.totalorder %s7446_s19, %s10866_s4 }
   0x8   :  { %p7452_p2 = pnand %p7450_p1, %p7447_p0 }
   0xa   :  { %7455 = shalt.err (!%p7452_p2)
}
   0xb   :  { %s7456_s24 = scalar_lea.vmem %s45_s14, 64  ;;  %p7461_p4 = scmp.lt.s32.totalorder %s45_s14, %s45_s14 }
   0xc   :  { %p7457_p3 = scmp.ne.s32.totalorder %s45_s14, %s7456_s24  ;;  %p7462_p5 = scmp.lt.s32.totalorder %s7456_s24, %s7456_s24 }
   0xe   :  { %p7463_p6 = por %p7462_p5, %p7461_p4 }
  0x10   :  { %p7464_p7 = pnand %p7463_p6, %p7457_p3 }
  0x12   :  { %7467 = shalt.err (!%p7464_p7)
}
  0x13   :  { %47 = dma.hbm_to_vmem [thread:$0]  %s10866_s4, 64, %s45_s14, [#allocation7]  }
  0x14   :  { %s7468_s29 = scalar_lea.hbm %s10863_s1, 16384 }
  0x15   :  { %p7469_p8 = scmp.ne.s32.totalorder %s10863_s1, %s7468_s29  ;;  %p7472_p9 = scmp.lt.u32.totalorder %s7468_s29, %s10863_s1 }
  0x17   :  { %p7474_p10 = pnand %p7472_p9, %p7469_p8 }
  0x19   :  { %7477 = shalt.err (!%p7474_p10)
}
  0x1a   :  { %s7478_s15 = scalar_lea.vmem %s7628_s16, 16384  ;;  %p7483_p12 = scmp.lt.s32.totalorder %s7628_s16, %s7628_s16 }
  0x1b   :  { %p7479_p11 = scmp.ne.s32.totalorder %s7628_s16, %s7478_s15  ;;  %p7484_p13 = scmp.lt.s32.totalorder %s7478_s15, %s7478_s15 }
  0x1d   :  { %p7485_p0 = por %p7484_p13, %p7483_p12 }
  0x1f   :  { %p7486_p1 = pnand %p7485_p0, %p7479_p11 }
  0x21   :  { %7489 = shalt.err (!%p7486_p1)
}
  0x22   :  { %s7566_s4 = smov 512   ;;  %s7567_s14 = smov 32  }
  0x23   :  { %33 = dma.hbm_to_vmem [thread:$0]  %s10863_s1, 16384, %s7628_s16, [#allocation4], %s7566_s4, %s7566_s4, %s7567_s14  }
  0x24   :  { %s7568_s19 = smov [#allocation8]   ;;  %s7490_s23 = scalar_lea.hbm %s10869_s7, 4096 }
  0x25   :  { %s57_s20 = sshll.u32 %s7568_s19, 4  ;;  %p7491_p2 = scmp.ne.s32.totalorder %s10869_s7, %s7490_s23  ;;  %s58_s20 = int_to_ptr.vmem [resolvable:$true] %s57_s20 }
  0x26   :  { %p7494_p3 = scmp.lt.u32.totalorder %s7490_s23, %s10869_s7 }
  0x28   :  { %p7496_p4 = pnand %p7494_p3, %p7491_p2 }
  0x2a   :  { %7499 = shalt.err (!%p7496_p4)
}
  0x2b   :  { %s7500_s28 = scalar_lea.vmem %s58_s20, 4096  ;;  %p7505_p6 = scmp.lt.s32.totalorder %s58_s20, %s58_s20 }
  0x2c   :  { %p7501_p5 = scmp.ne.s32.totalorder %s58_s20, %s7500_s28  ;;  %p7506_p7 = scmp.lt.s32.totalorder %s7500_s28, %s7500_s28 }
  0x2e   :  { %p7507_p8 = por %p7506_p7, %p7505_p6 }
  0x30   :  { %p7508_p9 = pnand %p7507_p8, %p7501_p5 }
  0x32   :  { %7511 = shalt.err (!%p7508_p9)
}
  0x33   :  { %s7569_s1 = smov 128   ;;  %s7570_s16 = smov 8  }
  0x34   :  { %63 = dma.hbm_to_vmem [thread:$0]  %s10869_s7, 4096, %s58_s20, [#allocation7], %s7569_s1, %s7569_s1, %s7570_s16  }
  0x35   :  { %7556 = dma.done.wait [#allocation4], 16384  }
  0x36   :  { %7557 = vsyncadd [#allocation4], 4294950912 }
  0x37   :  { %7558 = dma.done.wait [#allocation7], 4160  }
  0x38   :  { %7559 = vsyncadd [#allocation7], 4294963136  ;;  %vm339_vm0 = vcmask 261120   ;;  %v131_v0 = vld [vmem:[%s10862_s0 + $0x180] sm:$0xff]  ;;  %v132_v2 = vld [vmem:[%s10862_s0 + $0x188] sm:$0xff]  ;;  %vm1375_vm1 = vcmask 130112  }
  0x39   :  { %v99_v1 = vld [vmem:[%s10862_s0 + $0x80] sm:$0xff]  ;;  %v484_v3 = vsel %vm339_vm0, %v131_v0, -inf  ;;  %v100_v5 = vld [vmem:[%s10862_s0 + $0x88] sm:$0xff]  ;;  %v487_v6 = vsel %vm339_vm0, %v132_v2, -inf  ;;  %v101_v13 = vld [vmem:[%s10862_s0 + $0x90] sm:$0xff]  ;;  %vm1382_vm2 = vcmask 195712  }
  0x3a   :  { %v388_v4 = vsel %vm339_vm0, %v99_v1, -inf  ;;  %485 = vmax.xlane.f32.xlu1 %v484_v3  ;;  %v391_v7 = vsel %vm339_vm0, %v100_v5, -inf  ;;  %v84_v8 = vld [vmem:[%s10862_s0 + $0x8] sm:$0xff]  ;;  %v83_v9 = vld [vmem:[%s10862_s0] sm:$0xff]  ;;  %v394_v15 = vsel %vm339_vm0, %v101_v13, -inf  ;;  %v133_v16 = vld [vmem:[%s10862_s0 + $0x190] sm:$0xff] }
  0x3b   :  { %389 = vmax.xlane.f32.xlu0 %v388_v4  ;;  %v343_v10 = vsel %vm339_vm0, %v84_v8, -inf  ;;  %v340_v11 = vsel %vm339_vm0, %v83_v9, -inf  ;;  %v115_v12 = vld [vmem:[%s10862_s0 + $0x100] sm:$0xff]  ;;  %v116_v17 = vld [vmem:[%s10862_s0 + $0x108] sm:$0xff]  ;;  %v490_v18 = vsel %vm339_vm0, %v133_v16, -inf  ;;  %v102_v24 = vld [vmem:[%s10862_s0 + $0x98] sm:$0xff] }
  0x3c   :  { %v436_v14 = vsel %vm339_vm0, %v115_v12, -inf  ;;  %v439_v19 = vsel %vm339_vm0, %v116_v17, -inf  ;;  %v164_v20 = vld [vmem:[%s10862_s0 + $0x288] sm:$0xff]  ;;  %v163_v21 = vld [vmem:[%s10862_s0 + $0x280] sm:$0xff]  ;;  %v85_v25 = vld [vmem:[%s10862_s0 + $0x10] sm:$0xff]  ;;  %v397_v26 = vsel %vm339_vm0, %v102_v24, -inf }
  0x3d   :  { %v583_v22 = vsel %vm339_vm0, %v164_v20, -inf  ;;  %v580_v23 = vsel %vm339_vm0, %v163_v21, -inf  ;;  %v346_v27 = vsel %vm339_vm0, %v85_v25, -inf  ;;  %v134_v28 = vld [vmem:[%s10862_s0 + $0x198] sm:$0xff]  ;;  %v117_v29 = vld [vmem:[%s10862_s0 + $0x110] sm:$0xff]  ;;  %v148_v32 = vld [vmem:[%s10862_s0 + $0x208] sm:$0xff] }
  0x3e   :  { %488 = vmax.xlane.f32.xlu1 %v487_v6  ;;  %v493_v30 = vsel %vm339_vm0, %v134_v28, -inf  ;;  %v442_v31 = vsel %vm339_vm0, %v117_v29, -inf  ;;  %v147_v33 = vld [vmem:[%s10862_s0 + $0x200] sm:$0xff]  ;;  %v535_v34 = vsel %vm339_vm0, %v148_v32, -inf  ;;  %v165_v37 = vld [vmem:[%s10862_s0 + $0x290] sm:$0xff]  ;;  %v86_v40 = vld [vmem:[%s10862_s0 + $0x18] sm:$0xff] }
  0x3f   :  { %392 = vmax.xlane.f32.xlu0 %v391_v7  ;;  %v532_v35 = vsel %vm339_vm0, %v147_v33, -inf  ;;  %v195_v36 = vld [vmem:[%s10862_s0 + $0x380] sm:$0xff]  ;;  %v586_v39 = vsel %vm339_vm0, %v165_v37, -inf  ;;  %v196_v41 = vld [vmem:[%s10862_s0 + $0x388] sm:$0xff]  ;;  %v349_v42 = vsel %vm339_vm0, %v86_v40, -inf  ;;  %v118_v44 = vld [vmem:[%s10862_s0 + $0x118] sm:$0xff] }
  0x40   :  { %v676_v38 = vsel %vm339_vm0, %v195_v36, -inf  ;;  %v679_v43 = vsel %vm339_vm0, %v196_v41, -inf  ;;  %v103_v45 = vld [vmem:[%s10862_s0 + $0xa0] sm:$0xff]  ;;  %v445_v46 = vsel %vm339_vm0, %v118_v44, -inf  ;;  %v149_v48 = vld [vmem:[%s10862_s0 + $0x210] sm:$0xff]  ;;  %v166_v53 = vld [vmem:[%s10862_s0 + $0x298] sm:$0xff] }
  0x41   :  { %v400_v47 = vsel %vm339_vm0, %v103_v45, -inf  ;;  %v135_v49 = vld [vmem:[%s10862_s0 + $0x1a0] sm:$0xff]  ;;  %v538_v50 = vsel %vm339_vm0, %v149_v48, -inf  ;;  %v589_v55 = vsel %vm339_vm0, %v166_v53, -inf  ;;  %v197_v56 = vld [vmem:[%s10862_s0 + $0x390] sm:$0xff]  ;;  %v180_v57 = vld [vmem:[%s10862_s0 + $0x308] sm:$0xff] }
  0x42   :  { %344 = vmax.xlane.f32.xlu1 %v343_v10  ;;  %v496_v51 = vsel %vm339_vm0, %v135_v49, -inf  ;;  %v179_v52 = vld [vmem:[%s10862_s0 + $0x300] sm:$0xff]  ;;  %v682_v58 = vsel %vm339_vm0, %v197_v56, -inf  ;;  %v631_v59 = vsel %vm339_vm0, %v180_v57, -inf  ;;  %v228_v60 = vld [vmem:[%s10862_s0 + $0x488] sm:$0xff]  ;;  %v150_v9 = vld [vmem:[%s10862_s0 + $0x218] sm:$0xff] }
  0x43   :  { %341 = vmax.xlane.f32.xlu0 %v340_v11  ;;  %v628_v54 = vsel %vm339_vm0, %v179_v52, -inf  ;;  %v227_v61 = vld [vmem:[%s10862_s0 + $0x480] sm:$0xff]  ;;  %v775_v62 = vsel %vm339_vm0, %v228_v60, -inf  ;;  %v104_v0 = vld [vmem:[%s10862_s0 + $0xa8] sm:$0xff]  ;;  %v541_v11 = vsel %vm339_vm0, %v150_v9, -inf  ;;  %v198_v12 = vld [vmem:[%s10862_s0 + $0x398] sm:$0xff] }
  0x44   :  { %v772_v63 = vsel %vm339_vm0, %v227_v61, -inf  ;;  %v87_v1 = vld [vmem:[%s10862_s0 + $0x20] sm:$0xff]  ;;  %v403_v2 = vsel %vm339_vm0, %v104_v0, -inf  ;;  %v136_v4 = vld [vmem:[%s10862_s0 + $0x1a8] sm:$0xff]  ;;  %v181_v13 = vld [vmem:[%s10862_s0 + $0x310] sm:$0xff]  ;;  %vm1389_vm3 = vcmask 261312  }
  0x45   :  { %v352_v3 = vsel %vm339_vm0, %v87_v1, -inf  ;;  %v119_v5 = vld [vmem:[%s10862_s0 + $0x120] sm:$0xff]  ;;  %v499_v6 = vsel %vm339_vm0, %v136_v4, -inf  ;;  %v212_v16 = vld [vmem:[%s10862_s0 + $0x408] sm:$0xff]  ;;  %v229_v21 = vld [vmem:[%s10862_s0 + $0x490] sm:$0xff]  ;;  %vm1396_vm4 = vcmask 326912  }
  0x46   :  { %437 = vmax.xlane.f32.xlu1 %v436_v14  ;;  %v448_v7 = vsel %vm339_vm0, %v119_v5, -inf  ;;  %v167_v8 = vld [vmem:[%s10862_s0 + $0x2a0] sm:$0xff]  ;;  %v685_v14 = vsel %vm339_vm0, %v198_v12, -inf  ;;  %v88_v24 = vld [vmem:[%s10862_s0 + $0x28] sm:$0xff]  ;;  %v105_v29 = vld [vmem:[%s10862_s0 + $0xb0] sm:$0xff]  ;;  %vm1403_vm5 = vcmask 392512  }
  0x47   :  { %395 = vmax.xlane.f32.xlu0 %v394_v15  ;;  %v592_v10 = vsel %vm339_vm0, %v167_v8, -inf  ;;  %v634_v15 = vsel %vm339_vm0, %v181_v13, -inf  ;;  %v211_v17 = vld [vmem:[%s10862_s0 + $0x400] sm:$0xff]  ;;  %v260_v25 = vld [vmem:[%s10862_s0 + $0x588] sm:$0xff]  ;;  %v137_v33 = vld [vmem:[%s10862_s0 + $0x1b0] sm:$0xff]  ;;  %vm1410_vm6 = vcmask 458112  }
  0x48   :  { %v259_v20 = vld [vmem:[%s10862_s0 + $0x580] sm:$0xff]  ;;  %v120_v28 = vld [vmem:[%s10862_s0 + $0x128] sm:$0xff]  ;;  %v182_v36 = vld [vmem:[%s10862_s0 + $0x318] sm:$0xff]  ;;  %vm1417_vm7 = vcmask 523712   ;;  %vm1424_vm8 = vcmask 589312   ;;  %vm1431_vm9 = vcmask 654912  }
  0x49   :  { %v151_v32 = vld [vmem:[%s10862_s0 + $0x220] sm:$0xff]  ;;  %v168_v37 = vld [vmem:[%s10862_s0 + $0x2a8] sm:$0xff]  ;;  %v213_v40 = vld [vmem:[%s10862_s0 + $0x410] sm:$0xff]  ;;  %vm1438_vm10 = vcmask 720512   ;;  %vm1445_vm11 = vcmask 786112   ;;  %vm1452_vm12 = vcmask 851712  }
  0x4a   :  { %491 = vmax.xlane.f32.xlu1 %v490_v18  ;;  %v727_v18 = vsel %vm339_vm0, %v212_v16, -inf  ;;  %v199_v41 = vld [vmem:[%s10862_s0 + $0x3a0] sm:$0xff]  ;;  %v230_v45 = vld [vmem:[%s10862_s0 + $0x498] sm:$0xff]  ;;  %v261_v48 = vld [vmem:[%s10862_s0 + $0x590] sm:$0xff]  ;;  %vm1459_vm13 = vcmask 917312   ;;  %vm1466_vm14 = vcmask 982912  }
  0x4b   :  { %440 = vmax.xlane.f32.xlu0 %v439_v19  ;;  %v724_v19 = vsel %vm339_vm0, %v211_v17, -inf  ;;  %v243_v44 = vld [vmem:[%s10862_s0 + $0x500] sm:$0xff]  ;;  %v244_v49 = vld [vmem:[%s10862_s0 + $0x508] sm:$0xff]  ;;  %v106_v56 = vld [vmem:[%s10862_s0 + $0xb8] sm:$0xff]  ;;  %vm1473_vm15 = vcmask 1048512  }
  0x4c   :  { %v292_v52 = vld [vmem:[%s10862_s0 + $0x688] sm:$0xff]  ;;  %v291_v53 = vld [vmem:[%s10862_s0 + $0x680] sm:$0xff]  ;;  %v89_v57 = vld [vmem:[%s10862_s0 + $0x30] sm:$0xff] }
  0x4d   :  { %v138_v60 = vld [vmem:[%s10862_s0 + $0x1b8] sm:$0xff]  ;;  %v121_v61 = vld [vmem:[%s10862_s0 + $0x130] sm:$0xff]  ;;  %v152_v1 = vld [vmem:[%s10862_s0 + $0x228] sm:$0xff] }
  0x4e   :  { %584 = vmax.xlane.f32.xlu1 %v583_v22  ;;  %v868_v22 = vsel %vm339_vm0, %v259_v20, -inf  ;;  %v169_v0 = vld [vmem:[%s10862_s0 + $0x2b0] sm:$0xff]  ;;  %v200_v4 = vld [vmem:[%s10862_s0 + $0x3a8] sm:$0xff]  ;;  %v183_v5 = vld [vmem:[%s10862_s0 + $0x320] sm:$0xff] }
  0x4f   :  { %581 = vmax.xlane.f32.xlu0 %v580_v23  ;;  %v778_v23 = vsel %vm339_vm0, %v229_v21, -inf  ;;  %v231_v8 = vld [vmem:[%s10862_s0 + $0x4a0] sm:$0xff]  ;;  %v214_v9 = vld [vmem:[%s10862_s0 + $0x418] sm:$0xff] }
  0x50   :  { %v733_v12 = vsel %vm339_vm0, %v214_v9, -inf  ;;  %v262_v13 = vld [vmem:[%s10862_s0 + $0x598] sm:$0xff]  ;;  %v275_v20 = vld [vmem:[%s10862_s0 + $0x600] sm:$0xff] }
  0x51   :  { %v877_v16 = vsel %vm339_vm0, %v262_v13, -inf }
  0x52   :  { %398 = vmax.xlane.f32.xlu1 %v397_v26  ;;  %v355_v26 = vsel %vm339_vm0, %v88_v24, -inf }
  0x53   :  { %347 = vmax.xlane.f32.xlu0 %v346_v27  ;;  %v871_v27 = vsel %vm339_vm0, %v260_v25, -inf  ;;  %v916_v25 = vsel %vm339_vm0, %v275_v20, -inf }
  0x56   :  { %494 = vmax.xlane.f32.xlu1 %v493_v30  ;;  %v451_v30 = vsel %vm339_vm0, %v120_v28, -inf  ;;  %v323_v28 = vld [vmem:[%s10862_s0 + $0x780] sm:$0xff] }
  0x57   :  { %443 = vmax.xlane.f32.xlu0 %v442_v31  ;;  %v406_v31 = vsel %vm339_vm0, %v105_v29, -inf  ;;  %v293_v29 = vld [vmem:[%s10862_s0 + $0x690] sm:$0xff] }
  0x5a   :  { %536 = vmax.xlane.f32.xlu1 %v535_v34  ;;  %v544_v34 = vsel %vm339_vm0, %v151_v32, -inf  ;;  %v1060_v32 = vsel %vm339_vm0, %v323_v28, -inf }
  0x5b   :  { %533 = vmax.xlane.f32.xlu0 %v532_v35  ;;  %v502_v35 = vsel %vm339_vm0, %v137_v33, -inf  ;;  %v970_v33 = vsel %vm339_vm0, %v293_v29, -inf  ;;  %v246_v29 = vld [vmem:[%s10862_s0 + $0x518] sm:$0xff] }
  0x5e   :  { %677 = vmax.xlane.f32.xlu1 %v676_v38  ;;  %v637_v38 = vsel %vm339_vm0, %v182_v36, -inf }
  0x5f   :  { %587 = vmax.xlane.f32.xlu0 %v586_v39  ;;  %v595_v39 = vsel %vm339_vm0, %v168_v37, -inf }
  0x62   :  { %350 = vmax.xlane.f32.xlu1 %v349_v42  ;;  %v730_v42 = vsel %vm339_vm0, %v213_v40, -inf  ;;  %v324_v40 = vld [vmem:[%s10862_s0 + $0x788] sm:$0xff] }
  0x63   :  { %680 = vmax.xlane.f32.xlu0 %v679_v43  ;;  %v688_v43 = vsel %vm339_vm0, %v199_v41, -inf }
  0x66   :  { %446 = vmax.xlane.f32.xlu1 %v445_v46  ;;  %v820_v46 = vsel %vm339_vm0, %v243_v44, -inf }
  0x67   :  { %401 = vmax.xlane.f32.xlu0 %v400_v47  ;;  %v781_v47 = vsel %vm339_vm0, %v230_v45, -inf }
  0x6a   :  { %539 = vmax.xlane.f32.xlu1 %v538_v50  ;;  %v874_v50 = vsel %vm339_vm0, %v261_v48, -inf }
  0x6b   :  { %497 = vmax.xlane.f32.xlu0 %v496_v51  ;;  %v823_v51 = vsel %vm339_vm0, %v244_v49, -inf }
  0x6e   :  { %629 = vmax.xlane.f32.xlu1 %v628_v54  ;;  %v967_v54 = vsel %vm339_vm0, %v292_v52, -inf }
  0x6f   :  { %590 = vmax.xlane.f32.xlu0 %v589_v55  ;;  %v964_v55 = vsel %vm339_vm0, %v291_v53, -inf }
  0x72   :  { %683 = vmax.xlane.f32.xlu1 %v682_v58  ;;  %v409_v58 = vsel %vm339_vm0, %v106_v56, -inf }
  0x73   :  { %632 = vmax.xlane.f32.xlu0 %v631_v59  ;;  %v358_v59 = vsel %vm339_vm0, %v89_v57, -inf }
  0x76   :  { %776 = vmax.xlane.f32.xlu1 %v775_v62  ;;  %v505_v62 = vsel %vm339_vm0, %v138_v60, -inf }
  0x77   :  { %773 = vmax.xlane.f32.xlu0 %v772_v63  ;;  %v454_v63 = vsel %vm339_vm0, %v121_v61, -inf }
  0x7a   :  { %404 = vmax.xlane.f32.xlu1 %v403_v2  ;;  %v598_v2 = vsel %vm339_vm0, %v169_v0, -inf }
  0x7b   :  { %353 = vmax.xlane.f32.xlu0 %v352_v3  ;;  %v547_v3 = vsel %vm339_vm0, %v152_v1, -inf }
  0x7e   :  { %500 = vmax.xlane.f32.xlu1 %v499_v6  ;;  %v691_v6 = vsel %vm339_vm0, %v200_v4, -inf  ;;  %v184_v4 = vld [vmem:[%s10862_s0 + $0x328] sm:$0xff] }
  0x7f   :  { %449 = vmax.xlane.f32.xlu0 %v448_v7  ;;  %v640_v7 = vsel %vm339_vm0, %v183_v5, -inf  ;;  %v170_v5 = vld [vmem:[%s10862_s0 + $0x2b8] sm:$0xff] }
  0x82   :  { %593 = vmax.xlane.f32.xlu1 %v592_v10  ;;  %v1364_v10 = vlaneseq }
  0x83   :  { %542 = vmax.xlane.f32.xlu0 %v541_v11  ;;  %v784_v11 = vsel %vm339_vm0, %v231_v8, -inf }
  0x86   :  { %686 = vmax.xlane.f32.xlu1 %v685_v14  ;;  %v245_v14 = vld [vmem:[%s10862_s0 + $0x510] sm:$0xff] }
  0x87   :  { %635 = vmax.xlane.f32.xlu0 %v634_v15  ;;  %v7957_v15 = vand.u32 127, %v1364_v10  ;;  %v826_v17 = vsel %vm339_vm0, %v245_v14, -inf }
  0x89   :  { %v1370_v21 = vadd.s32 4294967288, %v7957_v15 }
  0x8a   :  { %728 = vmax.xlane.f32.xlu1 %v727_v18  ;;  %v7961_v18 = vshrl.u32 %v1364_v10, 7 }
  0x8b   :  { %725 = vmax.xlane.f32.xlu0 %v724_v19  ;;  %v276_v19 = vld [vmem:[%s10862_s0 + $0x608] sm:$0xff] }
  0x8c   :  { %v919_v24 = vsel %vm339_vm0, %v276_v19, -inf  ;;  %v201_v19 = vld [vmem:[%s10862_s0 + $0x3b0] sm:$0xff] }
  0x8e   :  { %869 = vmax.xlane.f32.xlu1 %v868_v22 }
  0x8f   :  { %779 = vmax.xlane.f32.xlu0 %v778_v23 }
  0x92   :  { %356 = vmax.xlane.f32.xlu1 %v355_v26  ;;  %v7974_v26 = vsub.s32 %v7957_v15, %v7961_v18 }
  0x93   :  { %872 = vmax.xlane.f32.xlu0 %v871_v27  ;;  %v7977_v27 = vsub.s32 %v1370_v21, %v7961_v18 }
  0x96   :  { %452 = vmax.xlane.f32.xlu1 %v451_v30 }
  0x97   :  { %407 = vmax.xlane.f32.xlu0 %v406_v31 }
  0x9a   :  { %545 = vmax.xlane.f32.xlu1 %v544_v34  ;;  %v1377_v34 = vadd.s32 4294967280, %v7957_v15 }
  0x9b   :  { %503 = vmax.xlane.f32.xlu0 %v502_v35 }
  0x9c   :  { %v8005_v49 = vsub.s32 %v1377_v34, %v7961_v18 }
  0x9e   :  { %638 = vmax.xlane.f32.xlu1 %v637_v38 }
  0x9f   :  { %596 = vmax.xlane.f32.xlu0 %v595_v39  ;;  %v90_v39 = vld [vmem:[%s10862_s0 + $0x38] sm:$0xff] }
  0xa0   :  { %v361_v45 = vsel %vm339_vm0, %v90_v39, -inf  ;;  %v277_v39 = vld [vmem:[%s10862_s0 + $0x610] sm:$0xff] }
  0xa2   :  { %731 = vmax.xlane.f32.xlu1 %v730_v42 }
  0xa3   :  { %689 = vmax.xlane.f32.xlu0 %v688_v43 }
  0xa6   :  { %821 = vmax.xlane.f32.xlu1 %v820_v46  ;;  %v1063_v46 = vsel %vm339_vm0, %v324_v40, -inf  ;;  %v263_v40 = vld [vmem:[%s10862_s0 + $0x5a0] sm:$0xff] }
  0xa7   :  { %782 = vmax.xlane.f32.xlu0 %v781_v47 }
  0xaa   :  { %875 = vmax.xlane.f32.xlu1 %v874_v50  ;;  %v122_v50 = vld [vmem:[%s10862_s0 + $0x138] sm:$0xff] }
  0xab   :  { %824 = vmax.xlane.f32.xlu0 %v823_v51  ;;  %v107_v51 = vld [vmem:[%s10862_s0 + $0xc0] sm:$0xff] }
  0xac   :  { %v412_v56 = vsel %vm339_vm0, %v107_v51, -inf  ;;  %v294_v51 = vld [vmem:[%s10862_s0 + $0x698] sm:$0xff] }
  0xae   :  { %968 = vmax.xlane.f32.xlu1 %v967_v54 }
  0xaf   :  { %965 = vmax.xlane.f32.xlu0 %v964_v55  ;;  %v457_v55 = vsel %vm339_vm0, %v122_v50, -inf  ;;  %v307_v50 = vld [vmem:[%s10862_s0 + $0x700] sm:$0xff] }
  0xb2   :  { %410 = vmax.xlane.f32.xlu1 %v409_v58  ;;  %v153_v58 = vld [vmem:[%s10862_s0 + $0x230] sm:$0xff] }
  0xb3   :  { %359 = vmax.xlane.f32.xlu0 %v358_v59  ;;  %v139_v59 = vld [vmem:[%s10862_s0 + $0x1c0] sm:$0xff] }
  0xb4   :  { %v508_v0 = vsel %vm339_vm0, %v139_v59, -inf  ;;  %v308_v59 = vld [vmem:[%s10862_s0 + $0x708] sm:$0xff] }
  0xb6   :  { %506 = vmax.xlane.f32.xlu1 %v505_v62 }
  0xb7   :  { %455 = vmax.xlane.f32.xlu0 %v454_v63  ;;  %v550_v63 = vsel %vm339_vm0, %v153_v58, -inf  ;;  %v325_v58 = vld [vmem:[%s10862_s0 + $0x790] sm:$0xff] }
  0xba   :  { %599 = vmax.xlane.f32.xlu1 %v598_v2 }
  0xbb   :  { %548 = vmax.xlane.f32.xlu0 %v547_v3 }
  0xbe   :  { %692 = vmax.xlane.f32.xlu1 %v691_v6  ;;  %v1384_v6 = vadd.s32 4294967272, %v7957_v15 }
  0xbf   :  { %641 = vmax.xlane.f32.xlu0 %v640_v7 }
  0xc2   :  { %785 = vmax.xlane.f32.xlu1 %v784_v11  ;;  %v643_v11 = vsel %vm339_vm0, %v184_v4, -inf }
  0xc3   :  { %734 = vmax.xlane.f32.xlu0 %v733_v12  ;;  %v601_v12 = vsel %vm339_vm0, %v170_v5, -inf }
  0xc6   :  { %878 = vmax.xlane.f32.xlu1 %v877_v16  ;;  %v8043_v16 = vsub.s32 %v1384_v6, %v7961_v18  ;;  %v108_v6 = vld [vmem:[%s10862_s0 + $0xc8] sm:$0xff] }
  0xc7   :  { %827 = vmax.xlane.f32.xlu0 %v826_v17  ;;  %v486_v22 = vpop.xlane.xlu1 %485  ;;  %v215_v17 = vld [vmem:[%s10862_s0 + $0x420] sm:$0xff] }
  0xc8   :  { %v390_v23 = vpop.xlane.xlu0 %389  ;;  %v1636_v35 = vrot.slane %v486_v22, %v7974_v26 }
  0xc9   :  { %v1478_v36 = vrot.slane %v390_v23, %v7974_v26  ;;  %v736_v23 = vsel %vm339_vm0, %v215_v17, -inf }
  0xca   :  { %920 = vmax.xlane.f32.xlu1 %v919_v24  ;;  %v694_v24 = vsel %vm339_vm0, %v201_v19, -inf  ;;  %v140_v19 = vld [vmem:[%s10862_s0 + $0x1c8] sm:$0xff] }
  0xcb   :  { %917 = vmax.xlane.f32.xlu0 %v916_v25  ;;  %v489_v30 = vpop.xlane.xlu1 %488 }
  0xcc   :  { %v393_v31 = vpop.xlane.xlu0 %392  ;;  %v1640_v37 = vrot.slane %v489_v30, %v7977_v27  ;;  %v232_v30 = vld [vmem:[%s10862_s0 + $0x4a8] sm:$0xff] }
  0xcd   :  { %v1482_v38 = vrot.slane %v393_v31, %v7977_v27 }
  0xce   :  { %v1641_v41 = vsel %vm1375_vm1, %v1640_v37, %v1636_v35  ;;  %1061 = vmax.xlane.f32.xlu1 %v1060_v32  ;;  %v829_v35 = vsel %vm339_vm0, %v246_v29, -inf }
  0xcf   :  { %v1483_v42 = vsel %vm1375_vm1, %v1482_v38, %v1478_v36  ;;  %971 = vmax.xlane.f32.xlu0 %v970_v33  ;;  %v345_v43 = vpop.xlane.xlu1 %344  ;;  %v787_v36 = vsel %vm339_vm0, %v232_v30, -inf }
  0xd0   :  { %v342_v44 = vpop.xlane.xlu0 %341  ;;  %v1374_v47 = vrot.slane %v345_v43, %v7977_v27 }
  0xd1   :  { %v1369_v48 = vrot.slane %v342_v44, %v7974_v26 }
  0xd2   :  { %362 = vmax.xlane.f32.xlu1 %v361_v45  ;;  %v922_v45 = vsel %vm339_vm0, %v277_v39, -inf }
  0xd3   :  { %v1376_v52 = vsel %vm1375_vm1, %v1374_v47, %v1369_v48  ;;  %1064 = vmax.xlane.f32.xlu0 %v1063_v46  ;;  %v438_v53 = vpop.xlane.xlu1 %437  ;;  %v880_v46 = vsel %vm339_vm0, %v263_v40, -inf  ;;  %v202_v40 = vld [vmem:[%s10862_s0 + $0x3b8] sm:$0xff] }
  0xd4   :  { %v396_v54 = vpop.xlane.xlu0 %395  ;;  %v1557_v1 = vrot.slane %v438_v53, %v7974_v26 }
  0xd5   :  { %v1487_v57 = vrot.slane %v396_v54, %v8005_v49 }
  0xd6   :  { %458 = vmax.xlane.f32.xlu1 %v457_v55  ;;  %v1012_v55 = vsel %vm339_vm0, %v307_v50, -inf }
  0xd7   :  { %v1488_v60 = vsel %vm1382_vm2, %v1487_v57, %v1483_v42  ;;  %413 = vmax.xlane.f32.xlu0 %v412_v56  ;;  %v492_v61 = vpop.xlane.xlu1 %491  ;;  %v973_v56 = vsel %vm339_vm0, %v294_v51, -inf  ;;  %v233_v51 = vld [vmem:[%s10862_s0 + $0x4b0] sm:$0xff] }
  0xd8   :  { %v441_v62 = vpop.xlane.xlu0 %440  ;;  %v1645_v2 = vrot.slane %v492_v61, %v8005_v49 }
  0xd9   :  { %v1561_v3 = vrot.slane %v441_v62, %v7977_v27 }
  0xda   :  { %v1646_v7 = vsel %vm1382_vm2, %v1645_v2, %v1641_v41  ;;  %551 = vmax.xlane.f32.xlu1 %v550_v63 }
  0xdb   :  { %v1562_v8 = vsel %vm1375_vm1, %v1561_v3, %v1557_v1  ;;  %509 = vmax.xlane.f32.xlu0 %v508_v0  ;;  %v585_v9 = vpop.xlane.xlu1 %584  ;;  %v1066_v0 = vsel %vm339_vm0, %v325_v58, -inf  ;;  %v1015_v1 = vsel %vm339_vm0, %v308_v59, -inf  ;;  %v790_v58 = vsel %vm339_vm0, %v233_v51, -inf }
  0xdc   :  { %v582_v10 = vpop.xlane.xlu0 %581  ;;  %v1798_v13 = vrot.slane %v585_v9, %v7977_v27 }
  0xdd   :  { %v1794_v14 = vrot.slane %v582_v10, %v7974_v26 }
  0xde   :  { %644 = vmax.xlane.f32.xlu1 %v643_v11 }
  0xdf   :  { %v1799_v20 = vsel %vm1375_vm1, %v1798_v13, %v1794_v14  ;;  %602 = vmax.xlane.f32.xlu0 %v601_v12  ;;  %v399_v21 = vpop.xlane.xlu1 %398  ;;  %v415_v12 = vsel %vm339_vm0, %v108_v6, -inf }
  0xe0   :  { %v348_v22 = vpop.xlane.xlu0 %347  ;;  %v1492_v25 = vrot.slane %v399_v21, %v8043_v16 }
  0xe1   :  { %v1381_v28 = vrot.slane %v348_v22, %v8005_v49 }
  0xe2   :  { %v8063_v31 = vsel %vm1389_vm3, %v1492_v25, %v1488_v60  ;;  %737 = vmax.xlane.f32.xlu1 %v736_v23  ;;  %v1391_v60 = vadd.s32 4294967264, %v7957_v15  ;;  %v511_v25 = vsel %vm339_vm0, %v140_v19, -inf }
  0xe3   :  { %v1383_v32 = vsel %vm1382_vm2, %v1381_v28, %v1376_v52  ;;  %695 = vmax.xlane.f32.xlu0 %v694_v24  ;;  %v495_v33 = vpop.xlane.xlu1 %494 }
  0xe4   :  { %v444_v34 = vpop.xlane.xlu0 %443  ;;  %v1650_v37 = vrot.slane %v495_v33, %v8043_v16  ;;  %v8108_v5 = vsub.s32 %v1391_v60, %v7961_v18 }
  0xe5   :  { %v1566_v38 = vrot.slane %v444_v34, %v8005_v49 }
  0xe6   :  { %v8077_v41 = vsel %vm1389_vm3, %v1650_v37, %v1646_v7  ;;  %830 = vmax.xlane.f32.xlu1 %v829_v35  ;;  %v91_v7 = vld [vmem:[%s10862_s0 + $0x40] sm:$0xff] }
  0xe7   :  { %v1567_v42 = vsel %vm1382_vm2, %v1566_v38, %v1562_v8  ;;  %788 = vmax.xlane.f32.xlu0 %v787_v36  ;;  %v537_v43 = vpop.xlane.xlu1 %536  ;;  %v364_v13 = vsel %vm339_vm0, %v91_v7, -inf }
  0xe8   :  { %v534_v44 = vpop.xlane.xlu0 %533  ;;  %v1719_v47 = vrot.slane %v537_v43, %v7977_v27 }
  0xe9   :  { %v1715_v48 = vrot.slane %v534_v44, %v7974_v26 }
  0xea   :  { %923 = vmax.xlane.f32.xlu1 %v922_v45  ;;  %v697_v45 = vsel %vm339_vm0, %v202_v40, -inf }
  0xeb   :  { %v1720_v52 = vsel %vm1375_vm1, %v1719_v47, %v1715_v48  ;;  %881 = vmax.xlane.f32.xlu0 %v880_v46  ;;  %v678_v53 = vpop.xlane.xlu1 %677 }
  0xec   :  { %v588_v54 = vpop.xlane.xlu0 %587  ;;  %v1952_v2 = vrot.slane %v678_v53, %v7974_v26  ;;  %v1398_v53 = vadd.s32 4294967256, %v7957_v15 }
  0xed   :  { %v1803_v57 = vrot.slane %v588_v54, %v8005_v49 }
  0xee   :  { %1013 = vmax.xlane.f32.xlu1 %v1012_v55 }
  0xef   :  { %v1804_v61 = vsel %vm1382_vm2, %v1803_v57, %v1799_v20  ;;  %974 = vmax.xlane.f32.xlu0 %v973_v56  ;;  %v351_v62 = vpop.xlane.xlu1 %350  ;;  %v123_v20 = vld [vmem:[%s10862_s0 + $0x140] sm:$0xff] }
  0xf0   :  { %v681_v63 = vpop.xlane.xlu0 %680  ;;  %v1388_v3 = vrot.slane %v351_v62, %v8043_v16  ;;  %v460_v28 = vsel %vm339_vm0, %v123_v20, -inf  ;;  %v8181_v62 = vsub.s32 %v1398_v53, %v7961_v18 }
  0xf1   :  { %v1956_v4 = vrot.slane %v681_v63, %v7977_v27  ;;  %v264_v63 = vld [vmem:[%s10862_s0 + $0x5a8] sm:$0xff] }
  0xf2   :  { %v8117_v8 = vsel %vm1389_vm3, %v1388_v3, %v1383_v32  ;;  %1067 = vmax.xlane.f32.xlu1 %v1066_v0  ;;  %v171_v32 = vld [vmem:[%s10862_s0 + $0x2c0] sm:$0xff] }
  0xf3   :  { %v1957_v9 = vsel %vm1375_vm1, %v1956_v4, %v1952_v2  ;;  %1016 = vmax.xlane.f32.xlu0 %v1015_v1  ;;  %v447_v10 = vpop.xlane.xlu1 %446  ;;  %v604_v37 = vsel %vm339_vm0, %v171_v32, -inf  ;;  %v247_v0 = vld [vmem:[%s10862_s0 + $0x520] sm:$0xff]  ;;  %v883_v4 = vsel %vm339_vm0, %v264_v63, -inf }
  0xf4   :  { %v402_v11 = vpop.xlane.xlu0 %401  ;;  %v1571_v14 = vrot.slane %v447_v10, %v8043_v16  ;;  %v832_v6 = vsel %vm339_vm0, %v247_v0, -inf  ;;  %v295_v10 = vld [vmem:[%s10862_s0 + $0x6a0] sm:$0xff] }
  0xf5   :  { %v1497_v17 = vrot.slane %v402_v11, %v8108_v5  ;;  %v278_v11 = vld [vmem:[%s10862_s0 + $0x618] sm:$0xff]  ;;  %v976_v19 = vsel %vm339_vm0, %v295_v10, -inf  ;;  %v203_v0 = vld [vmem:[%s10862_s0 + $0x3c0] sm:$0xff] }
  0xf6   :  { %v8131_v21 = vsel %vm1389_vm3, %v1571_v14, %v1567_v42  ;;  %416 = vmax.xlane.f32.xlu1 %v415_v12  ;;  %v185_v42 = vld [vmem:[%s10862_s0 + $0x330] sm:$0xff]  ;;  %v925_v20 = vsel %vm339_vm0, %v278_v11, -inf }
  0xf7   :  { %v1498_v22 = vsel %vm1396_vm4, %v1497_v17, %v8063_v31  ;;  %365 = vmax.xlane.f32.xlu0 %v364_v13  ;;  %v540_v23 = vpop.xlane.xlu1 %539  ;;  %v154_v31 = vld [vmem:[%s10862_s0 + $0x238] sm:$0xff]  ;;  %v646_v46 = vsel %vm339_vm0, %v185_v42, -inf }
  0xf8   :  { %v498_v24 = vpop.xlane.xlu0 %497  ;;  %v1724_v29 = vrot.slane %v540_v23, %v8005_v49  ;;  %v553_v38 = vsel %vm339_vm0, %v154_v31, -inf }
  0xf9   :  { %v1655_v30 = vrot.slane %v498_v24, %v8108_v5 }
  0xfa   :  { %v8146_v33 = vsel %vm1382_vm2, %v1724_v29, %v1720_v52  ;;  %512 = vmax.xlane.f32.xlu1 %v511_v25  ;;  %v216_v52 = vld [vmem:[%s10862_s0 + $0x428] sm:$0xff] }
  0xfb   :  { %v1656_v34 = vsel %vm1396_vm4, %v1655_v30, %v8077_v41  ;;  %461 = vmax.xlane.f32.xlu0 %v460_v28  ;;  %v630_v35 = vpop.xlane.xlu1 %629  ;;  %v739_v59 = vsel %vm339_vm0, %v216_v52, -inf }
  0xfc   :  { %v591_v36 = vpop.xlane.xlu0 %590  ;;  %v1873_v47 = vrot.slane %v630_v35, %v7974_v26 }
  0xfd   :  { %v1808_v39 = vrot.slane %v591_v36, %v8043_v16 }
  0xfe   :  { %605 = vmax.xlane.f32.xlu1 %v604_v37 }
  0xff   :  { %v8160_v41 = vsel %vm1389_vm3, %v1808_v39, %v1804_v61  ;;  %554 = vmax.xlane.f32.xlu0 %v553_v38  ;;  %v684_v43 = vpop.xlane.xlu1 %683 }
 0x100   :  { %v633_v44 = vpop.xlane.xlu0 %632  ;;  %v1961_v48 = vrot.slane %v684_v43, %v8005_v49 }
 0x101   :  { %v1877_v50 = vrot.slane %v633_v44, %v7977_v27 }
 0x102   :  { %v1962_v54 = vsel %vm1382_vm2, %v1961_v48, %v1957_v9  ;;  %698 = vmax.xlane.f32.xlu1 %v697_v45 }
 0x103   :  { %v1878_v55 = vsel %vm1375_vm1, %v1877_v50, %v1873_v47  ;;  %647 = vmax.xlane.f32.xlu0 %v646_v46  ;;  %v777_v56 = vpop.xlane.xlu1 %776 }
 0x104   :  { %v774_v57 = vpop.xlane.xlu0 %773  ;;  %v2114_v60 = vrot.slane %v777_v56, %v7977_v27 }
 0x105   :  { %v2110_v61 = vrot.slane %v774_v57, %v7974_v26 }
 0x106   :  { %791 = vmax.xlane.f32.xlu1 %v790_v58 }
 0x107   :  { %v8190_v1 = vsel %vm1375_vm1, %v2114_v60, %v2110_v61  ;;  %740 = vmax.xlane.f32.xlu0 %v739_v59  ;;  %v405_v2 = vpop.xlane.xlu1 %404 }
 0x108   :  { %v354_v3 = vpop.xlane.xlu0 %353  ;;  %v1502_v7 = vrot.slane %v405_v2, %v8181_v62  ;;  %v186_v2 = vld [vmem:[%s10862_s0 + $0x338] sm:$0xff] }
 0x109   :  { %v1395_v9 = vrot.slane %v354_v3, %v8108_v5  ;;  %v1405_v3 = vadd.s32 4294967248, %v7957_v15  ;;  %v649_v10 = vsel %vm339_vm0, %v186_v2, -inf }
 0x10a   :  { %v8203_v12 = vsel %vm1403_vm5, %v1502_v7, %v1498_v22  ;;  %884 = vmax.xlane.f32.xlu1 %v883_v4  ;;  %v326_v22 = vld [vmem:[%s10862_s0 + $0x798] sm:$0xff] }
 0x10b   :  { %v8207_v13 = vsel %vm1396_vm4, %v1395_v9, %v8117_v8  ;;  %833 = vmax.xlane.f32.xlu0 %v832_v6  ;;  %v501_v14 = vpop.xlane.xlu1 %500  ;;  %v309_v8 = vld [vmem:[%s10862_s0 + $0x710] sm:$0xff]  ;;  %v1069_v32 = vsel %vm339_vm0, %v326_v22, -inf  ;;  %v700_v9 = vsel %vm339_vm0, %v203_v0, -inf }
 0x10c   :  { %v450_v17 = vpop.xlane.xlu0 %449  ;;  %v1660_v23 = vrot.slane %v501_v14, %v8181_v62  ;;  %v1018_v31 = vsel %vm339_vm0, %v309_v8, -inf }
 0x10d   :  { %v1576_v24 = vrot.slane %v450_v17, %v8108_v5 }
 0x10e   :  { %v8220_v25 = vsel %vm1403_vm5, %v1660_v23, %v1656_v34  ;;  %977 = vmax.xlane.f32.xlu1 %v976_v19  ;;  %v109_v34 = vld [vmem:[%s10862_s0 + $0xd0] sm:$0xff]  ;;  %v8293_v19 = vsub.s32 %v1405_v3, %v7961_v18 }
 0x10f   :  { %v8224_v28 = vsel %vm1396_vm4, %v1576_v24, %v8131_v21  ;;  %926 = vmax.xlane.f32.xlu0 %v925_v20  ;;  %v594_v29 = vpop.xlane.xlu1 %593  ;;  %v92_v21 = vld [vmem:[%s10862_s0 + $0x48] sm:$0xff]  ;;  %v418_v42 = vsel %vm339_vm0, %v109_v34, -inf  ;;  %v217_v20 = vld [vmem:[%s10862_s0 + $0x430] sm:$0xff] }
 0x110   :  { %v543_v30 = vpop.xlane.xlu0 %542  ;;  %v1813_v35 = vrot.slane %v594_v29, %v8108_v5  ;;  %v367_v43 = vsel %vm339_vm0, %v92_v21, -inf }
 0x111   :  { %v1729_v36 = vrot.slane %v543_v30, %v8043_v16  ;;  %v742_v30 = vsel %vm339_vm0, %v217_v20, -inf }
 0x112   :  { %v8238_v37 = vsel %vm1396_vm4, %v1813_v35, %v8160_v41  ;;  %1070 = vmax.xlane.f32.xlu1 %v1069_v32  ;;  %v141_v41 = vld [vmem:[%s10862_s0 + $0x1d0] sm:$0xff]  ;;  %v248_v35 = vld [vmem:[%s10862_s0 + $0x528] sm:$0xff] }
 0x113   :  { %v8242_v38 = vsel %vm1389_vm3, %v1729_v36, %v8146_v33  ;;  %1019 = vmax.xlane.f32.xlu0 %v1018_v31  ;;  %v687_v39 = vpop.xlane.xlu1 %686  ;;  %v124_v33 = vld [vmem:[%s10862_s0 + $0x148] sm:$0xff]  ;;  %v514_v51 = vsel %vm339_vm0, %v141_v41, -inf }
 0x114   :  { %v636_v40 = vpop.xlane.xlu0 %635  ;;  %v1966_v44 = vrot.slane %v687_v39, %v8043_v16  ;;  %v463_v52 = vsel %vm339_vm0, %v124_v33, -inf }
 0x115   :  { %v1882_v45 = vrot.slane %v636_v40, %v8005_v49 }
 0x116   :  { %v8255_v46 = vsel %vm1389_vm3, %v1966_v44, %v1962_v54  ;;  %419 = vmax.xlane.f32.xlu1 %v418_v42  ;;  %v172_v54 = vld [vmem:[%s10862_s0 + $0x2c8] sm:$0xff]  ;;  %v835_v42 = vsel %vm339_vm0, %v248_v35, -inf }
 0x117   :  { %v8258_v47 = vsel %vm1382_vm2, %v1882_v45, %v1878_v55  ;;  %368 = vmax.xlane.f32.xlu0 %v367_v43  ;;  %v729_v48 = vpop.xlane.xlu1 %728  ;;  %v155_v55 = vld [vmem:[%s10862_s0 + $0x240] sm:$0xff]  ;;  %v607_v60 = vsel %vm339_vm0, %v172_v54, -inf }
 0x118   :  { %v726_v50 = vpop.xlane.xlu0 %725  ;;  %v2035_v53 = vrot.slane %v729_v48, %v7977_v27  ;;  %v556_v61 = vsel %vm339_vm0, %v155_v55, -inf }
 0x119   :  { %v2031_v56 = vrot.slane %v726_v50, %v7974_v26 }
 0x11a   :  { %515 = vmax.xlane.f32.xlu1 %v514_v51 }
 0x11b   :  { %v8271_v57 = vsel %vm1375_vm1, %v2035_v53, %v2031_v56  ;;  %464 = vmax.xlane.f32.xlu0 %v463_v52  ;;  %v870_v58 = vpop.xlane.xlu1 %869 }
 0x11c   :  { %v780_v59 = vpop.xlane.xlu0 %779  ;;  %v2268_v11 = vrot.slane %v870_v58, %v7974_v26 }
 0x11d   :  { %v2119_v63 = vrot.slane %v780_v59, %v8005_v49 }
 0x11e   :  { %608 = vmax.xlane.f32.xlu1 %v607_v60 }
 0x11f   :  { %v8285_v4 = vsel %vm1382_vm2, %v2119_v63, %v8190_v1  ;;  %557 = vmax.xlane.f32.xlu0 %v556_v61  ;;  %v357_v6 = vpop.xlane.xlu1 %356  ;;  %v234_v1 = vld [vmem:[%s10862_s0 + $0x4b8] sm:$0xff] }
 0x120   :  { %v873_v7 = vpop.xlane.xlu0 %872  ;;  %v1402_v14 = vrot.slane %v357_v6, %v8181_v62  ;;  %v793_v29 = vsel %vm339_vm0, %v234_v1, -inf }
 0x121   :  { %v2272_v17 = vrot.slane %v873_v7, %v7977_v27 }
 0x122   :  { %v8303_v23 = vsel %vm1403_vm5, %v1402_v14, %v8207_v13  ;;  %701 = vmax.xlane.f32.xlu1 %v700_v9  ;;  %v265_v13 = vld [vmem:[%s10862_s0 + $0x5b0] sm:$0xff] }
 0x123   :  { %v8306_v24 = vsel %vm1375_vm1, %v2272_v17, %v2268_v11  ;;  %650 = vmax.xlane.f32.xlu0 %v649_v10  ;;  %v453_v22 = vpop.xlane.xlu1 %452  ;;  %v886_v40 = vsel %vm339_vm0, %v265_v13, -inf  ;;  %v142_v11 = vld [vmem:[%s10862_s0 + $0x1d8] sm:$0xff] }
 0x124   :  { %v408_v8 = vpop.xlane.xlu0 %407  ;;  %v1581_v32 = vrot.slane %v453_v22, %v8181_v62  ;;  %v517_v1 = vsel %vm339_vm0, %v142_v11, -inf }
 0x125   :  { %v1507_v31 = vrot.slane %v408_v8, %v8293_v19 }
 0x126   :  { %v8320_v36 = vsel %vm1403_vm5, %v1581_v32, %v8224_v28  ;;  %794 = vmax.xlane.f32.xlu1 %v793_v29  ;;  %v296_v28 = vld [vmem:[%s10862_s0 + $0x6a8] sm:$0xff]  ;;  %v1412_v32 = vadd.s32 4294967240, %v7957_v15 }
 0x127   :  { %v8324_v34 = vsel %vm1410_vm6, %v1507_v31, %v8203_v12  ;;  %743 = vmax.xlane.f32.xlu0 %v742_v30  ;;  %v546_v21 = vpop.xlane.xlu1 %545  ;;  %v279_v12 = vld [vmem:[%s10862_s0 + $0x620] sm:$0xff]  ;;  %v979_v50 = vsel %vm339_vm0, %v296_v28, -inf  ;;  %v173_v30 = vld [vmem:[%s10862_s0 + $0x2d0] sm:$0xff] }
 0x128   :  { %v504_v39 = vpop.xlane.xlu0 %503  ;;  %v1734_v43 = vrot.slane %v546_v21, %v8108_v5  ;;  %v928_v51 = vsel %vm339_vm0, %v279_v12, -inf  ;;  %v187_v28 = vld [vmem:[%s10862_s0 + $0x340] sm:$0xff] }
 0x129   :  { %v1665_v44 = vrot.slane %v504_v39, %v8293_v19  ;;  %v610_v39 = vsel %vm339_vm0, %v173_v30, -inf }
 0x12a   :  { %v8338_v45 = vsel %vm1396_vm4, %v1734_v43, %v8242_v38  ;;  %887 = vmax.xlane.f32.xlu1 %v886_v40  ;;  %v327_v38 = vld [vmem:[%s10862_s0 + $0x7a0] sm:$0xff] }
 0x12b   :  { %v8342_v41 = vsel %vm1410_vm6, %v1665_v44, %v8220_v25  ;;  %836 = vmax.xlane.f32.xlu0 %v835_v42  ;;  %v639_v33 = vpop.xlane.xlu1 %638  ;;  %v310_v25 = vld [vmem:[%s10862_s0 + $0x718] sm:$0xff]  ;;  %v1072_v59 = vsel %vm339_vm0, %v327_v38, -inf  ;;  %v8417_v44 = vsub.s32 %v1412_v32, %v7961_v18  ;;  %v235_v38 = vld [vmem:[%s10862_s0 + $0x4c0] sm:$0xff] }
 0x12c   :  { %v597_v48 = vpop.xlane.xlu0 %596  ;;  %v1887_v52 = vrot.slane %v639_v33, %v8043_v16  ;;  %v1021_v60 = vsel %vm339_vm0, %v310_v25, -inf  ;;  %v218_v25 = vld [vmem:[%s10862_s0 + $0x438] sm:$0xff] }
 0x12d   :  { %v1818_v53 = vrot.slane %v597_v48, %v8181_v62 }
 0x12e   :  { %v8356_v56 = vsel %vm1389_vm3, %v1887_v52, %v8258_v47  ;;  %980 = vmax.xlane.f32.xlu1 %v979_v50  ;;  %v110_v47 = vld [vmem:[%s10862_s0 + $0xd8] sm:$0xff] }
 0x12f   :  { %v8360_v54 = vsel %vm1403_vm5, %v1818_v53, %v8238_v37  ;;  %929 = vmax.xlane.f32.xlu0 %v928_v51  ;;  %v732_v55 = vpop.xlane.xlu1 %731  ;;  %v93_v37 = vld [vmem:[%s10862_s0 + $0x50] sm:$0xff]  ;;  %v421_v7 = vsel %vm339_vm0, %v110_v47, -inf  ;;  %v652_v51 = vsel %vm339_vm0, %v187_v28, -inf }
 0x130   :  { %v690_v58 = vpop.xlane.xlu0 %689  ;;  %v2040_v61 = vrot.slane %v732_v55, %v8005_v49  ;;  %v370_v9 = vsel %vm339_vm0, %v93_v37, -inf }
 0x131   :  { %v1971_v63 = vrot.slane %v690_v58, %v8108_v5 }
 0x132   :  { %v8374_v0 = vsel %vm1382_vm2, %v2040_v61, %v8271_v57  ;;  %1073 = vmax.xlane.f32.xlu1 %v1072_v59  ;;  %v125_v57 = vld [vmem:[%s10862_s0 + $0x150] sm:$0xff]  ;;  %v796_v61 = vsel %vm339_vm0, %v235_v38, -inf }
 0x133   :  { %v8378_v2 = vsel %vm1396_vm4, %v1971_v63, %v8255_v46  ;;  %1022 = vmax.xlane.f32.xlu0 %v1021_v60  ;;  %v822_v3 = vpop.xlane.xlu1 %821  ;;  %v466_v20 = vsel %vm339_vm0, %v125_v57, -inf  ;;  %v745_v63 = vsel %vm339_vm0, %v218_v25, -inf }
 0x134   :  { %v783_v6 = vpop.xlane.xlu0 %782  ;;  %v2189_v22 = vrot.slane %v822_v3, %v7974_v26 }
 0x135   :  { %v2124_v10 = vrot.slane %v783_v6, %v8043_v16 }
 0x136   :  { %422 = vmax.xlane.f32.xlu1 %v421_v7 }
 0x137   :  { %v8391_v46 = vsel %vm1389_vm3, %v2124_v10, %v8285_v4  ;;  %371 = vmax.xlane.f32.xlu0 %v370_v9  ;;  %v876_v14 = vpop.xlane.xlu1 %875  ;;  %v156_v4 = vld [vmem:[%s10862_s0 + $0x248] sm:$0xff] }
 0x138   :  { %v825_v17 = vpop.xlane.xlu0 %824  ;;  %v2277_v8 = vrot.slane %v876_v14, %v8005_v49  ;;  %v559_v40 = vsel %vm339_vm0, %v156_v4, -inf }
 0x139   :  { %v2193_v29 = vrot.slane %v825_v17, %v7977_v27 }
 0x13a   :  { %v8407_v31 = vsel %vm1382_vm2, %v2277_v8, %v8306_v24  ;;  %518 = vmax.xlane.f32.xlu1 %v517_v1  ;;  %v204_v24 = vld [vmem:[%s10862_s0 + $0x3c8] sm:$0xff] }
 0x13b   :  { %v8410_v13 = vsel %vm1375_vm1, %v2193_v29, %v2189_v22  ;;  %467 = vmax.xlane.f32.xlu0 %v466_v20  ;;  %v969_v35 = vpop.xlane.xlu1 %968  ;;  %v703_v50 = vsel %vm339_vm0, %v204_v24, -inf }
 0x13c   :  { %v966_v21 = vpop.xlane.xlu0 %965  ;;  %v2430_v42 = vrot.slane %v969_v35, %v7977_v27 }
 0x13d   :  { %v2426_v43 = vrot.slane %v966_v21, %v7974_v26 }
 0x13e   :  { %611 = vmax.xlane.f32.xlu1 %v610_v39 }
 0x13f   :  { %v8426_v12 = vsel %vm1375_vm1, %v2430_v42, %v2426_v43  ;;  %560 = vmax.xlane.f32.xlu0 %v559_v40  ;;  %v411_v33 = vpop.xlane.xlu1 %410 }
 0x140   :  { %v360_v48 = vpop.xlane.xlu0 %359  ;;  %v1512_v52 = vrot.slane %v411_v33, %v8417_v44 }
 0x141   :  { %v1409_v53 = vrot.slane %v360_v48, %v8293_v19 }
 0x142   :  { %v8440_v55 = vsel %vm1417_vm7, %v1512_v52, %v8324_v34  ;;  %704 = vmax.xlane.f32.xlu1 %v703_v50  ;;  %v266_v34 = vld [vmem:[%s10862_s0 + $0x5b8] sm:$0xff] }
 0x143   :  { %v8444_v58 = vsel %vm1410_vm6, %v1409_v53, %v8303_v23  ;;  %653 = vmax.xlane.f32.xlu0 %v652_v51  ;;  %v507_v59 = vpop.xlane.xlu1 %506  ;;  %v249_v23 = vld [vmem:[%s10862_s0 + $0x530] sm:$0xff]  ;;  %v889_v10 = vsel %vm339_vm0, %v266_v34, -inf }
 0x144   :  { %v456_v60 = vpop.xlane.xlu0 %455  ;;  %v1670_v47 = vrot.slane %v507_v59, %v8417_v44  ;;  %v838_v11 = vsel %vm339_vm0, %v249_v23, -inf }
 0x145   :  { %v1586_v37 = vrot.slane %v456_v60, %v8293_v19 }
 0x146   :  { %v8458_v3 = vsel %vm1417_vm7, %v1670_v47, %v8342_v41  ;;  %797 = vmax.xlane.f32.xlu1 %v796_v61  ;;  %v297_v41 = vld [vmem:[%s10862_s0 + $0x6b0] sm:$0xff] }
 0x147   :  { %v8462_v6 = vsel %vm1410_vm6, %v1586_v37, %v8320_v36  ;;  %746 = vmax.xlane.f32.xlu0 %v745_v63  ;;  %v600_v7 = vpop.xlane.xlu1 %599  ;;  %v280_v36 = vld [vmem:[%s10862_s0 + $0x628] sm:$0xff]  ;;  %v982_v8 = vsel %vm339_vm0, %v297_v41, -inf }
 0x148   :  { %v549_v9 = vpop.xlane.xlu0 %548  ;;  %v1823_v57 = vrot.slane %v600_v7, %v8293_v19  ;;  %v931_v29 = vsel %vm339_vm0, %v280_v36, -inf  ;;  %v188_v41 = vld [vmem:[%s10862_s0 + $0x348] sm:$0xff]  ;;  %v1419_v36 = vadd.s32 4294967232, %v7957_v15 }
 0x149   :  { %v1739_v14 = vrot.slane %v549_v9, %v8181_v62 }
 0x14a   :  { %v8476_v17 = vsel %vm1410_vm6, %v1823_v57, %v8360_v54  ;;  %890 = vmax.xlane.f32.xlu1 %v889_v10  ;;  %v328_v54 = vld [vmem:[%s10862_s0 + $0x7a8] sm:$0xff] }
 0x14b   :  { %v8480_v1 = vsel %vm1403_vm5, %v1739_v14, %v8338_v45  ;;  %839 = vmax.xlane.f32.xlu0 %v838_v11  ;;  %v693_v20 = vpop.xlane.xlu1 %692  ;;  %v311_v45 = vld [vmem:[%s10862_s0 + $0x720] sm:$0xff]  ;;  %v1075_v40 = vsel %vm339_vm0, %v328_v54, -inf  ;;  %v205_v14 = vld [vmem:[%s10862_s0 + $0x3d0] sm:$0xff] }
 0x14c   :  { %v642_v22 = vpop.xlane.xlu0 %641  ;;  %v1976_v30 = vrot.slane %v693_v20, %v8181_v62  ;;  %v1024_v42 = vsel %vm339_vm0, %v311_v45, -inf }
 0x14d   :  { %v1892_v4 = vrot.slane %v642_v22, %v8108_v5 }
 0x14e   :  { %v8494_v32 = vsel %vm1403_vm5, %v1976_v30, %v8378_v2  ;;  %983 = vmax.xlane.f32.xlu1 %v982_v8  ;;  %v111_v2 = vld [vmem:[%s10862_s0 + $0xe0] sm:$0xff]  ;;  %v655_v30 = vsel %vm339_vm0, %v188_v41, -inf }
 0x14f   :  { %v8498_v35 = vsel %vm1396_vm4, %v1892_v4, %v8356_v56  ;;  %932 = vmax.xlane.f32.xlu0 %v931_v29  ;;  %v786_v21 = vpop.xlane.xlu1 %785  ;;  %v94_v56 = vld [vmem:[%s10862_s0 + $0x58] sm:$0xff]  ;;  %v424_v51 = vsel %vm339_vm0, %v111_v2, -inf  ;;  %v706_v29 = vsel %vm339_vm0, %v205_v14, -inf }
 0x150   :  { %v735_v39 = vpop.xlane.xlu0 %734  ;;  %v2129_v43 = vrot.slane %v786_v21, %v8108_v5  ;;  %v373_v52 = vsel %vm339_vm0, %v94_v56, -inf  ;;  %v8569_v21 = vsub.s32 %v1419_v36, %v7961_v18 }
 0x151   :  { %v2045_v24 = vrot.slane %v735_v39, %v8043_v16  ;;  %v219_v39 = vld [vmem:[%s10862_s0 + $0x440] sm:$0xff] }
 0x152   :  { %v8512_v28 = vsel %vm1396_vm4, %v2129_v43, %v8391_v46  ;;  %1076 = vmax.xlane.f32.xlu1 %v1075_v40  ;;  %v143_v46 = vld [vmem:[%s10862_s0 + $0x1e0] sm:$0xff]  ;;  %v748_v56 = vsel %vm339_vm0, %v219_v39, -inf }
 0x153   :  { %v8516_v33 = vsel %vm1389_vm3, %v2045_v24, %v8374_v0  ;;  %1025 = vmax.xlane.f32.xlu0 %v1024_v42  ;;  %v879_v48 = vpop.xlane.xlu1 %878  ;;  %v126_v0 = vld [vmem:[%s10862_s0 + $0x158] sm:$0xff]  ;;  %v520_v63 = vsel %vm339_vm0, %v143_v46, -inf }
 0x154   :  { %v828_v50 = vpop.xlane.xlu0 %827  ;;  %v2282_v53 = vrot.slane %v879_v48, %v8043_v16  ;;  %v469_v47 = vsel %vm339_vm0, %v126_v0, -inf }
 0x155   :  { %v2198_v38 = vrot.slane %v828_v50, %v8005_v49 }
 0x156   :  { %v8530_v25 = vsel %vm1389_vm3, %v2282_v53, %v8407_v31  ;;  %425 = vmax.xlane.f32.xlu1 %v424_v51  ;;  %v174_v31 = vld [vmem:[%s10862_s0 + $0x2d8] sm:$0xff] }
 0x157   :  { %v8534_v59 = vsel %vm1382_vm2, %v2198_v38, %v8410_v13  ;;  %374 = vmax.xlane.f32.xlu0 %v373_v52  ;;  %v921_v60 = vpop.xlane.xlu1 %920  ;;  %v157_v13 = vld [vmem:[%s10862_s0 + $0x250] sm:$0xff]  ;;  %v613_v10 = vsel %vm339_vm0, %v174_v31, -inf  ;;  %v250_v51 = vld [vmem:[%s10862_s0 + $0x538] sm:$0xff] }
 0x158   :  { %v918_v61 = vpop.xlane.xlu0 %917  ;;  %v2351_v37 = vrot.slane %v921_v60, %v7977_v27  ;;  %v562_v11 = vsel %vm339_vm0, %v157_v13, -inf  ;;  %v841_v60 = vsel %vm339_vm0, %v250_v51, -inf }
 0x159   :  { %v2347_v34 = vrot.slane %v918_v61, %v7974_v26 }
 0x15a   :  { %521 = vmax.xlane.f32.xlu1 %v520_v63 }
 0x15b   :  { %v8547_v23 = vsel %vm1375_vm1, %v2351_v37, %v2347_v34  ;;  %470 = vmax.xlane.f32.xlu0 %v469_v47  ;;  %v1062_v7 = vpop.xlane.xlu1 %1061 }
 0x15c   :  { %v972_v9 = vpop.xlane.xlu0 %971  ;;  %v2584_v4 = vrot.slane %v1062_v7, %v7974_v26 }
 0x15d   :  { %v2435_v57 = vrot.slane %v972_v9, %v8005_v49 }
 0x15e   :  { %614 = vmax.xlane.f32.xlu1 %v613_v10 }
 0x15f   :  { %v8561_v20 = vsel %vm1382_vm2, %v2435_v57, %v8426_v12  ;;  %563 = vmax.xlane.f32.xlu0 %v562_v11  ;;  %v363_v22 = vpop.xlane.xlu1 %362  ;;  %v236_v12 = vld [vmem:[%s10862_s0 + $0x4c8] sm:$0xff] }
 0x160   :  { %v1065_v8 = vpop.xlane.xlu0 %1064  ;;  %v1416_v54 = vrot.slane %v363_v22, %v8417_v44  ;;  %v799_v2 = vsel %vm339_vm0, %v236_v12, -inf }
 0x161   :  { %v2588_v45 = vrot.slane %v1065_v8, %v7977_v27 }
 0x162   :  { %v8579_v40 = vsel %vm1417_vm7, %v1416_v54, %v8444_v58  ;;  %707 = vmax.xlane.f32.xlu1 %v706_v29  ;;  %v267_v58 = vld [vmem:[%s10862_s0 + $0x5c0] sm:$0xff] }
 0x163   :  { %v8582_v42 = vsel %vm1375_vm1, %v2588_v45, %v2584_v4  ;;  %656 = vmax.xlane.f32.xlu0 %v655_v30  ;;  %v459_v43 = vpop.xlane.xlu1 %458  ;;  %v892_v0 = vsel %vm339_vm0, %v267_v58, -inf }
 0x164   :  { %v414_v24 = vpop.xlane.xlu0 %413  ;;  %v1591_v48 = vrot.slane %v459_v43, %v8417_v44 }
 0x165   :  { %v1517_v50 = vrot.slane %v414_v24, %v8569_v21 }
 0x166   :  { %v8596_v52 = vsel %vm1417_vm7, %v1591_v48, %v8462_v6  ;;  %800 = vmax.xlane.f32.xlu1 %v799_v2  ;;  %v298_v6 = vld [vmem:[%s10862_s0 + $0x6b8] sm:$0xff] }
 0x167   :  { %v8600_v53 = vsel %vm1424_vm8, %v1517_v50, %v8440_v55  ;;  %749 = vmax.xlane.f32.xlu0 %v748_v56  ;;  %v552_v38 = vpop.xlane.xlu1 %551  ;;  %v281_v55 = vld [vmem:[%s10862_s0 + $0x630] sm:$0xff]  ;;  %v985_v13 = vsel %vm339_vm0, %v298_v6, -inf }
 0x168   :  { %v510_v46 = vpop.xlane.xlu0 %509  ;;  %v1744_v61 = vrot.slane %v552_v38, %v8293_v19  ;;  %v934_v7 = vsel %vm339_vm0, %v281_v55, -inf }
 0x169   :  { %v1675_v63 = vrot.slane %v510_v46, %v8569_v21 }
 0x16a   :  { %v8614_v47 = vsel %vm1410_vm6, %v1744_v61, %v8480_v1  ;;  %893 = vmax.xlane.f32.xlu1 %v892_v0  ;;  %v329_v1 = vld [vmem:[%s10862_s0 + $0x7b0] sm:$0xff] }
 0x16b   :  { %v8618_v37 = vsel %vm1424_vm8, %v1675_v63, %v8458_v3  ;;  %842 = vmax.xlane.f32.xlu0 %v841_v60  ;;  %v645_v34 = vpop.xlane.xlu1 %644  ;;  %v312_v3 = vld [vmem:[%s10862_s0 + $0x728] sm:$0xff]  ;;  %v1078_v36 = vsel %vm339_vm0, %v329_v1, -inf }
 0x16c   :  { %v603_v31 = vpop.xlane.xlu0 %602  ;;  %v1897_v9 = vrot.slane %v645_v34, %v8181_v62  ;;  %v1027_v22 = vsel %vm339_vm0, %v312_v3, -inf }
 0x16d   :  { %v1828_v10 = vrot.slane %v603_v31, %v8417_v44  ;;  %v206_v31 = vld [vmem:[%s10862_s0 + $0x3d8] sm:$0xff] }
 0x16e   :  { %v8632_v11 = vsel %vm1403_vm5, %v1897_v9, %v8498_v35  ;;  %986 = vmax.xlane.f32.xlu1 %v985_v13  ;;  %v112_v35 = vld [vmem:[%s10862_s0 + $0xe8] sm:$0xff] }
 0x16f   :  { %v8636_v57 = vsel %vm1417_vm7, %v1828_v10, %v8476_v17  ;;  %935 = vmax.xlane.f32.xlu0 %v934_v7  ;;  %v738_v14 = vpop.xlane.xlu1 %737  ;;  %v95_v17 = vld [vmem:[%s10862_s0 + $0x60] sm:$0xff]  ;;  %v427_v12 = vsel %vm339_vm0, %v112_v35, -inf  ;;  %v709_v10 = vsel %vm339_vm0, %v206_v31, -inf }
 0x170   :  { %v696_v41 = vpop.xlane.xlu0 %695  ;;  %v2050_v8 = vrot.slane %v738_v14, %v8108_v5  ;;  %v376_v39 = vsel %vm339_vm0, %v95_v17, -inf }
 0x171   :  { %v1981_v29 = vrot.slane %v696_v41, %v8293_v19 }
 0x172   :  { %v8650_v30 = vsel %vm1396_vm4, %v2050_v8, %v8516_v33  ;;  %1079 = vmax.xlane.f32.xlu1 %v1078_v36  ;;  %v144_v33 = vld [vmem:[%s10862_s0 + $0x1e8] sm:$0xff] }
 0x173   :  { %v8654_v4 = vsel %vm1410_vm6, %v1981_v29, %v8494_v32  ;;  %1028 = vmax.xlane.f32.xlu0 %v1027_v22  ;;  %v831_v54 = vpop.xlane.xlu1 %830  ;;  %v127_v32 = vld [vmem:[%s10862_s0 + $0x160] sm:$0xff]  ;;  %v523_v58 = vsel %vm339_vm0, %v144_v33, -inf  ;;  %v220_v22 = vld [vmem:[%s10862_s0 + $0x448] sm:$0xff] }
 0x174   :  { %v789_v45 = vpop.xlane.xlu0 %788  ;;  %v2203_v43 = vrot.slane %v831_v54, %v8043_v16  ;;  %v472_v51 = vsel %vm339_vm0, %v127_v32, -inf  ;;  %v751_v17 = vsel %vm339_vm0, %v220_v22, -inf }
 0x175   :  { %v2134_v24 = vrot.slane %v789_v45, %v8181_v62 }
 0x176   :  { %v8668_v2 = vsel %vm1389_vm3, %v2203_v43, %v8534_v59  ;;  %428 = vmax.xlane.f32.xlu1 %v427_v12  ;;  %v175_v59 = vld [vmem:[%s10862_s0 + $0x2e0] sm:$0xff] }
 0x177   :  { %v8672_v56 = vsel %vm1403_vm5, %v2134_v24, %v8512_v28  ;;  %377 = vmax.xlane.f32.xlu0 %v376_v39  ;;  %v924_v48 = vpop.xlane.xlu1 %923  ;;  %v158_v28 = vld [vmem:[%s10862_s0 + $0x258] sm:$0xff]  ;;  %v616_v6 = vsel %vm339_vm0, %v175_v59, -inf  ;;  %v251_v12 = vld [vmem:[%s10862_s0 + $0x540] sm:$0xff] }
 0x178   :  { %v882_v50 = vpop.xlane.xlu0 %881  ;;  %v2356_v38 = vrot.slane %v924_v48, %v8005_v49  ;;  %v565_v55 = vsel %vm339_vm0, %v158_v28, -inf  ;;  %v844_v48 = vsel %vm339_vm0, %v251_v12, -inf }
 0x179   :  { %v2287_v46 = vrot.slane %v882_v50, %v8108_v5 }
 0x17a   :  { %v8686_v0 = vsel %vm1382_vm2, %v2356_v38, %v8547_v23  ;;  %524 = vmax.xlane.f32.xlu1 %v523_v58  ;;  %v189_v23 = vld [vmem:[%s10862_s0 + $0x350] sm:$0xff] }
 0x17b   :  { %v8690_v60 = vsel %vm1396_vm4, %v2287_v46, %v8530_v25  ;;  %473 = vmax.xlane.f32.xlu0 %v472_v51  ;;  %v1014_v61 = vpop.xlane.xlu1 %1013  ;;  %v1426_v25 = vadd.s32 4294967224, %v7957_v15  ;;  %v658_v1 = vsel %vm339_vm0, %v189_v23, -inf }
 0x17c   :  { %v975_v63 = vpop.xlane.xlu0 %974  ;;  %v2505_v3 = vrot.slane %v1014_v61, %v7974_v26 }
 0x17d   :  { %v2440_v34 = vrot.slane %v975_v63, %v8043_v16  ;;  %v8712_v36 = vsub.s32 %v1426_v25, %v7961_v18 }
 0x17e   :  { %617 = vmax.xlane.f32.xlu1 %v616_v6 }
 0x17f   :  { %v8704_v13 = vsel %vm1389_vm3, %v2440_v34, %v8561_v20  ;;  %566 = vmax.xlane.f32.xlu0 %v565_v55  ;;  %v1068_v7 = vpop.xlane.xlu1 %1067  ;;  %v237_v20 = vld [vmem:[%s10862_s0 + $0x4d0] sm:$0xff] }
 0x180   :  { %v1017_v9 = vpop.xlane.xlu0 %1016  ;;  %v2593_v14 = vrot.slane %v1068_v7, %v8005_v49  ;;  %v802_v35 = vsel %vm339_vm0, %v237_v20, -inf }
 0x181   :  { %v2509_v41 = vrot.slane %v1017_v9, %v7977_v27 }
 0x182   :  { %v8722_v8 = vsel %vm1382_vm2, %v2593_v14, %v8582_v42  ;;  %710 = vmax.xlane.f32.xlu1 %v709_v10  ;;  %v268_v42 = vld [vmem:[%s10862_s0 + $0x5c8] sm:$0xff] }
 0x183   :  { %v8725_v26 = vsel %vm1375_vm1, %v2509_v41, %v2505_v3  ;;  %659 = vmax.xlane.f32.xlu0 %v658_v1  ;;  %v417_v27 = vpop.xlane.xlu1 %416  ;;  %v895_v32 = vsel %vm339_vm0, %v268_v42, -inf  ;;  %vm2662_vm1 = vcmask 1042434  }
 0x184   :  { %v366_v29 = vpop.xlane.xlu0 %365  ;;  %v1522_v54 = vrot.slane %v417_v27, %v8712_v36 }
 0x185   :  { %v1423_v45 = vrot.slane %v366_v29, %v8569_v21 }
 0x186   :  { %v8739_v39 = vsel %vm1431_vm9, %v1522_v54, %v8600_v53  ;;  %803 = vmax.xlane.f32.xlu1 %v802_v35  ;;  %v299_v53 = vld [vmem:[%s10862_s0 + $0x6c0] sm:$0xff] }
 0x187   :  { %v8743_v43 = vsel %vm1424_vm8, %v1423_v45, %v8579_v40  ;;  %752 = vmax.xlane.f32.xlu0 %v751_v17  ;;  %v513_v24 = vpop.xlane.xlu1 %512  ;;  %v282_v40 = vld [vmem:[%s10862_s0 + $0x638] sm:$0xff]  ;;  %v988_v28 = vsel %vm339_vm0, %v299_v53, -inf }
 0x188   :  { %v462_v33 = vpop.xlane.xlu0 %461  ;;  %v1680_v50 = vrot.slane %v513_v24, %v8712_v36  ;;  %v937_v61 = vsel %vm339_vm0, %v282_v40, -inf }
 0x189   :  { %v1596_v58 = vrot.slane %v462_v33, %v8569_v21 }
 0x18a   :  { %v8757_v51 = vsel %vm1431_vm9, %v1680_v50, %v8618_v37  ;;  %896 = vmax.xlane.f32.xlu1 %v895_v32  ;;  %v330_v37 = vld [vmem:[%s10862_s0 + $0x7b8] sm:$0xff] }
 0x18b   :  { %v8761_v38 = vsel %vm1424_vm8, %v1596_v58, %v8596_v52  ;;  %845 = vmax.xlane.f32.xlu0 %v844_v48  ;;  %v606_v46 = vpop.xlane.xlu1 %605  ;;  %v313_v52 = vld [vmem:[%s10862_s0 + $0x730] sm:$0xff]  ;;  %v1081_v25 = vsel %vm339_vm0, %v330_v37, -inf }
 0x18c   :  { %v555_v59 = vpop.xlane.xlu0 %554  ;;  %v1833_v63 = vrot.slane %v606_v46, %v8569_v21  ;;  %v1030_v7 = vsel %vm339_vm0, %v313_v52, -inf }
 0x18d   :  { %v1749_v6 = vrot.slane %v555_v59, %v8417_v44 }
 0x18e   :  { %v8775_v55 = vsel %vm1424_vm8, %v1833_v63, %v8636_v57  ;;  %989 = vmax.xlane.f32.xlu1 %v988_v28  ;;  %v113_v57 = vld [vmem:[%s10862_s0 + $0xf0] sm:$0xff]  ;;  %v1433_v28 = vadd.s32 4294967216, %v7957_v15 }
 0x18f   :  { %v8779_v34 = vsel %vm1417_vm7, %v1749_v6, %v8614_v47  ;;  %938 = vmax.xlane.f32.xlu0 %v937_v61  ;;  %v699_v31 = vpop.xlane.xlu1 %698  ;;  %v96_v47 = vld [vmem:[%s10862_s0 + $0x68] sm:$0xff]  ;;  %v430_v20 = vsel %vm339_vm0, %v113_v57, -inf }
 0x190   :  { %v648_v23 = vpop.xlane.xlu0 %647  ;;  %v1986_v9 = vrot.slane %v699_v31, %v8417_v44  ;;  %v379_v22 = vsel %vm339_vm0, %v96_v47, -inf }
 0x191   :  { %v1902_v10 = vrot.slane %v648_v23, %v8293_v19 }
 0x192   :  { %v8793_v1 = vsel %vm1417_vm7, %v1986_v9, %v8654_v4  ;;  %1082 = vmax.xlane.f32.xlu1 %v1081_v25  ;;  %v145_v4 = vld [vmem:[%s10862_s0 + $0x1f0] sm:$0xff] }
 0x193   :  { %v8797_v3 = vsel %vm1410_vm6, %v1902_v10, %v8632_v11  ;;  %1031 = vmax.xlane.f32.xlu0 %v1030_v7  ;;  %v792_v14 = vpop.xlane.xlu1 %791  ;;  %v128_v11 = vld [vmem:[%s10862_s0 + $0x168] sm:$0xff]  ;;  %v526_v42 = vsel %vm339_vm0, %v145_v4, -inf  ;;  %v8859_v7 = vsub.s32 %v1433_v28, %v7961_v18 }
 0x194   :  { %v741_v41 = vpop.xlane.xlu0 %740  ;;  %v2139_v27 = vrot.slane %v792_v14, %v8293_v19  ;;  %v475_v12 = vsel %vm339_vm0, %v128_v11, -inf }
 0x195   :  { %v2055_v29 = vrot.slane %v741_v41, %v8181_v62 }
 0x196   :  { %v8811_v35 = vsel %vm1410_vm6, %v2139_v27, %v8672_v56  ;;  %431 = vmax.xlane.f32.xlu1 %v430_v20  ;;  %v176_v56 = vld [vmem:[%s10862_s0 + $0x2e8] sm:$0xff] }
 0x197   :  { %v8815_v17 = vsel %vm1403_vm5, %v2055_v29, %v8650_v30  ;;  %380 = vmax.xlane.f32.xlu0 %v379_v22  ;;  %v885_v54 = vpop.xlane.xlu1 %884  ;;  %v159_v30 = vld [vmem:[%s10862_s0 + $0x260] sm:$0xff]  ;;  %v619_v53 = vsel %vm339_vm0, %v176_v56, -inf }
 0x198   :  { %v834_v45 = vpop.xlane.xlu0 %833  ;;  %v2292_v24 = vrot.slane %v885_v54, %v8181_v62  ;;  %v568_v40 = vsel %vm339_vm0, %v159_v30, -inf }
 0x199   :  { %v2208_v33 = vrot.slane %v834_v45, %v8108_v5 }
 0x19a   :  { %v8829_v32 = vsel %vm1403_vm5, %v2292_v24, %v8690_v60  ;;  %527 = vmax.xlane.f32.xlu1 %v526_v42  ;;  %v207_v60 = vld [vmem:[%s10862_s0 + $0x3e0] sm:$0xff] }
 0x19b   :  { %v8833_v48 = vsel %vm1396_vm4, %v2208_v33, %v8668_v2  ;;  %476 = vmax.xlane.f32.xlu0 %v475_v12  ;;  %v978_v50 = vpop.xlane.xlu1 %977  ;;  %v190_v2 = vld [vmem:[%s10862_s0 + $0x358] sm:$0xff]  ;;  %v712_v52 = vsel %vm339_vm0, %v207_v60, -inf }
 0x19c   :  { %v927_v58 = vpop.xlane.xlu0 %926  ;;  %v2445_v46 = vrot.slane %v978_v50, %v8108_v5  ;;  %v661_v31 = vsel %vm339_vm0, %v190_v2, -inf }
 0x19d   :  { %v2361_v59 = vrot.slane %v927_v58, %v8043_v16 }
 0x19e   :  { %v8848_v61 = vsel %vm1396_vm4, %v2445_v46, %v8704_v13  ;;  %620 = vmax.xlane.f32.xlu1 %v619_v53  ;;  %v221_v13 = vld [vmem:[%s10862_s0 + $0x450] sm:$0xff] }
 0x19f   :  { %v8852_v63 = vsel %vm1389_vm3, %v2361_v59, %v8686_v0  ;;  %569 = vmax.xlane.f32.xlu0 %v568_v40  ;;  %v1071_v6 = vpop.xlane.xlu1 %1070  ;;  %v238_v0 = vld [vmem:[%s10862_s0 + $0x4d8] sm:$0xff]  ;;  %v754_v14 = vsel %vm339_vm0, %v221_v13, -inf }
 0x1a0   :  { %v1020_v37 = vpop.xlane.xlu0 %1019  ;;  %v2598_v23 = vrot.slane %v1071_v6, %v8043_v16  ;;  %v805_v47 = vsel %vm339_vm0, %v238_v0, -inf }
 0x1a1   :  { %v2514_v25 = vrot.slane %v1020_v37, %v8005_v49 }
 0x1a2   :  { %v8869_v9 = vsel %vm1389_vm3, %v2598_v23, %v8722_v8  ;;  %713 = vmax.xlane.f32.xlu1 %v712_v52  ;;  %v269_v8 = vld [vmem:[%s10862_s0 + $0x5d0] sm:$0xff] }
 0x1a3   :  { %v8873_v10 = vsel %vm1382_vm2, %v2514_v25, %v8725_v26  ;;  %662 = vmax.xlane.f32.xlu0 %v661_v31  ;;  %v420_v49 = vpop.xlane.xlu1 %419  ;;  %v252_v26 = vld [vmem:[%s10862_s0 + $0x548] sm:$0xff]  ;;  %v898_v11 = vsel %vm339_vm0, %v269_v8, -inf  ;;  %vm2664_vm2 = vcmask 1043459  }
 0x1a4   :  { %v369_v57 = vpop.xlane.xlu0 %368  ;;  %v1527_v41 = vrot.slane %v420_v49, %v8859_v7  ;;  %v847_v54 = vsel %vm339_vm0, %v252_v26, -inf }
 0x1a5   :  { %v1430_v20 = vrot.slane %v369_v57, %v8712_v36 }
 0x1a6   :  { %v8887_v22 = vsel %vm1438_vm10, %v1527_v41, %v8739_v39  ;;  %806 = vmax.xlane.f32.xlu1 %v805_v47  ;;  %v300_v39 = vld [vmem:[%s10862_s0 + $0x6c8] sm:$0xff] }
 0x1a7   :  { %v8891_v27 = vsel %vm1431_vm9, %v1430_v20, %v8743_v43  ;;  %755 = vmax.xlane.f32.xlu0 %v754_v14  ;;  %v516_v29 = vpop.xlane.xlu1 %515  ;;  %v283_v43 = vld [vmem:[%s10862_s0 + $0x640] sm:$0xff]  ;;  %v991_v30 = vsel %vm339_vm0, %v300_v39, -inf }
 0x1a8   :  { %v465_v4 = vpop.xlane.xlu0 %464  ;;  %v1685_v45 = vrot.slane %v516_v29, %v8859_v7  ;;  %v940_v50 = vsel %vm339_vm0, %v283_v43, -inf }
 0x1a9   :  { %v1601_v42 = vrot.slane %v465_v4, %v8712_v36 }
 0x1aa   :  { %v8905_v12 = vsel %vm1438_vm10, %v1685_v45, %v8757_v51  ;;  %899 = vmax.xlane.f32.xlu1 %v898_v11  ;;  %v331_v51 = vld [vmem:[%s10862_s0 + $0x7c0] sm:$0xff] }
 0x1ab   :  { %v8909_v24 = vsel %vm1431_vm9, %v1601_v42, %v8761_v38  ;;  %848 = vmax.xlane.f32.xlu0 %v847_v54  ;;  %v609_v33 = vpop.xlane.xlu1 %608  ;;  %v314_v38 = vld [vmem:[%s10862_s0 + $0x738] sm:$0xff]  ;;  %v1084_v2 = vsel %vm339_vm0, %v331_v51, -inf }
 0x1ac   :  { %v558_v56 = vpop.xlane.xlu0 %557  ;;  %v1838_v58 = vrot.slane %v609_v33, %v8712_v36  ;;  %v1033_v28 = vsel %vm339_vm0, %v314_v38, -inf }
 0x1ad   :  { %v1754_v53 = vrot.slane %v558_v56, %v8569_v21 }
 0x1ae   :  { %v8923_v40 = vsel %vm1431_vm9, %v1838_v58, %v8775_v55  ;;  %992 = vmax.xlane.f32.xlu1 %v991_v30  ;;  %v114_v55 = vld [vmem:[%s10862_s0 + $0xf8] sm:$0xff]  ;;  %v1440_v30 = vadd.s32 4294967208, %v7957_v15 }
 0x1af   :  { %v8927_v46 = vsel %vm1424_vm8, %v1754_v53, %v8779_v34  ;;  %941 = vmax.xlane.f32.xlu0 %v940_v50  ;;  %v702_v59 = vpop.xlane.xlu1 %701  ;;  %v97_v34 = vld [vmem:[%s10862_s0 + $0x70] sm:$0xff]  ;;  %v433_v0 = vsel %vm339_vm0, %v114_v55, -inf }
 0x1b0   :  { %v651_v60 = vpop.xlane.xlu0 %650  ;;  %v1991_v6 = vrot.slane %v702_v59, %v8569_v21  ;;  %v382_v13 = vsel %vm339_vm0, %v97_v34, -inf }
 0x1b1   :  { %v1907_v37 = vrot.slane %v651_v60, %v8417_v44 }
 0x1b2   :  { %v8941_v52 = vsel %vm1424_vm8, %v1991_v6, %v8793_v1  ;;  %1085 = vmax.xlane.f32.xlu1 %v1084_v2  ;;  %v146_v1 = vld [vmem:[%s10862_s0 + $0x1f8] sm:$0xff] }
 0x1b3   :  { %v8945_v31 = vsel %vm1417_vm7, %v1907_v37, %v8797_v3  ;;  %1034 = vmax.xlane.f32.xlu0 %v1033_v28  ;;  %v795_v23 = vpop.xlane.xlu1 %794  ;;  %v129_v3 = vld [vmem:[%s10862_s0 + $0x170] sm:$0xff]  ;;  %v529_v8 = vsel %vm339_vm0, %v146_v1, -inf  ;;  %v9007_v28 = vsub.s32 %v1440_v30, %v7961_v18 }
 0x1b4   :  { %v744_v25 = vpop.xlane.xlu0 %743  ;;  %v2144_v49 = vrot.slane %v795_v23, %v8417_v44  ;;  %v478_v26 = vsel %vm339_vm0, %v129_v3, -inf }
 0x1b5   :  { %v2060_v57 = vrot.slane %v744_v25, %v8293_v19 }
 0x1b6   :  { %v8959_v47 = vsel %vm1417_vm7, %v2144_v49, %v8811_v35  ;;  %434 = vmax.xlane.f32.xlu1 %v433_v0  ;;  %v177_v35 = vld [vmem:[%s10862_s0 + $0x2f0] sm:$0xff] }
 0x1b7   :  { %v8963_v14 = vsel %vm1410_vm6, %v2060_v57, %v8815_v17  ;;  %383 = vmax.xlane.f32.xlu0 %v382_v13  ;;  %v888_v41 = vpop.xlane.xlu1 %887  ;;  %v160_v17 = vld [vmem:[%s10862_s0 + $0x268] sm:$0xff]  ;;  %v622_v39 = vsel %vm339_vm0, %v177_v35, -inf }
 0x1b8   :  { %v837_v20 = vpop.xlane.xlu0 %836  ;;  %v2297_v29 = vrot.slane %v888_v41, %v8293_v19  ;;  %v571_v43 = vsel %vm339_vm0, %v160_v17, -inf }
 0x1b9   :  { %v2213_v4 = vrot.slane %v837_v20, %v8181_v62 }
 0x1ba   :  { %v8977_v11 = vsel %vm1410_vm6, %v2297_v29, %v8829_v32  ;;  %530 = vmax.xlane.f32.xlu1 %v529_v8  ;;  %v208_v32 = vld [vmem:[%s10862_s0 + $0x3e8] sm:$0xff] }
 0x1bb   :  { %v8981_v54 = vsel %vm1403_vm5, %v2213_v4, %v8833_v48  ;;  %479 = vmax.xlane.f32.xlu0 %v478_v26  ;;  %v981_v45 = vpop.xlane.xlu1 %980  ;;  %v191_v48 = vld [vmem:[%s10862_s0 + $0x360] sm:$0xff]  ;;  %v715_v38 = vsel %vm339_vm0, %v208_v32, -inf }
 0x1bc   :  { %v930_v42 = vpop.xlane.xlu0 %929  ;;  %v2450_v33 = vrot.slane %v981_v45, %v8181_v62  ;;  %v664_v59 = vsel %vm339_vm0, %v191_v48, -inf }
 0x1bd   :  { %v2366_v56 = vrot.slane %v930_v42, %v8108_v5 }
 0x1be   :  { %v8996_v50 = vsel %vm1403_vm5, %v2450_v33, %v8848_v61  ;;  %623 = vmax.xlane.f32.xlu1 %v622_v39  ;;  %v239_v61 = vld [vmem:[%s10862_s0 + $0x4e0] sm:$0xff] }
 0x1bf   :  { %v9000_v58 = vsel %vm1396_vm4, %v2366_v56, %v8852_v63  ;;  %572 = vmax.xlane.f32.xlu0 %v571_v43  ;;  %v1074_v53 = vpop.xlane.xlu1 %1073  ;;  %v222_v63 = vld [vmem:[%s10862_s0 + $0x458] sm:$0xff]  ;;  %v808_v34 = vsel %vm339_vm0, %v239_v61, -inf }
 0x1c0   :  { %v1023_v51 = vpop.xlane.xlu0 %1022  ;;  %v2603_v60 = vrot.slane %v1074_v53, %v8108_v5  ;;  %v757_v23 = vsel %vm339_vm0, %v222_v63, -inf }
 0x1c1   :  { %v2519_v2 = vrot.slane %v1023_v51, %v8043_v16 }
 0x1c2   :  { %v9017_v6 = vsel %vm1396_vm4, %v2603_v60, %v8869_v9  ;;  %716 = vmax.xlane.f32.xlu1 %v715_v38  ;;  %v270_v9 = vld [vmem:[%s10862_s0 + $0x5d8] sm:$0xff] }
 0x1c3   :  { %v9021_v37 = vsel %vm1389_vm3, %v2519_v2, %v8873_v10  ;;  %665 = vmax.xlane.f32.xlu0 %v664_v59  ;;  %v423_v16 = vpop.xlane.xlu1 %422  ;;  %v253_v10 = vld [vmem:[%s10862_s0 + $0x550] sm:$0xff]  ;;  %v901_v3 = vsel %vm339_vm0, %v270_v9, -inf  ;;  %vm2666_vm3 = vcmask 1044484  }
 0x1c4   :  { %v372_v55 = vpop.xlane.xlu0 %371  ;;  %v1532_v25 = vrot.slane %v423_v16, %v9007_v28  ;;  %v850_v41 = vsel %vm339_vm0, %v253_v10, -inf }
 0x1c5   :  { %v1437_v0 = vrot.slane %v372_v55, %v8859_v7 }
 0x1c6   :  { %v9035_v13 = vsel %vm1445_vm11, %v1532_v25, %v8887_v22  ;;  %809 = vmax.xlane.f32.xlu1 %v808_v34  ;;  %v301_v22 = vld [vmem:[%s10862_s0 + $0x6d0] sm:$0xff] }
 0x1c7   :  { %v9039_v49 = vsel %vm1438_vm10, %v1437_v0, %v8891_v27  ;;  %758 = vmax.xlane.f32.xlu0 %v757_v23  ;;  %v519_v57 = vpop.xlane.xlu1 %518  ;;  %v284_v27 = vld [vmem:[%s10862_s0 + $0x648] sm:$0xff]  ;;  %v994_v17 = vsel %vm339_vm0, %v301_v22, -inf }
 0x1c8   :  { %v468_v1 = vpop.xlane.xlu0 %467  ;;  %v1690_v20 = vrot.slane %v519_v57, %v9007_v28  ;;  %v943_v45 = vsel %vm339_vm0, %v284_v27, -inf }
 0x1c9   :  { %v1606_v8 = vrot.slane %v468_v1, %v8859_v7 }
 0x1ca   :  { %v9053_v26 = vsel %vm1445_vm11, %v1690_v20, %v8905_v12  ;;  %902 = vmax.xlane.f32.xlu1 %v901_v3  ;;  %v332_v12 = vld [vmem:[%s10862_s0 + $0x7c8] sm:$0xff] }
 0x1cb   :  { %v9057_v29 = vsel %vm1438_vm10, %v1606_v8, %v8909_v24  ;;  %851 = vmax.xlane.f32.xlu0 %v850_v41  ;;  %v612_v4 = vpop.xlane.xlu1 %611  ;;  %v315_v24 = vld [vmem:[%s10862_s0 + $0x740] sm:$0xff]  ;;  %v1087_v48 = vsel %vm339_vm0, %v332_v12, -inf }
 0x1cc   :  { %v561_v35 = vpop.xlane.xlu0 %560  ;;  %v1843_v42 = vrot.slane %v612_v4, %v8859_v7  ;;  %v1036_v30 = vsel %vm339_vm0, %v315_v24, -inf }
 0x1cd   :  { %v1759_v39 = vrot.slane %v561_v35, %v8712_v36 }
 0x1ce   :  { %v9071_v43 = vsel %vm1438_vm10, %v1843_v42, %v8923_v40  ;;  %995 = vmax.xlane.f32.xlu1 %v994_v17  ;;  %v130_v40 = vld [vmem:[%s10862_s0 + $0x178] sm:$0xff]  ;;  %v1447_v17 = vadd.s32 4294967200, %v7957_v15 }
 0x1cf   :  { %v9075_v33 = vsel %vm1431_vm9, %v1759_v39, %v8927_v46  ;;  %944 = vmax.xlane.f32.xlu0 %v943_v45  ;;  %v705_v56 = vpop.xlane.xlu1 %704  ;;  %v98_v46 = vld [vmem:[%s10862_s0 + $0x78] sm:$0xff]  ;;  %v481_v61 = vsel %vm339_vm0, %v130_v40, -inf }
 0x1d0   :  { %v654_v32 = vpop.xlane.xlu0 %653  ;;  %v1996_v53 = vrot.slane %v705_v56, %v8712_v36  ;;  %v385_v63 = vsel %vm339_vm0, %v98_v46, -inf }
 0x1d1   :  { %v1912_v51 = vrot.slane %v654_v32, %v8569_v21 }
 0x1d2   :  { %v9089_v38 = vsel %vm1431_vm9, %v1996_v53, %v8941_v52  ;;  %1088 = vmax.xlane.f32.xlu1 %v1087_v48  ;;  %v178_v52 = vld [vmem:[%s10862_s0 + $0x2f8] sm:$0xff] }
 0x1d3   :  { %v9093_v59 = vsel %vm1424_vm8, %v1912_v51, %v8945_v31  ;;  %1037 = vmax.xlane.f32.xlu0 %v1036_v30  ;;  %v798_v60 = vpop.xlane.xlu1 %797  ;;  %v161_v31 = vld [vmem:[%s10862_s0 + $0x270] sm:$0xff]  ;;  %v625_v9 = vsel %vm339_vm0, %v178_v52, -inf  ;;  %v9155_v30 = vsub.s32 %v1447_v17, %v7961_v18 }
 0x1d4   :  { %v747_v2 = vpop.xlane.xlu0 %746  ;;  %v2149_v16 = vrot.slane %v798_v60, %v8569_v21  ;;  %v574_v10 = vsel %vm339_vm0, %v161_v31, -inf }
 0x1d5   :  { %v2065_v55 = vrot.slane %v747_v2, %v8417_v44 }
 0x1d6   :  { %v9107_v34 = vsel %vm1424_vm8, %v2149_v16, %v8959_v47  ;;  %482 = vmax.xlane.f32.xlu1 %v481_v61  ;;  %v209_v47 = vld [vmem:[%s10862_s0 + $0x3f0] sm:$0xff] }
 0x1d7   :  { %v9111_v23 = vsel %vm1417_vm7, %v2065_v55, %v8963_v14  ;;  %386 = vmax.xlane.f32.xlu0 %v385_v63  ;;  %v891_v25 = vpop.xlane.xlu1 %890  ;;  %v192_v14 = vld [vmem:[%s10862_s0 + $0x368] sm:$0xff]  ;;  %v718_v22 = vsel %vm339_vm0, %v209_v47, -inf }
 0x1d8   :  { %v840_v0 = vpop.xlane.xlu0 %839  ;;  %v2302_v57 = vrot.slane %v891_v25, %v8417_v44  ;;  %v667_v27 = vsel %vm339_vm0, %v192_v14, -inf }
 0x1d9   :  { %v2218_v1 = vrot.slane %v840_v0, %v8293_v19 }
 0x1da   :  { %v9125_v3 = vsel %vm1417_vm7, %v2302_v57, %v8977_v11  ;;  %626 = vmax.xlane.f32.xlu1 %v625_v9  ;;  %v240_v11 = vld [vmem:[%s10862_s0 + $0x4e8] sm:$0xff] }
 0x1db   :  { %v9129_v41 = vsel %vm1410_vm6, %v2218_v1, %v8981_v54  ;;  %575 = vmax.xlane.f32.xlu0 %v574_v10  ;;  %v984_v20 = vpop.xlane.xlu1 %983  ;;  %v223_v54 = vld [vmem:[%s10862_s0 + $0x460] sm:$0xff]  ;;  %v811_v24 = vsel %vm339_vm0, %v240_v11, -inf }
 0x1dc   :  { %v933_v8 = vpop.xlane.xlu0 %932  ;;  %v2455_v4 = vrot.slane %v984_v20, %v8293_v19  ;;  %v760_v56 = vsel %vm339_vm0, %v223_v54, -inf }
 0x1dd   :  { %v2371_v35 = vrot.slane %v933_v8, %v8181_v62 }
 0x1de   :  { %v9144_v45 = vsel %vm1410_vm6, %v2455_v4, %v8996_v50  ;;  %719 = vmax.xlane.f32.xlu1 %v718_v22  ;;  %v271_v50 = vld [vmem:[%s10862_s0 + $0x5e0] sm:$0xff] }
 0x1df   :  { %v9148_v42 = vsel %vm1403_vm5, %v2371_v35, %v9000_v58  ;;  %668 = vmax.xlane.f32.xlu0 %v667_v27  ;;  %v1077_v39 = vpop.xlane.xlu1 %1076  ;;  %v254_v58 = vld [vmem:[%s10862_s0 + $0x558] sm:$0xff]  ;;  %v904_v46 = vsel %vm339_vm0, %v271_v50, -inf }
 0x1e0   :  { %v1026_v12 = vpop.xlane.xlu0 %1025  ;;  %v2608_v32 = vrot.slane %v1077_v39, %v8181_v62  ;;  %v853_v60 = vsel %vm339_vm0, %v254_v58, -inf }
 0x1e1   :  { %v2524_v48 = vrot.slane %v1026_v12, %v8108_v5 }
 0x1e2   :  { %v9165_v53 = vsel %vm1403_vm5, %v2608_v32, %v9017_v6  ;;  %812 = vmax.xlane.f32.xlu1 %v811_v24  ;;  %v302_v6 = vld [vmem:[%s10862_s0 + $0x6d8] sm:$0xff] }
 0x1e3   :  { %v9169_v51 = vsel %vm1396_vm4, %v2524_v48, %v9021_v37  ;;  %761 = vmax.xlane.f32.xlu0 %v760_v56  ;;  %v426_v5 = vpop.xlane.xlu1 %425  ;;  %v285_v37 = vld [vmem:[%s10862_s0 + $0x650] sm:$0xff]  ;;  %v997_v31 = vsel %vm339_vm0, %v302_v6, -inf  ;;  %vm2668_vm4 = vcmask 1045509  }
 0x1e4   :  { %v375_v40 = vpop.xlane.xlu0 %374  ;;  %v1537_v2 = vrot.slane %v426_v5, %v9155_v30  ;;  %v946_v25 = vsel %vm339_vm0, %v285_v37, -inf }
 0x1e5   :  { %v1444_v61 = vrot.slane %v375_v40, %v9007_v28 }
 0x1e6   :  { %v9183_v63 = vsel %vm1452_vm12, %v1537_v2, %v9035_v13  ;;  %905 = vmax.xlane.f32.xlu1 %v904_v46  ;;  %v333_v13 = vld [vmem:[%s10862_s0 + $0x7d0] sm:$0xff] }
 0x1e7   :  { %v9187_v16 = vsel %vm1445_vm11, %v1444_v61, %v9039_v49  ;;  %854 = vmax.xlane.f32.xlu0 %v853_v60  ;;  %v522_v55 = vpop.xlane.xlu1 %521  ;;  %v316_v49 = vld [vmem:[%s10862_s0 + $0x748] sm:$0xff]  ;;  %v1090_v14 = vsel %vm339_vm0, %v333_v13, -inf }
 0x1e8   :  { %v471_v52 = vpop.xlane.xlu0 %470  ;;  %v1695_v0 = vrot.slane %v522_v55, %v9155_v30  ;;  %v1039_v20 = vsel %vm339_vm0, %v316_v49, -inf }
 0x1e9   :  { %v1611_v9 = vrot.slane %v471_v52, %v9007_v28 }
 0x1ea   :  { %v9201_v10 = vsel %vm1452_vm12, %v1695_v0, %v9053_v26  ;;  %998 = vmax.xlane.f32.xlu1 %v997_v31  ;;  %v193_v26 = vld [vmem:[%s10862_s0 + $0x370] sm:$0xff] }
 0x1eb   :  { %v9205_v57 = vsel %vm1445_vm11, %v1611_v9, %v9057_v29  ;;  %947 = vmax.xlane.f32.xlu0 %v946_v25  ;;  %v615_v1 = vpop.xlane.xlu1 %614  ;;  %v162_v29 = vld [vmem:[%s10862_s0 + $0x278] sm:$0xff]  ;;  %v670_v54 = vsel %vm339_vm0, %v193_v26, -inf }
 0x1ec   :  { %v564_v47 = vpop.xlane.xlu0 %563  ;;  %v1848_v8 = vrot.slane %v615_v1, %v9007_v28  ;;  %v577_v17 = vsel %vm339_vm0, %v162_v29, -inf }
 0x1ed   :  { %v1764_v22 = vrot.slane %v564_v47, %v8859_v7 }
 0x1ee   :  { %v9219_v27 = vsel %vm1445_vm11, %v1848_v8, %v9071_v43  ;;  %1091 = vmax.xlane.f32.xlu1 %v1090_v14  ;;  %v224_v43 = vld [vmem:[%s10862_s0 + $0x468] sm:$0xff]  ;;  %v1454_v14 = vadd.s32 4294967192, %v7957_v15 }
 0x1ef   :  { %v9223_v4 = vsel %vm1438_vm10, %v1764_v22, %v9075_v33  ;;  %1040 = vmax.xlane.f32.xlu0 %v1039_v20  ;;  %v708_v35 = vpop.xlane.xlu1 %707  ;;  %v210_v33 = vld [vmem:[%s10862_s0 + $0x3f8] sm:$0xff]  ;;  %v763_v50 = vsel %vm339_vm0, %v224_v43, -inf }
 0x1f0   :  { %v657_v11 = vpop.xlane.xlu0 %656  ;;  %v2001_v39 = vrot.slane %v708_v35, %v8859_v7  ;;  %v721_v58 = vsel %vm339_vm0, %v210_v33, -inf }
 0x1f1   :  { %v1917_v12 = vrot.slane %v657_v11, %v8712_v36 }
 0x1f2   :  { %v9237_v24 = vsel %vm1438_vm10, %v2001_v39, %v9089_v38  ;;  %671 = vmax.xlane.f32.xlu1 %v670_v54  ;;  %v255_v38 = vld [vmem:[%s10862_s0 + $0x560] sm:$0xff] }
 0x1f3   :  { %v9241_v56 = vsel %vm1431_vm9, %v1917_v12, %v9093_v59  ;;  %578 = vmax.xlane.f32.xlu0 %v577_v17  ;;  %v801_v32 = vpop.xlane.xlu1 %800  ;;  %v241_v59 = vld [vmem:[%s10862_s0 + $0x4f0] sm:$0xff]  ;;  %v856_v6 = vsel %vm339_vm0, %v255_v38, -inf  ;;  %v9303_v17 = vsub.s32 %v1454_v14, %v7961_v18 }
 0x1f4   :  { %v750_v48 = vpop.xlane.xlu0 %749  ;;  %v2154_v5 = vrot.slane %v801_v32, %v8712_v36  ;;  %v814_v37 = vsel %vm339_vm0, %v241_v59, -inf }
 0x1f5   :  { %v2070_v40 = vrot.slane %v750_v48, %v8569_v21 }
 0x1f6   :  { %v9255_v46 = vsel %vm1431_vm9, %v2154_v5, %v9107_v34  ;;  %764 = vmax.xlane.f32.xlu1 %v763_v50  ;;  %v286_v34 = vld [vmem:[%s10862_s0 + $0x658] sm:$0xff] }
 0x1f7   :  { %v9259_v60 = vsel %vm1424_vm8, %v2070_v40, %v9111_v23  ;;  %722 = vmax.xlane.f32.xlu0 %v721_v58  ;;  %v894_v2 = vpop.xlane.xlu1 %893  ;;  %v272_v23 = vld [vmem:[%s10862_s0 + $0x5e8] sm:$0xff]  ;;  %v949_v13 = vsel %vm339_vm0, %v286_v34, -inf }
 0x1f8   :  { %v843_v61 = vpop.xlane.xlu0 %842  ;;  %v2307_v55 = vrot.slane %v894_v2, %v8569_v21  ;;  %v907_v49 = vsel %vm339_vm0, %v272_v23, -inf  ;;  %v2701_v23 = vld [vmem:[#allocation3 + $0x28] sm:$0xff] }
 0x1f9   :  { %v2223_v52 = vrot.slane %v843_v61, %v8417_v44  ;;  %v2696_v61 = vld [vmem:[#allocation3] sm:$0xff] }
 0x1fa   :  { %v9273_v31 = vsel %vm1424_vm8, %v2307_v55, %v9125_v3  ;;  %857 = vmax.xlane.f32.xlu1 %v856_v6  ;;  %v317_v3 = vld [vmem:[%s10862_s0 + $0x750] sm:$0xff]  ;;  %v2700_v6 = vld [vmem:[#allocation3 + $0x20] sm:$0xff] }
 0x1fb   :  { %v9277_v25 = vsel %vm1417_vm7, %v2223_v52, %v9129_v41  ;;  %815 = vmax.xlane.f32.xlu0 %v814_v37  ;;  %v987_v0 = vpop.xlane.xlu1 %986  ;;  %v303_v41 = vld [vmem:[%s10862_s0 + $0x6e0] sm:$0xff]  ;;  %v1042_v29 = vsel %vm339_vm0, %v317_v3, -inf  ;;  %v2697_v37 = vld [vmem:[#allocation3 + $0x8] sm:$0xff]  ;;  %v6389_v34 = vcombine.high %v2696_v61, %v2700_v6 }
 0x1fc   :  { %v936_v9 = vpop.xlane.xlu0 %935  ;;  %v2460_v1 = vrot.slane %v987_v0, %v8417_v44  ;;  %v1000_v35 = vsel %vm339_vm0, %v303_v41, -inf  ;;  %v256_v52 = vld [vmem:[%s10862_s0 + $0x568] sm:$0xff]  ;;  %v6391_v0 = vcombine.high %v2697_v37, %v2701_v23 }
 0x1fd   :  { %v2376_v47 = vrot.slane %v936_v9, %v8293_v19  ;;  %v6388_v9 = vcombine.low %v2696_v61, %v2700_v6  ;;  %v859_v14 = vsel %vm339_vm0, %v256_v52, -inf  ;;  %3506 = vmatprep.subr.bf16.mxu0 %v6389_v34  ;;  %v318_v61 = vld [vmem:[%s10862_s0 + $0x758] sm:$0xff] }
 0x1fe   :  { %v9292_v20 = vsel %vm1417_vm7, %v2460_v1, %v9144_v45  ;;  %950 = vmax.xlane.f32.xlu1 %v949_v13  ;;  %v194_v45 = vld [vmem:[%s10862_s0 + $0x378] sm:$0xff]  ;;  %v6390_v13 = vcombine.low %v2697_v37, %v2701_v23  ;;  %3547 = vmatprep.subr.bf16.mxu1 %v6391_v0  ;;  %v2717_v37 = vld [vmem:[#allocation3 + $0xa8] sm:$0xff] }
 0x1ff   :  { %v9296_v8 = vsel %vm1410_vm6, %v2376_v47, %v9148_v42  ;;  %908 = vmax.xlane.f32.xlu0 %v907_v49  ;;  %v1080_v22 = vpop.xlane.xlu1 %1079  ;;  %v334_v42 = vld [vmem:[%s10862_s0 + $0x7d8] sm:$0xff]  ;;  %v673_v33 = vsel %vm339_vm0, %v194_v45, -inf  ;;  %3507 = vmatpush1.bf16.msra.mxu0 %v6388_v9  ;;  %v2709_v45 = vld [vmem:[#allocation3 + $0x68] sm:$0xff] }
 0x200   :  { %v1029_v26 = vpop.xlane.xlu0 %1028  ;;  %v2613_v11 = vrot.slane %v1080_v22, %v8293_v19  ;;  %v1093_v32 = vsel %vm339_vm0, %v334_v42, -inf  ;;  %v2704_v22 = vld [vmem:[#allocation3 + $0x40] sm:$0xff]  ;;  %3548 = vmatpush1.bf16.msra.mxu1 %v6390_v13  ;;  %v1045_v13 = vsel %vm339_vm0, %v318_v61, -inf }
 0x201   :  { %v2529_v54 = vrot.slane %v1029_v26, %v8181_v62  ;;  %v2708_v26 = vld [vmem:[#allocation3 + $0x60] sm:$0xff] }
 0x202   :  { %v9313_v39 = vsel %vm1410_vm6, %v2613_v11, %v9165_v53  ;;  %1043 = vmax.xlane.f32.xlu1 %v1042_v29  ;;  %v242_v53 = vld [vmem:[%s10862_s0 + $0x4f8] sm:$0xff]  ;;  %v2705_v29 = vld [vmem:[#allocation3 + $0x48] sm:$0xff]  ;;  %v287_v11 = vld [vmem:[%s10862_s0 + $0x660] sm:$0xff] }
 0x203   :  { %v9317_v12 = vsel %vm1403_vm5, %v2529_v54, %v9169_v51  ;;  %1001 = vmax.xlane.f32.xlu0 %v1000_v35  ;;  %v429_v62 = vpop.xlane.xlu1 %428  ;;  %v225_v51 = vld [vmem:[%s10862_s0 + $0x470] sm:$0xff]  ;;  %v817_v59 = vsel %vm339_vm0, %v242_v53, -inf  ;;  %v6397_v54 = vcombine.high %v2704_v22, %v2708_v26  ;;  %v6399_v42 = vcombine.high %v2705_v29, %v2709_v45 }
 0x204   :  { %v378_v43 = vpop.xlane.xlu0 %377  ;;  %v1542_v48 = vrot.slane %v429_v62, %v9303_v17  ;;  %v766_v2 = vsel %vm339_vm0, %v225_v51, -inf  ;;  %v6396_v62 = vcombine.low %v2704_v22, %v2708_v26  ;;  %v952_v51 = vsel %vm339_vm0, %v287_v11, -inf  ;;  %v226_v22 = vld [vmem:[%s10862_s0 + $0x478] sm:$0xff] }
 0x205   :  { %v1451_v50 = vrot.slane %v378_v43, %v9155_v30  ;;  %v6398_v43 = vcombine.low %v2705_v29, %v2709_v45  ;;  %3508 = vmatprep.subr.bf16.mxu0 %v6397_v54  ;;  %3549 = vmatprep.subr.bf16.mxu1 %v6399_v42  ;;  %v2725_v29 = vld [vmem:[#allocation3 + $0xe8] sm:$0xff]  ;;  %vm2670_vm5 = vcmask 1046534  }
 0x206   :  { %v9331_v58 = vsel %vm1459_vm13, %v1542_v48, %v9183_v63  ;;  %674 = vmax.xlane.f32.xlu1 %v673_v33  ;;  %3509 = vmatpush1.bf16.msra.mxu0 %v6396_v62 }
 0x207   :  { %v9335_v5 = vsel %vm1452_vm12, %v1451_v50, %v9187_v16  ;;  %1094 = vmax.xlane.f32.xlu0 %v1093_v32  ;;  %v525_v40 = vpop.xlane.xlu1 %524  ;;  %v273_v16 = vld [vmem:[%s10862_s0 + $0x5f0] sm:$0xff]  ;;  %3550 = vmatpush1.bf16.msra.mxu1 %v6398_v43  ;;  %v769_v43 = vsel %vm339_vm0, %v226_v22, -inf }
 0x208   :  { %v474_v38 = vpop.xlane.xlu0 %473  ;;  %v1700_v55 = vrot.slane %v525_v40, %v9303_v17  ;;  %v910_v41 = vsel %vm339_vm0, %v273_v16, -inf  ;;  %v2712_v40 = vld [vmem:[#allocation3 + $0x80] sm:$0xff] }
 0x209   :  { %v1616_v63 = vrot.slane %v474_v38, %v9155_v30  ;;  %v2716_v38 = vld [vmem:[#allocation3 + $0xa0] sm:$0xff] }
 0x20a   :  { %v9349_v49 = vsel %vm1459_vm13, %v1700_v55, %v9201_v10  ;;  %818 = vmax.xlane.f32.xlu1 %v817_v59  ;;  %v2713_v59 = vld [vmem:[#allocation3 + $0x88] sm:$0xff]  ;;  %v6405_v6 = vcombine.high %v2712_v40, %v2716_v38 }
 0x20b   :  { %v9353_v1 = vsel %vm1452_vm12, %v1616_v63, %v9205_v57  ;;  %767 = vmax.xlane.f32.xlu0 %v766_v2  ;;  %v618_v47 = vpop.xlane.xlu1 %617  ;;  %v304_v57 = vld [vmem:[%s10862_s0 + $0x6e8] sm:$0xff]  ;;  %v6407_v55 = vcombine.high %v2713_v59, %v2717_v37  ;;  %v6404_v63 = vcombine.low %v2712_v40, %v2716_v38  ;;  %v6406_v16 = vcombine.low %v2713_v59, %v2717_v37  ;;  %v274_v40 = vld [vmem:[%s10862_s0 + $0x5f8] sm:$0xff] }
 0x20c   :  { %v567_v3 = vpop.xlane.xlu0 %566  ;;  %v1853_v10 = vrot.slane %v618_v47, %v9155_v30  ;;  %v1003_v53 = vsel %vm339_vm0, %v304_v57, -inf  ;;  %3510 = vmatprep.subr.bf16.mxu0 %v6405_v6  ;;  %v2720_v47 = vld [vmem:[#allocation3 + $0xc0] sm:$0xff]  ;;  %v2733_v59 = vld [vmem:[#allocation3 + $0x128] sm:$0xff] }
 0x20d   :  { %v1769_v35 = vrot.slane %v567_v3, %v9007_v28  ;;  %3551 = vmatprep.subr.bf16.mxu1 %v6407_v55  ;;  %v2724_v3 = vld [vmem:[#allocation3 + $0xe0] sm:$0xff]  ;;  %3511 = vmatpush1.bf16.msra.mxu0 %v6404_v63 }
 0x20e   :  { %v9367_v33 = vsel %vm1452_vm12, %v1853_v10, %v9219_v27  ;;  %911 = vmax.xlane.f32.xlu1 %v910_v41  ;;  %v2721_v41 = vld [vmem:[#allocation3 + $0xc8] sm:$0xff]  ;;  %3552 = vmatpush1.bf16.msra.mxu1 %v6406_v16  ;;  %v6413_v26 = vcombine.high %v2720_v47, %v2724_v3  ;;  %v913_v16 = vsel %vm339_vm0, %v274_v40, -inf }
 0x20f   :  { %v9371_v32 = vsel %vm1445_vm11, %v1769_v35, %v9223_v4  ;;  %860 = vmax.xlane.f32.xlu0 %v859_v14  ;;  %v711_v48 = vpop.xlane.xlu1 %710  ;;  %v335_v4 = vld [vmem:[%s10862_s0 + $0x7e0] sm:$0xff]  ;;  %v6415_v10 = vcombine.high %v2721_v41, %v2725_v29  ;;  %v6412_v35 = vcombine.low %v2720_v47, %v2724_v3  ;;  %v6414_v57 = vcombine.low %v2721_v41, %v2725_v29  ;;  %v305_v3 = vld [vmem:[%s10862_s0 + $0x6f0] sm:$0xff] }
 0x210   :  { %v660_v50 = vpop.xlane.xlu0 %659  ;;  %v2006_v27 = vrot.slane %v711_v48, %v9007_v28  ;;  %v1096_v9 = vsel %vm339_vm0, %v335_v4, -inf  ;;  %3512 = vmatprep.subr.bf16.mxu0 %v6413_v26  ;;  %v2728_v48 = vld [vmem:[#allocation3 + $0x100] sm:$0xff] }
 0x211   :  { %v1922_v2 = vrot.slane %v660_v50, %v8859_v7  ;;  %3553 = vmatprep.subr.bf16.mxu1 %v6415_v10  ;;  %v2732_v50 = vld [vmem:[#allocation3 + $0x120] sm:$0xff]  ;;  %3513 = vmatpush1.bf16.msra.mxu0 %v6412_v35 }
 0x212   :  { %v9385_v52 = vsel %vm1445_vm11, %v2006_v27, %v9237_v24  ;;  %1004 = vmax.xlane.f32.xlu1 %v1003_v53  ;;  %v2729_v53 = vld [vmem:[#allocation3 + $0x108] sm:$0xff]  ;;  %3554 = vmatpush1.bf16.msra.mxu1 %v6414_v57  ;;  %v6421_v38 = vcombine.high %v2728_v48, %v2732_v50  ;;  %v319_v47 = vld [vmem:[%s10862_s0 + $0x760] sm:$0xff] }
 0x213   :  { %v9389_v34 = vsel %vm1438_vm10, %v1922_v2, %v9241_v56  ;;  %953 = vmax.xlane.f32.xlu0 %v952_v51  ;;  %v804_v23 = vpop.xlane.xlu1 %803  ;;  %v257_v56 = vld [vmem:[%s10862_s0 + $0x570] sm:$0xff]  ;;  %v6423_v27 = vcombine.high %v2729_v53, %v2733_v59  ;;  %v6420_v2 = vcombine.low %v2728_v48, %v2732_v50  ;;  %v6422_v4 = vcombine.low %v2729_v53, %v2733_v59  ;;  %v258_v50 = vld [vmem:[%s10862_s0 + $0x578] sm:$0xff]  ;;  %v336_v53 = vld [vmem:[%s10862_s0 + $0x7e8] sm:$0xff] }
 0x214   :  { %v753_v0 = vpop.xlane.xlu0 %752  ;;  %v2159_v24 = vrot.slane %v804_v23, %v8859_v7  ;;  %v862_v62 = vsel %vm339_vm0, %v257_v56, -inf  ;;  %v1461_v23 = vadd.s32 4294967184, %v7957_v15  ;;  %3514 = vmatprep.subr.bf16.mxu0 %v6421_v38  ;;  %v1048_v57 = vsel %vm339_vm0, %v319_v47, -inf }
 0x215   :  { %v2075_v14 = vrot.slane %v753_v0, %v8712_v36  ;;  %3555 = vmatprep.subr.bf16.mxu1 %v6423_v27  ;;  %v2736_v0 = vld [vmem:[#allocation3 + $0x140] sm:$0xff]  ;;  %3515 = vmatpush1.bf16.msra.mxu0 %v6420_v2 }
 0x216   :  { %v9403_v11 = vsel %vm1438_vm10, %v2159_v24, %v9255_v46  ;;  %1097 = vmax.xlane.f32.xlu1 %v1096_v9  ;;  %v2740_v9 = vld [vmem:[#allocation3 + $0x160] sm:$0xff]  ;;  %3556 = vmatpush1.bf16.msra.mxu1 %v6422_v4  ;;  %v2741_v24 = vld [vmem:[#allocation3 + $0x168] sm:$0xff]  ;;  %v865_v4 = vsel %vm339_vm0, %v258_v50, -inf }
 0x217   :  { %v9407_v54 = vsel %vm1431_vm9, %v2075_v14, %v9259_v60  ;;  %1046 = vmax.xlane.f32.xlu0 %v1045_v13  ;;  %v897_v45 = vpop.xlane.xlu1 %896  ;;  %v288_v60 = vld [vmem:[%s10862_s0 + $0x668] sm:$0xff]  ;;  %v6429_v41 = vcombine.high %v2736_v0, %v2740_v9  ;;  %v6428_v56 = vcombine.low %v2736_v0, %v2740_v9  ;;  %v289_v0 = vld [vmem:[%s10862_s0 + $0x670] sm:$0xff] }
 0x218   :  { %v846_v42 = vpop.xlane.xlu0 %845  ;;  %v2312_v46 = vrot.slane %v897_v45, %v8712_v36  ;;  %v955_v63 = vsel %vm339_vm0, %v288_v60, -inf  ;;  %v1006_v45 = vsel %vm339_vm0, %v305_v3, -inf }
 0x219   :  { %v2228_v51 = vrot.slane %v846_v42, %v8569_v21  ;;  %v9449_v42 = vsub.s32 %v1461_v23, %v7961_v18  ;;  %3516 = vmatprep.subr.bf16.mxu0 %v6429_v41 }
 0x21a   :  { %v9421_v61 = vsel %vm1431_vm9, %v2312_v46, %v9273_v31  ;;  %863 = vmax.xlane.f32.xlu1 %v862_v62  ;;  %v2737_v31 = vld [vmem:[#allocation3 + $0x148] sm:$0xff]  ;;  %v2744_v62 = vld [vmem:[#allocation3 + $0x180] sm:$0xff]  ;;  %3517 = vmatpush1.bf16.msra.mxu0 %v6428_v56 }
 0x21b   :  { %v9425_v6 = vsel %vm1424_vm8, %v2228_v51, %v9277_v25  ;;  %770 = vmax.xlane.f32.xlu0 %v769_v43  ;;  %v990_v37 = vpop.xlane.xlu1 %989  ;;  %v6431_v14 = vcombine.high %v2737_v31, %v2741_v24  ;;  %v6430_v22 = vcombine.low %v2737_v31, %v2741_v24  ;;  %v2745_v43 = vld [vmem:[#allocation3 + $0x188] sm:$0xff] }
 0x21c   :  { %v939_v55 = vpop.xlane.xlu0 %938  ;;  %v2465_v13 = vrot.slane %v990_v37, %v8569_v21  ;;  %v2749_v51 = vld [vmem:[#allocation3 + $0x1a8] sm:$0xff]  ;;  %v1099_v37 = vsel %vm339_vm0, %v336_v53, -inf }
 0x21d   :  { %v2381_v25 = vrot.slane %v939_v55, %v8417_v44  ;;  %3557 = vmatprep.subr.bf16.mxu1 %v6431_v14  ;;  %v6439_v60 = vcombine.high %v2745_v43, %v2749_v51  ;;  %v6438_v38 = vcombine.low %v2745_v43, %v2749_v51  ;;  %v2752_v55 = vld [vmem:[#allocation3 + $0x1c0] sm:$0xff]  ;;  %v2757_v31 = vld [vmem:[#allocation3 + $0x1e8] sm:$0xff] }
 0x21e   :  { %v9440_v26 = vsel %vm1424_vm8, %v2465_v13, %v9292_v20  ;;  %956 = vmax.xlane.f32.xlu1 %v955_v63  ;;  %v2748_v20 = vld [vmem:[#allocation3 + $0x1a0] sm:$0xff]  ;;  %3558 = vmatpush1.bf16.msra.mxu1 %v6430_v22  ;;  %v958_v22 = vsel %vm339_vm0, %v289_v0, -inf  ;;  %v2765_v43 = vld [vmem:[#allocation3 + $0x228] sm:$0xff] }
 0x21f   :  { %v9444_v29 = vsel %vm1417_vm7, %v2381_v25, %v9296_v8  ;;  %914 = vmax.xlane.f32.xlu0 %v913_v16  ;;  %v1083_v10 = vpop.xlane.xlu1 %1082  ;;  %v6437_v46 = vcombine.high %v2744_v62, %v2748_v20  ;;  %v6436_v40 = vcombine.low %v2744_v62, %v2748_v20  ;;  %3559 = vmatprep.subr.bf16.mxu1 %v6439_v60  ;;  %v2756_v63 = vld [vmem:[#allocation3 + $0x1e0] sm:$0xff]  ;;  %v2753_v16 = vld [vmem:[#allocation3 + $0x1c8] sm:$0xff] }
 0x220   :  { %v1032_v35 = vpop.xlane.xlu0 %1031  ;;  %v2618_v48 = vrot.slane %v1083_v10, %v8417_v44  ;;  %v6445_v9 = vcombine.high %v2752_v55, %v2756_v63  ;;  %v6447_v13 = vcombine.high %v2753_v16, %v2757_v31  ;;  %v6444_v25 = vcombine.low %v2752_v55, %v2756_v63  ;;  %v2760_v10 = vld [vmem:[#allocation3 + $0x200] sm:$0xff]  ;;  %v320_v62 = vld [vmem:[%s10862_s0 + $0x768] sm:$0xff]  ;;  %v290_v55 = vld [vmem:[%s10862_s0 + $0x678] sm:$0xff] }
 0x221   :  { %v2534_v8 = vrot.slane %v1032_v35, %v8293_v19  ;;  %3518 = vmatprep.subr.bf16.mxu0 %v6437_v46  ;;  %v6446_v47 = vcombine.low %v2753_v16, %v2757_v31  ;;  %v2764_v35 = vld [vmem:[#allocation3 + $0x220] sm:$0xff]  ;;  %v2773_v16 = vld [vmem:[#allocation3 + $0x268] sm:$0xff] }
 0x222   :  { %v9461_v59 = vsel %vm1417_vm7, %v2618_v48, %v9313_v39  ;;  %1049 = vmax.xlane.f32.xlu1 %v1048_v57  ;;  %3519 = vmatpush1.bf16.msra.mxu0 %v6436_v40  ;;  %v2761_v57 = vld [vmem:[#allocation3 + $0x208] sm:$0xff]  ;;  %v6453_v20 = vcombine.high %v2760_v10, %v2764_v35 }
 0x223   :  { %v9465_v19 = vsel %vm1410_vm6, %v2534_v8, %v9317_v12  ;;  %1007 = vmax.xlane.f32.xlu0 %v1006_v45  ;;  %v432_v27 = vpop.xlane.xlu1 %431  ;;  %v306_v12 = vld [vmem:[%s10862_s0 + $0x6f8] sm:$0xff]  ;;  %3560 = vmatpush1.bf16.msra.mxu1 %v6438_v38  ;;  %v6455_v48 = vcombine.high %v2761_v57, %v2765_v43  ;;  %v6452_v8 = vcombine.low %v2760_v10, %v2764_v35  ;;  %v1051_v38 = vsel %vm339_vm0, %v320_v62, -inf }
 0x224   :  { %v381_v2 = vpop.xlane.xlu0 %380  ;;  %v1547_v39 = vrot.slane %v432_v27, %v9449_v42  ;;  %v1009_v56 = vsel %vm339_vm0, %v306_v12, -inf  ;;  %3520 = vmatprep.subr.bf16.mxu0 %v6445_v9  ;;  %3561 = vmatprep.subr.bf16.mxu1 %v6447_v13  ;;  %v6454_v50 = vcombine.low %v2761_v57, %v2765_v43  ;;  %v2768_v27 = vld [vmem:[#allocation3 + $0x240] sm:$0xff]  ;;  %v338_v10 = vld [vmem:[%s10862_s0 + $0x7f8] sm:$0xff]  ;;  %v2781_v57 = vld [vmem:[#allocation3 + $0x2a8] sm:$0xff]  ;;  %vm2672_vm6 = vcmask 1047559  }
 0x225   :  { %v1458_v23 = vrot.slane %v381_v2, %v9303_v17  ;;  %v2772_v2 = vld [vmem:[#allocation3 + $0x260] sm:$0xff] }
 0x226   :  { %v9479_v3 = vsel %vm1466_vm14, %v1547_v39, %v9331_v58  ;;  %866 = vmax.xlane.f32.xlu1 %v865_v4  ;;  %3521 = vmatpush1.bf16.msra.mxu0 %v6444_v25  ;;  %v2769_v4 = vld [vmem:[#allocation3 + $0x248] sm:$0xff]  ;;  %v6461_v63 = vcombine.high %v2768_v27, %v2772_v2 }
 0x227   :  { %v9483_v41 = vsel %vm1459_vm13, %v1458_v23, %v9335_v5  ;;  %1100 = vmax.xlane.f32.xlu0 %v1099_v37  ;;  %v528_v24 = vpop.xlane.xlu1 %527  ;;  %v337_v5 = vld [vmem:[%s10862_s0 + $0x7f0] sm:$0xff]  ;;  %3562 = vmatpush1.bf16.msra.mxu1 %v6446_v47  ;;  %v6463_v39 = vcombine.high %v2769_v4, %v2773_v16  ;;  %v6460_v23 = vcombine.low %v2768_v27, %v2772_v2  ;;  %v961_v47 = vsel %vm339_vm0, %v290_v55, -inf  ;;  %v2789_v27 = vld [vmem:[#allocation3 + $0x2e8] sm:$0xff] }
 0x228   :  { %v477_v14 = vpop.xlane.xlu0 %476  ;;  %v1705_v58 = vrot.slane %v528_v24, %v9449_v42  ;;  %v1102_v40 = vsel %vm339_vm0, %v337_v5, -inf  ;;  %3522 = vmatprep.subr.bf16.mxu0 %v6453_v20  ;;  %3563 = vmatprep.subr.bf16.mxu1 %v6455_v48  ;;  %v6462_v12 = vcombine.low %v2769_v4, %v2773_v16  ;;  %v2776_v24 = vld [vmem:[#allocation3 + $0x280] sm:$0xff] }
 0x229   :  { %v1621_v45 = vrot.slane %v477_v14, %v9303_v17  ;;  %v2780_v14 = vld [vmem:[#allocation3 + $0x2a0] sm:$0xff] }
 0x22a   :  { %v9497_v53 = vsel %vm1466_vm14, %v1705_v58, %v9349_v49  ;;  %1010 = vmax.xlane.f32.xlu1 %v1009_v56  ;;  %3523 = vmatpush1.bf16.msra.mxu0 %v6452_v8  ;;  %v2777_v56 = vld [vmem:[#allocation3 + $0x288] sm:$0xff]  ;;  %v6469_v35 = vcombine.high %v2776_v24, %v2780_v14  ;;  %v2792_v16 = vld [vmem:[#allocation3 + $0x300] sm:$0xff] }
 0x22b   :  { %v9501_v46 = vsel %vm1459_vm13, %v1621_v45, %v9353_v1  ;;  %959 = vmax.xlane.f32.xlu0 %v958_v22  ;;  %v621_v51 = vpop.xlane.xlu1 %620  ;;  %v321_v1 = vld [vmem:[%s10862_s0 + $0x770] sm:$0xff]  ;;  %3564 = vmatpush1.bf16.msra.mxu1 %v6454_v50  ;;  %v6471_v58 = vcombine.high %v2777_v56, %v2781_v57  ;;  %v6468_v45 = vcombine.low %v2776_v24, %v2780_v14  ;;  %v1105_v50 = vsel %vm339_vm0, %v338_v10, -inf  ;;  %v2804_v10 = vld [vmem:[#allocation3 + $0x360] sm:$0xff] }
 0x22c   :  { %v570_v60 = vpop.xlane.xlu0 %569  ;;  %v1858_v49 = vrot.slane %v621_v51, %v9303_v17  ;;  %v1054_v25 = vsel %vm339_vm0, %v321_v1, -inf  ;;  %3524 = vmatprep.subr.bf16.mxu0 %v6461_v63  ;;  %3565 = vmatprep.subr.bf16.mxu1 %v6463_v39  ;;  %v6470_v5 = vcombine.low %v2777_v56, %v2781_v57  ;;  %v2784_v51 = vld [vmem:[#allocation3 + $0x2c0] sm:$0xff] }
 0x22d   :  { %v1774_v37 = vrot.slane %v570_v60, %v9155_v30  ;;  %v2788_v60 = vld [vmem:[#allocation3 + $0x2e0] sm:$0xff] }
 0x22e   :  { %v9515_v0 = vsel %vm1459_vm13, %v1858_v49, %v9367_v33  ;;  %1103 = vmax.xlane.f32.xlu1 %v1102_v40  ;;  %3525 = vmatpush1.bf16.msra.mxu0 %v6460_v23  ;;  %v2785_v40 = vld [vmem:[#allocation3 + $0x2c8] sm:$0xff]  ;;  %v6476_v4 = vcombine.low %v2784_v51, %v2788_v60  ;;  %v2796_v39 = vld [vmem:[#allocation3 + $0x320] sm:$0xff] }
 0x22f   :  { %v9519_v9 = vsel %vm1452_vm12, %v1774_v37, %v9371_v32  ;;  %1052 = vmax.xlane.f32.xlu0 %v1051_v38  ;;  %v714_v31 = vpop.xlane.xlu1 %713  ;;  %v322_v32 = vld [vmem:[%s10862_s0 + $0x778] sm:$0xff]  ;;  %3566 = vmatpush1.bf16.msra.mxu1 %v6462_v12  ;;  %v6479_v2 = vcombine.high %v2785_v40, %v2789_v27  ;;  %v6478_v49 = vcombine.low %v2785_v40, %v2789_v27  ;;  %v2793_v23 = vld [vmem:[#allocation3 + $0x308] sm:$0xff]  ;;  %v2808_v40 = vld [vmem:[#allocation3 + $0x380] sm:$0xff] }
 0x230   :  { %v663_v13 = vpop.xlane.xlu0 %662  ;;  %v2011_v33 = vrot.slane %v714_v31, %v9155_v30  ;;  %v1057_v8 = vsel %vm339_vm0, %v322_v32, -inf  ;;  %3526 = vmatprep.subr.bf16.mxu0 %v6469_v35  ;;  %3567 = vmatprep.subr.bf16.mxu1 %v6471_v58  ;;  %v2800_v32 = vld [vmem:[#allocation3 + $0x340] sm:$0xff]  ;;  %v2801_v35 = vld [vmem:[#allocation3 + $0x348] sm:$0xff]  ;;  %vm2660_vm0 = vcmask 1041409  }
 0x231   :  { %v1927_v22 = vrot.slane %v663_v13, %v9007_v28  ;;  %v2797_v13 = vld [vmem:[#allocation3 + $0x328] sm:$0xff] }
 0x232   :  { %v9533_v62 = vsel %vm1452_vm12, %v2011_v33, %v9385_v52  ;;  %1055 = vmax.xlane.f32.xlu1 %v1054_v25  ;;  %3527 = vmatpush1.bf16.msra.mxu0 %v6468_v45  ;;  %v6487_v25 = vcombine.high %v2793_v23, %v2797_v13  ;;  %v2805_v45 = vld [vmem:[#allocation3 + $0x368] sm:$0xff] }
 0x233   :  { %v9537_v20 = vsel %vm1445_vm11, %v1927_v22, %v9389_v34  ;;  %962 = vmax.xlane.f32.xlu0 %v961_v47  ;;  %v807_v43 = vpop.xlane.xlu1 %806  ;;  %3568 = vmatpush1.bf16.msra.mxu1 %v6470_v5  ;;  %v6477_v34 = vcombine.high %v2784_v51, %v2788_v60  ;;  %v6486_v47 = vcombine.low %v2793_v23, %v2797_v13  ;;  %v1468_v22 = vadd.s32 4294967176, %v7957_v15  ;;  %v2820_v23 = vld [vmem:[#allocation3 + $0x3e0] sm:$0xff]  ;;  %v2821_v13 = vld [vmem:[#allocation3 + $0x3e8] sm:$0xff] }
 0x234   :  { %v756_v48 = vpop.xlane.xlu0 %755  ;;  %v2164_v52 = vrot.slane %v807_v43, %v9007_v28  ;;  %3569 = vmatprep.subr.bf16.mxu1 %v6479_v2  ;;  %v6495_v5 = vcombine.high %v2801_v35, %v2805_v45  ;;  %v6494_v43 = vcombine.low %v2801_v35, %v2805_v45  ;;  %v2813_v2 = vld [vmem:[#allocation3 + $0x3a8] sm:$0xff]  ;;  %v9597_v35 = vld [vmem:[#allocation3 + $0x18] sm:$0xff] }
 0x235   :  { %v2080_v38 = vrot.slane %v756_v48, %v8859_v7  ;;  %3528 = vmatprep.subr.bf16.mxu0 %v6477_v34  ;;  %v9573_v60 = vsub.s32 %v1468_v22, %v7961_v18 }
 0x236   :  { %v9545_v37 = vsel %vm1445_vm11, %v2164_v52, %v9403_v11  ;;  %1058 = vmax.xlane.f32.xlu1 %v1057_v8  ;;  %3529 = vmatpush1.bf16.msra.mxu0 %v6476_v4  ;;  %v6485_v11 = vcombine.high %v2792_v16, %v2796_v39  ;;  %v2812_v52 = vld [vmem:[#allocation3 + $0x3a0] sm:$0xff] }
 0x237   :  { %v9549_v1 = vsel %vm1438_vm10, %v2080_v38, %v9407_v54  ;;  %1106 = vmax.xlane.f32.xlu0 %v1105_v50  ;;  %v900_v55 = vpop.xlane.xlu1 %899  ;;  %3570 = vmatpush1.bf16.msra.mxu1 %v6478_v49  ;;  %v6484_v54 = vcombine.low %v2792_v16, %v2796_v39  ;;  %v2809_v38 = vld [vmem:[#allocation3 + $0x388] sm:$0xff]  ;;  %v6500_v4 = vcombine.low %v2808_v40, %v2812_v52 }
 0x238   :  { %v849_v63 = vpop.xlane.xlu0 %848  ;;  %v2317_v12 = vrot.slane %v900_v55, %v8859_v7  ;;  %3530 = vmatprep.subr.bf16.mxu0 %v6485_v11  ;;  %3571 = vmatprep.subr.bf16.mxu1 %v6487_v25  ;;  %v6502_v49 = vcombine.low %v2809_v38, %v2813_v2 }
 0x239   :  { %v2233_v31 = vrot.slane %v849_v63, %v8712_v36 }
 0x23a   :  { %v9555_v24 = vsel %vm1438_vm10, %v2317_v12, %v9421_v61  ;;  %3531 = vmatpush1.bf16.msra.mxu0 %v6484_v54  ;;  %v6493_v61 = vcombine.high %v2800_v32, %v2804_v10  ;;  %v2817_v12 = vld [vmem:[#allocation3 + $0x3c8] sm:$0xff] }
 0x23b   :  { %v9559_v14 = vsel %vm1431_vm9, %v2233_v31, %v9425_v6  ;;  %v993_v56 = vpop.xlane.xlu1 %992  ;;  %3572 = vmatpush1.bf16.msra.mxu1 %v6486_v47  ;;  %v6492_v6 = vcombine.low %v2800_v32, %v2804_v10  ;;  %v6511_v25 = vcombine.high %v2817_v12, %v2821_v13  ;;  %v9593_v32 = vld [vmem:[#allocation3 + $0x10] sm:$0xff] }
 0x23c   :  { %v942_v33 = vpop.xlane.xlu0 %941  ;;  %v2470_v57 = vrot.slane %v993_v56, %v8712_v36  ;;  %3532 = vmatprep.subr.bf16.mxu0 %v6493_v61  ;;  %3573 = vmatprep.subr.bf16.mxu1 %v6495_v5  ;;  %v9595_v10 = vld [vmem:[#allocation3 + $0x30] sm:$0xff] }
 0x23d   :  { %v2386_v58 = vrot.slane %v942_v33, %v8569_v21  ;;  %v6392_v61 = vcombine.low %v9593_v32, %v9595_v10 }
 0x23e   :  { %v9566_v48 = vsel %vm1431_vm9, %v2470_v57, %v9440_v26  ;;  %3533 = vmatpush1.bf16.msra.mxu0 %v6492_v6  ;;  %v6501_v26 = vcombine.high %v2808_v40, %v2812_v52 }
 0x23f   :  { %v9570_v8 = vsel %vm1424_vm8, %v2386_v58, %v9444_v29  ;;  %v1086_v50 = vpop.xlane.xlu1 %1085  ;;  %3574 = vmatpush1.bf16.msra.mxu1 %v6494_v43  ;;  %v6503_v29 = vcombine.high %v2809_v38, %v2813_v2 }
 0x240   :  { %v1035_v51 = vpop.xlane.xlu0 %1034  ;;  %v2623_v34 = vrot.slane %v1086_v50, %v8569_v21  ;;  %3534 = vmatprep.subr.bf16.mxu0 %v6501_v26 }
 0x241   :  { %v2539_v27 = vrot.slane %v1035_v51, %v8417_v44  ;;  %3575 = vmatprep.subr.bf16.mxu1 %v6503_v29  ;;  %v2816_v44 = vld [vmem:[#allocation3 + $0x3c0] sm:$0xff] }
 0x242   :  { %v9579_v55 = vsel %vm1424_vm8, %v2623_v34, %v9461_v59  ;;  %3535 = vmatpush1.bf16.msra.mxu0 %v6500_v4  ;;  %v6509_v59 = vcombine.high %v2816_v44, %v2820_v23  ;;  %v6508_v54 = vcombine.low %v2816_v44, %v2820_v23 }
 0x243   :  { %v9583_v63 = vsel %vm1417_vm7, %v2539_v27, %v9465_v19  ;;  %v435_v16 = vpop.xlane.xlu1 %434  ;;  %3576 = vmatpush1.bf16.msra.mxu1 %v6502_v49  ;;  %v6510_v19 = vcombine.low %v2817_v12, %v2821_v13 }
 0x244   :  { %v384_v39 = vpop.xlane.xlu0 %383  ;;  %v1552_v31 = vrot.slane %v435_v16, %v9573_v60  ;;  %3536 = vmatprep.subr.bf16.mxu0 %v6509_v59  ;;  %3577 = vmatprep.subr.bf16.mxu1 %v6511_v25 }
 0x245   :  { %v1465_v11 = vrot.slane %v384_v39, %v9449_v42 }
 0x246   :  { %v1553_v47 = vsel %vm1473_vm15, %v1552_v31, %v9479_v3  ;;  %3537 = vmatpush1.bf16.msra.mxu0 %v6508_v54  ;;  %v6393_v3 = vcombine.high %v9593_v32, %v9595_v10 }
 0x247   :  { %v9591_v56 = vsel %vm1466_vm14, %v1465_v11, %v9483_v41  ;;  %v531_v33 = vpop.xlane.xlu1 %530  ;;  %3578 = vmatpush1.bf16.msra.mxu1 %v6510_v19  ;;  %v9603_v41 = vld [vmem:[#allocation3 + $0x38] sm:$0xff] }
 0x248   :  { %v480_v22 = vpop.xlane.xlu0 %479  ;;  %v1710_v57 = vrot.slane %v531_v33, %v9573_v60  ;;  %v6394_v45 = vcombine.low %v9597_v35, %v9603_v41  ;;  %v6395_v5 = vcombine.high %v9597_v35, %v9603_v41  ;;  %3588 = vmatprep.subr.bf16.mxu0 %v6393_v3 }
 0x249   :  { %v1626_v58 = vrot.slane %v480_v22, %v9449_v42 }
 0x24a   :  { %v1711_v6 = vsel %vm1473_vm15, %v1710_v57, %v9497_v53  ;;  %3629 = vmatprep.subr.bf16.mxu1 %v6395_v5 }
 0x24b   :  { %v1627_v43 = vsel %vm1466_vm14, %v1626_v58, %v9501_v46  ;;  %v2674_v50 = vsel %vm2660_vm0, %v1711_v6, %v1553_v47  ;;  %v624_v51 = vpop.xlane.xlu1 %623 }
 0x24c   :  { %v573_v40 = vpop.xlane.xlu0 %572  ;;  %v1863_v52 = vrot.slane %v624_v51, %v9449_v42 }
 0x24d   :  { %v1779_v38 = vrot.slane %v573_v40, %v9303_v17 }
 0x24e   :  { %v1864_v34 = vsel %vm1466_vm14, %v1863_v52, %v9515_v0 }
 0x24f   :  { %v1780_v27 = vsel %vm1459_vm13, %v1779_v38, %v9519_v9  ;;  %v717_v53 = vpop.xlane.xlu1 %716 }
 0x250   :  { %v666_v26 = vpop.xlane.xlu0 %665  ;;  %v2016_v46 = vrot.slane %v717_v53, %v9303_v17 }
 0x251   :  { %v1932_v2 = vrot.slane %v666_v26, %v9155_v30 }
 0x252   :  { %v2017_v29 = vsel %vm1459_vm13, %v2016_v46, %v9533_v62 }
 0x253   :  { %v1933_v4 = vsel %vm1452_vm12, %v1932_v2, %v9537_v20  ;;  %v810_v49 = vpop.xlane.xlu1 %809 }
 0x254   :  { %v759_v16 = vpop.xlane.xlu0 %758  ;;  %v2169_v39 = vrot.slane %v810_v49, %v9155_v30 }
 0x255   :  { %v2085_v0 = vrot.slane %v759_v16, %v9007_v28 }
 0x256   :  { %v2170_v9 = vsel %vm1452_vm12, %v2169_v39, %v9545_v37 }
 0x257   :  { %v2086_v44 = vsel %vm1445_vm11, %v2085_v0, %v9549_v1  ;;  %v903_v23 = vpop.xlane.xlu1 %902 }
 0x258   :  { %v852_v12 = vpop.xlane.xlu0 %851  ;;  %v2322_v31 = vrot.slane %v903_v23, %v9007_v28 }
 0x259   :  { %v2238_v62 = vrot.slane %v852_v12, %v8859_v7 }
 0x25a   :  { %v2323_v20 = vsel %vm1445_vm11, %v2322_v31, %v9555_v24 }
 0x25b   :  { %v2239_v11 = vsel %vm1438_vm10, %v2238_v62, %v9559_v14  ;;  %v996_v59 = vpop.xlane.xlu1 %995 }
 0x25c   :  { %v945_v13 = vpop.xlane.xlu0 %944  ;;  %v2475_v25 = vrot.slane %v996_v59, %v8859_v7 }
 0x25d   :  { %v2391_v37 = vrot.slane %v945_v13, %v8712_v36 }
 0x25e   :  { %v2476_v1 = vsel %vm1438_vm10, %v2475_v25, %v9566_v48 }
 0x25f   :  { %v2392_v54 = vsel %vm1431_vm9, %v2391_v37, %v9570_v8  ;;  %v1089_v19 = vpop.xlane.xlu1 %1088 }
 0x260   :  { %v1038_v47 = vpop.xlane.xlu0 %1037  ;;  %v2628_v33 = vrot.slane %v1089_v19, %v8712_v36 }
 0x261   :  { %v2544_v24 = vrot.slane %v1038_v47, %v8569_v21 }
 0x262   :  { %v2629_v14 = vsel %vm1431_vm9, %v2628_v33, %v9579_v55 }
 0x263   :  { %v2545_v22 = vsel %vm1424_vm8, %v2544_v24, %v9583_v63  ;;  %v483_v57 = vpop.xlane.xlu1 %482 }
 0x264   :  { %v387_v58 = vpop.xlane.xlu0 %386  ;;  %v1631_v3 = vrot.slane %v483_v57, %v9573_v60 }
 0x265   :  { %v1472_v48 = vrot.slane %v387_v58, %v9573_v60 }
 0x266   :  { %v1632_v8 = vsel %vm1473_vm15, %v1631_v3, %v1627_v43 }
 0x267   :  { %v1474_v5 = vsel %vm1473_vm15, %v1472_v48, %v9591_v56  ;;  %v627_v21 = vpop.xlane.xlu1 %626 }
 0x268   :  { %v2661_v6 = vsel %vm2660_vm0, %v1632_v8, %v1474_v5  ;;  %v576_v51 = vpop.xlane.xlu0 %575  ;;  %v1868_v55 = vrot.slane %v627_v21, %v9573_v60 }
 0x269   :  { %v1784_v63 = vrot.slane %v576_v51, %v9449_v42 }
 0x26a   :  { %v1869_v40 = vsel %vm1473_vm15, %v1868_v55, %v1864_v34 }
 0x26b   :  { %v1785_v52 = vsel %vm1466_vm14, %v1784_v63, %v1780_v27  ;;  %v2675_v38 = vsel %vm2662_vm1, %v1869_v40, %v2674_v50  ;;  %v720_v53 = vpop.xlane.xlu1 %719 }
 0x26c   :  { %v669_v43 = vpop.xlane.xlu0 %668  ;;  %v2021_v26 = vrot.slane %v720_v53, %v9449_v42 }
 0x26d   :  { %v1937_v56 = vrot.slane %v669_v43, %v9303_v17 }
 0x26e   :  { %v2022_v46 = vsel %vm1466_vm14, %v2021_v26, %v2017_v29 }
 0x26f   :  { %v1938_v2 = vsel %vm1459_vm13, %v1937_v56, %v1933_v4  ;;  %v813_v49 = vpop.xlane.xlu1 %812 }
 0x270   :  { %v762_v16 = vpop.xlane.xlu0 %761  ;;  %v2174_v39 = vrot.slane %v813_v49, %v9303_v17 }
 0x271   :  { %v2090_v34 = vrot.slane %v762_v16, %v9155_v30 }
 0x272   :  { %v2175_v27 = vsel %vm1459_vm13, %v2174_v39, %v2170_v9 }
 0x273   :  { %v2091_v50 = vsel %vm1452_vm12, %v2090_v34, %v2086_v44  ;;  %v906_v0 = vpop.xlane.xlu1 %905 }
 0x274   :  { %v855_v23 = vpop.xlane.xlu0 %854  ;;  %v2327_v12 = vrot.slane %v906_v0, %v9155_v30 }
 0x275   :  { %v2243_v31 = vrot.slane %v855_v23, %v9007_v28 }
 0x276   :  { %v9674_v29 = vsel %vm1452_vm12, %v2327_v12, %v2323_v20 }
 0x277   :  { %v9677_v4 = vsel %vm1445_vm11, %v2243_v31, %v2239_v11  ;;  %v999_v62 = vpop.xlane.xlu1 %998 }
 0x278   :  { %v948_v59 = vpop.xlane.xlu0 %947  ;;  %v2480_v13 = vrot.slane %v999_v62, %v9007_v28 }
 0x279   :  { %v2396_v9 = vrot.slane %v948_v59, %v8859_v7 }
 0x27a   :  { %v9682_v44 = vsel %vm1445_vm11, %v2480_v13, %v2476_v1 }
 0x27b   :  { %v9685_v25 = vsel %vm1438_vm10, %v2396_v9, %v2392_v54  ;;  %v1092_v37 = vpop.xlane.xlu1 %1091 }
 0x27c   :  { %v1041_v19 = vpop.xlane.xlu0 %1040  ;;  %v2633_v20 = vrot.slane %v1092_v37, %v8859_v7 }
 0x27d   :  { %v2549_v47 = vrot.slane %v1041_v19, %v8712_v36 }
 0x27e   :  { %v9690_v11 = vsel %vm1438_vm10, %v2633_v20, %v2629_v14 }
 0x27f   :  { %v9693_v33 = vsel %vm1431_vm9, %v2549_v47, %v2545_v22  ;;  %v672_v24 = vpop.xlane.xlu1 %671 }
 0x280   :  { %v579_v57 = vpop.xlane.xlu0 %578  ;;  %v1942_v40 = vrot.slane %v672_v24, %v9449_v42 }
 0x281   :  { %v1789_v1 = vrot.slane %v579_v57, %v9573_v60 }
 0x282   :  { %v1943_v43 = vsel %vm1466_vm14, %v1942_v40, %v1938_v2 }
 0x283   :  { %v1790_v58 = vsel %vm1473_vm15, %v1789_v1, %v1785_v52  ;;  %v765_v3 = vpop.xlane.xlu1 %764 }
 0x284   :  { %v2663_v54 = vsel %vm2662_vm1, %v1790_v58, %v2661_v6  ;;  %v723_v48 = vpop.xlane.xlu0 %722  ;;  %v2095_v13 = vrot.slane %v765_v3, %v9303_v17 }
 0x285   :  { %v2026_v8 = vrot.slane %v723_v48, %v9573_v60 }
 0x287   :  { %v2027_v36 = vsel %vm1473_vm15, %v2026_v8, %v2022_v46  ;;  %v858_v5 = vpop.xlane.xlu1 %857 }
 0x288   :  { %v2676_v14 = vsel %vm2664_vm2, %v2027_v36, %v2675_v38  ;;  %v816_v22 = vpop.xlane.xlu0 %815 }
 0x289   :  { %v2179_v26 = vrot.slane %v816_v22, %v9449_v42 }
 0x28b   :  { %v9701_v21 = vpop.xlane.xlu1 %950  ;;  %v2180_v39 = vsel %vm1466_vm14, %v2179_v26, %v2175_v27  ;;  %v2096_v27 = vsel %vm1459_vm13, %v2095_v13, %v2091_v50 }
 0x28c   :  { %v909_v51 = vpop.xlane.xlu0 %908  ;;  %v2401_v13 = vrot.slane %v9701_v21, %v9007_v28 }
 0x28d   :  { %v2332_v20 = vrot.slane %v909_v51, %v9303_v17 }
 0x28f   :  { %v9703_v55 = vpop.xlane.xlu1 %1043  ;;  %v2333_v48 = vsel %vm1459_vm13, %v2332_v20, %v9674_v29 }
 0x290   :  { %v1002_v63 = vpop.xlane.xlu0 %1001 }
 0x293   :  { %v675_v6 = vpop.xlane.xlu1 %674 }
 0x294   :  { %v9706_v52 = vpop.xlane.xlu0 %1094  ;;  %v1947_v53 = vrot.slane %v675_v6, %v9573_v60 }
 0x295   :  { %v2638_v21 = vrot.slane %v9706_v52, %v9007_v28 }
 0x296   :  { %v1948_v38 = vsel %vm1473_vm15, %v1947_v53, %v1943_v43  ;;  %v2485_v43 = vrot.slane %v1002_v63, %v9155_v30 }
 0x297   :  { %v2665_v56 = vsel %vm2664_vm2, %v1948_v38, %v2663_v54  ;;  %v819_v46 = vpop.xlane.xlu1 %818 }
 0x298   :  { %v768_v49 = vpop.xlane.xlu0 %767  ;;  %v2184_v16 = vrot.slane %v819_v46, %v9573_v60 }
 0x299   :  { %v2100_v9 = vrot.slane %v768_v49, %v9449_v42 }
 0x29a   :  { %v2185_v34 = vsel %vm1473_vm15, %v2184_v16, %v2180_v39 }
 0x29b   :  { %v2677_v0 = vsel %vm2666_vm3, %v2185_v34, %v2676_v14  ;;  %v912_v23 = vpop.xlane.xlu1 %911  ;;  %v2101_v24 = vsel %vm1466_vm14, %v2100_v9, %v2096_v27  ;;  %v2248_v14 = vrot.slane %v858_v5, %v9155_v30  ;;  %v2486_v34 = vsel %vm1452_vm12, %v2485_v43, %v9682_v44 }
 0x29c   :  { %v861_v12 = vpop.xlane.xlu0 %860  ;;  %v2337_v57 = vrot.slane %v912_v23, %v9449_v42 }
 0x29d   :  { %v2253_v6 = vrot.slane %v861_v12, %v9303_v17  ;;  %v2249_v29 = vsel %vm1452_vm12, %v2248_v14, %v9677_v4 }
 0x29e   :  { %v2338_v8 = vsel %vm1466_vm14, %v2337_v57, %v2333_v48  ;;  %v2402_v57 = vsel %vm1445_vm11, %v2401_v13, %v9685_v25 }
 0x29f   :  { %v1005_v2 = vpop.xlane.xlu1 %1004 }
 0x2a0   :  { %v954_v31 = vpop.xlane.xlu0 %953  ;;  %v2490_v46 = vrot.slane %v1005_v2, %v9303_v17 }
 0x2a2   :  { %v2491_v23 = vsel %vm1459_vm13, %v2490_v46, %v2486_v34 }
 0x2a3   :  { %v9717_v62 = vpop.xlane.xlu1 %1097 }
 0x2a4   :  { %v9719_v59 = vpop.xlane.xlu0 %1046 }
 0x2a7   :  { %v864_v37 = vpop.xlane.xlu1 %863 }
 0x2a8   :  { %v771_v19 = vpop.xlane.xlu0 %770  ;;  %v2258_v53 = vrot.slane %v864_v37, %v9449_v42  ;;  %v2406_v37 = vrot.slane %v954_v31, %v9155_v30  ;;  %v2559_v31 = vrot.slane %v9719_v59, %v9007_v28 }
 0x2a9   :  { %v2105_v47 = vrot.slane %v771_v19, %v9573_v60 }
 0x2ab   :  { %v2106_v1 = vsel %vm1473_vm15, %v2105_v47, %v2101_v24  ;;  %v957_v54 = vpop.xlane.xlu1 %956  ;;  %v2554_v47 = vrot.slane %v9703_v55, %v8859_v7 }
 0x2ac   :  { %v2667_v58 = vsel %vm2666_vm3, %v2106_v1, %v2665_v56  ;;  %v915_v3 = vpop.xlane.xlu0 %914  ;;  %v2254_v56 = vsel %vm1459_vm13, %v2253_v6, %v2249_v29  ;;  %v2411_v20 = vrot.slane %v957_v54, %v9303_v17  ;;  %v2407_v1 = vsel %vm1452_vm12, %v2406_v37, %v2402_v57 }
 0x2ad   :  { %v2342_v50 = vrot.slane %v915_v3, %v9573_v60  ;;  %v2259_v49 = vsel %vm1466_vm14, %v2258_v53, %v2254_v56  ;;  %v2555_v28 = vsel %vm1438_vm10, %v2554_v47, %v9693_v33  ;;  %v2731_v47 = vld [vmem:[#allocation3 + $0x118] sm:$0xff] }
 0x2ae   :  { %v2412_v55 = vsel %vm1459_vm13, %v2411_v20, %v2407_v1  ;;  %v2727_v20 = vld [vmem:[#allocation3 + $0xf8] sm:$0xff] }
 0x2af   :  { %v2343_v36 = vsel %vm1473_vm15, %v2342_v50, %v2338_v8  ;;  %v1050_v51 = vpop.xlane.xlu1 %1049  ;;  %v2560_v8 = vsel %vm1445_vm11, %v2559_v31, %v2555_v28  ;;  %v2746_v28 = vld [vmem:[#allocation3 + $0x190] sm:$0xff] }
 0x2b0   :  { %v2678_v22 = vsel %vm2668_vm4, %v2343_v36, %v2677_v0  ;;  %v1008_v40 = vpop.xlane.xlu0 %1007  ;;  %v2564_v54 = vrot.slane %v1050_v51, %v9155_v30 }
 0x2b1   :  { %v2495_v16 = vrot.slane %v1008_v40, %v9449_v42 }
 0x2b2   :  { %v2565_v14 = vsel %vm1452_vm12, %v2564_v54, %v2560_v8  ;;  %v2742_v54 = vld [vmem:[#allocation3 + $0x170] sm:$0xff] }
 0x2b3   :  { %v867_v26 = vpop.xlane.xlu1 %866  ;;  %v2496_v2 = vsel %vm1466_vm14, %v2495_v16, %v2491_v23  ;;  %v2711_v16 = vld [vmem:[#allocation3 + $0x78] sm:$0xff] }
 0x2b4   :  { %v1101_v38 = vpop.xlane.xlu0 %1100  ;;  %v2263_v5 = vrot.slane %v867_v26, %v9573_v60  ;;  %v2715_v23 = vld [vmem:[#allocation3 + $0x98] sm:$0xff] }
 0x2b5   :  { %v2648_v48 = vrot.slane %v1101_v38, %v9303_v17  ;;  %v2706_v38 = vld [vmem:[#allocation3 + $0x50] sm:$0xff] }
 0x2b6   :  { %v2264_v39 = vsel %vm1473_vm15, %v2263_v5, %v2259_v49  ;;  %v2710_v5 = vld [vmem:[#allocation3 + $0x70] sm:$0xff]  ;;  %v2707_v49 = vld [vmem:[#allocation3 + $0x58] sm:$0xff] }
 0x2b7   :  { %v2669_v4 = vsel %vm2668_vm4, %v2264_v39, %v2667_v58  ;;  %v1011_v63 = vpop.xlane.xlu1 %1010  ;;  %v2643_v58 = vrot.slane %v9717_v62, %v9155_v30  ;;  %v2639_v30 = vsel %vm1445_vm11, %v2638_v21, %v9690_v11  ;;  %v6402_v13 = vcombine.low %v2707_v49, %v2711_v16 }
 0x2b8   :  { %v960_v0 = vpop.xlane.xlu0 %959  ;;  %v2500_v12 = vrot.slane %v1011_v63, %v9573_v60  ;;  %v6403_v63 = vcombine.high %v2707_v49, %v2711_v16  ;;  %v2770_v49 = vld [vmem:[#allocation3 + $0x250] sm:$0xff] }
 0x2b9   :  { %v2416_v24 = vrot.slane %v960_v0, %v9449_v42  ;;  %v2718_v0 = vld [vmem:[#allocation3 + $0xb0] sm:$0xff] }
 0x2ba   :  { %v2501_v9 = vsel %vm1473_vm15, %v2500_v12, %v2496_v2  ;;  %v2719_v12 = vld [vmem:[#allocation3 + $0xb8] sm:$0xff]  ;;  %v6400_v2 = vcombine.low %v2706_v38, %v2710_v5  ;;  %v2774_v16 = vld [vmem:[#allocation3 + $0x270] sm:$0xff] }
 0x2bb   :  { %v2679_v44 = vsel %vm2670_vm5, %v2501_v9, %v2678_v22  ;;  %v1104_v19 = vpop.xlane.xlu1 %1103  ;;  %v2417_v59 = vsel %vm1466_vm14, %v2416_v24, %v2412_v55  ;;  %v6411_v37 = vcombine.high %v2715_v23, %v2719_v12  ;;  %v6410_v10 = vcombine.low %v2715_v23, %v2719_v12  ;;  %v2735_v24 = vld [vmem:[#allocation3 + $0x138] sm:$0xff]  ;;  %v2778_v12 = vld [vmem:[#allocation3 + $0x290] sm:$0xff] }
 0x2bc   :  { %v1053_v27 = vpop.xlane.xlu0 %1052  ;;  %v2653_v50 = vrot.slane %v1104_v19, %v9449_v42  ;;  %v2726_v19 = vld [vmem:[#allocation3 + $0xf0] sm:$0xff]  ;;  %v6427_v1 = vcombine.high %v2731_v47, %v2735_v24 }
 0x2bd   :  { %v2569_v25 = vrot.slane %v1053_v27, %v9303_v17  ;;  %v2644_v17 = vsel %vm1452_vm12, %v2643_v58, %v2639_v30  ;;  %v2723_v27 = vld [vmem:[#allocation3 + $0xd8] sm:$0xff]  ;;  %v2738_v58 = vld [vmem:[#allocation3 + $0x150] sm:$0xff] }
 0x2be   :  { %v2649_v40 = vsel %vm1459_vm13, %v2648_v48, %v2644_v17  ;;  %v6419_v41 = vcombine.high %v2723_v27, %v2727_v20  ;;  %v6418_v21 = vcombine.low %v2723_v27, %v2727_v20  ;;  %v6426_v48 = vcombine.low %v2731_v47, %v2735_v24  ;;  %v2786_v20 = vld [vmem:[#allocation3 + $0x2d0] sm:$0xff] }
 0x2bf   :  { %v1056_v3 = vpop.xlane.xlu1 %1055  ;;  %v2654_v53 = vsel %vm1466_vm14, %v2653_v50, %v2649_v40  ;;  %v2747_v50 = vld [vmem:[#allocation3 + $0x198] sm:$0xff]  ;;  %v6432_v30 = vcombine.low %v2738_v58, %v2742_v54  ;;  %v2794_v24 = vld [vmem:[#allocation3 + $0x310] sm:$0xff] }
 0x2c0   :  { %v963_v7 = vpop.xlane.xlu0 %962  ;;  %v2574_v62 = vrot.slane %v1056_v3, %v9449_v42  ;;  %v2570_v42 = vsel %vm1459_vm13, %v2569_v25, %v2565_v14  ;;  %v2739_v3 = vld [vmem:[#allocation3 + $0x158] sm:$0xff]  ;;  %v6433_v25 = vcombine.high %v2738_v58, %v2742_v54  ;;  %v2754_v14 = vld [vmem:[#allocation3 + $0x1d0] sm:$0xff] }
 0x2c1   :  { %v2421_v52 = vrot.slane %v963_v7, %v9573_v60  ;;  %v2743_v7 = vld [vmem:[#allocation3 + $0x178] sm:$0xff] }
 0x2c2   :  { %v2575_v29 = vsel %vm1466_vm14, %v2574_v62, %v2570_v42  ;;  %v2751_v62 = vld [vmem:[#allocation3 + $0x1b8] sm:$0xff]  ;;  %v6434_v8 = vcombine.low %v2739_v3, %v2743_v7 }
 0x2c3   :  { %v2422_v36 = vsel %vm1473_vm15, %v2421_v52, %v2417_v59  ;;  %v1059_v33 = vpop.xlane.xlu1 %1058  ;;  %v6435_v52 = vcombine.high %v2739_v3, %v2743_v7  ;;  %v2750_v59 = vld [vmem:[#allocation3 + $0x1b0] sm:$0xff]  ;;  %v6443_v17 = vcombine.high %v2747_v50, %v2751_v62  ;;  %v6442_v42 = vcombine.low %v2747_v50, %v2751_v62 }
 0x2c4   :  { %v2671_v22 = vsel %vm2670_vm5, %v2422_v36, %v2669_v4  ;;  %v1107_v51 = vpop.xlane.xlu0 %1106  ;;  %v2579_v6 = vrot.slane %v1059_v33, %v9573_v60  ;;  %v6401_v4 = vcombine.high %v2706_v38, %v2710_v5  ;;  %v6441_v36 = vcombine.high %v2746_v28, %v2750_v59  ;;  %v2755_v33 = vld [vmem:[#allocation3 + $0x1d8] sm:$0xff]  ;;  %v2802_v7 = vld [vmem:[#allocation3 + $0x350] sm:$0xff] }
 0x2c5   :  { %v2658_v11 = vrot.slane %v1107_v51, %v9573_v60  ;;  %v2714_v60 = vld [vmem:[#allocation3 + $0x90] sm:$0xff]  ;;  %v2759_v51 = vld [vmem:[#allocation3 + $0x1f8] sm:$0xff]  ;;  %v6440_v40 = vcombine.low %v2746_v28, %v2750_v59 }
 0x2c6   :  { %v2580_v43 = vsel %vm1473_vm15, %v2579_v6, %v2575_v29  ;;  %v6409_v9 = vcombine.high %v2714_v60, %v2718_v0  ;;  %v6408_v32 = vcombine.low %v2714_v60, %v2718_v0  ;;  %v2766_v29 = vld [vmem:[#allocation3 + $0x230] sm:$0xff]  ;;  %v2775_v60 = vld [vmem:[#allocation3 + $0x278] sm:$0xff]  ;;  %v6465_v0 = vcombine.high %v2770_v49, %v2774_v16 }
 0x2c7   :  { %v2659_v26 = vsel %vm1473_vm15, %v2658_v11, %v2654_v53  ;;  %v2673_v56 = vsel %vm2672_vm6, %v2580_v43, %v2671_v22  ;;  %v2758_v22 = vld [vmem:[#allocation3 + $0x1f0] sm:$0xff]  ;;  %v6451_v11 = vcombine.high %v2755_v33, %v2759_v51  ;;  %v2763_v43 = vld [vmem:[#allocation3 + $0x218] sm:$0xff] }
 0x2c8   :  { %v2680_v46 = vsel %vm2672_vm6, %v2659_v26, %v2679_v44  ;;  %2692 = vst [vmem:[#allocation10] sm:$0xff] %v2673_v56  ;;  %v9797_v34 = vpack.c.bf16 %v2673_v56, %v2673_v56  ;;  %v2722_v44 = vld [vmem:[#allocation3 + $0xd0] sm:$0xff]  ;;  %v6449_v6 = vcombine.high %v2754_v14, %v2758_v22  ;;  %v2767_v26 = vld [vmem:[#allocation3 + $0x238] sm:$0xff]  ;;  %v6448_v38 = vcombine.low %v2754_v14, %v2758_v22 }
 0x2c9   :  { %2693 = vst [vmem:[#allocation10 + $0x8] sm:$0xff] %v2680_v46  ;;  %v2695_v39 = vpack.c.bf16 %v2680_v46, %v2680_v46  ;;  %v6417_v35 = vcombine.high %v2722_v44, %v2726_v19  ;;  %v6416_v57 = vcombine.low %v2722_v44, %v2726_v19  ;;  %v2762_v53 = vld [vmem:[#allocation3 + $0x210] sm:$0xff]  ;;  %v6450_v56 = vcombine.low %v2755_v33, %v2759_v51 }
 0x2ca   :  { %v6457_v46 = vcombine.high %v2762_v53, %v2766_v29  ;;  %v6459_v5 = vcombine.high %v2763_v43, %v2767_v26  ;;  %v2810_v62 = vld [vmem:[#allocation3 + $0x390] sm:$0xff] }
 0x2cb   :  { %3538 = vmatprep.mubr.bf16.mxu0 %v2695_v39  ;;  %3579 = vmatprep.mubr.bf16.mxu1 %v2695_v39  ;;  %v2818_v51 = vld [vmem:[#allocation3 + $0x3d0] sm:$0xff] }
 0x2cc   :  { %3539 = vmatmul.mubr.bf16.vlgmr.msra.gmra.mrb[0].mxu0 %v9797_v34  ;;  %3580 = vmatmul.mubr.bf16.vlgmr.msra.gmra.mrb[0].mxu1 %v9797_v34 }
 0x2cd   :  { %3589 = vmatpush1.bf16.msra.mxu0 %v6392_v61  ;;  %3630 = vmatpush1.bf16.msra.mxu1 %v6394_v45  ;;  %v2730_v61 = vld [vmem:[#allocation3 + $0x110] sm:$0xff] }
 0x2ce   :  { %3620 = vmatprep.mubr.bf16.mxu0 %v2695_v39  ;;  %3661 = vmatprep.mubr.bf16.mxu1 %v2695_v39  ;;  %v2734_v45 = vld [vmem:[#allocation3 + $0x130] sm:$0xff]  ;;  %v2771_v39 = vld [vmem:[#allocation3 + $0x258] sm:$0xff] }
 0x2cf   :  { %3590 = vmatprep.subr.bf16.mxu0 %v6401_v4  ;;  %3631 = vmatprep.subr.bf16.mxu1 %v6403_v63  ;;  %v6425_v31 = vcombine.high %v2730_v61, %v2734_v45  ;;  %v6424_v55 = vcombine.low %v2730_v61, %v2734_v45  ;;  %v6456_v4 = vcombine.low %v2762_v53, %v2766_v29 }
 0x2d0   :  { %v6458_v63 = vcombine.low %v2763_v43, %v2767_v26  ;;  %v6467_v23 = vcombine.high %v2771_v39, %v2775_v60  ;;  %v6466_v44 = vcombine.low %v2771_v39, %v2775_v60  ;;  %v6925_v39 = vld [vmem:[%s10865_s3 + $0x2c] ss:$16 sps:$4 sm:$0xff]   ;;  %v6920_v60 = vld [vmem:[%s10865_s3 + $0x20] ss:$16 sps:$4 sm:$0xff]  }
 0x2d1   :  { %3591 = vmatpush1.bf16.msra.mxu0 %v6400_v2  ;;  %3632 = vmatpush1.bf16.msra.mxu1 %v6402_v13  ;;  %v2782_v2 = vld [vmem:[#allocation3 + $0x2b0] sm:$0xff]  ;;  %v2779_v13 = vld [vmem:[#allocation3 + $0x298] sm:$0xff] }
 0x2d2   :  { %3592 = vmatprep.subr.bf16.mxu0 %v6409_v9  ;;  %3633 = vmatprep.subr.bf16.mxu1 %v6411_v37  ;;  %v2783_v9 = vld [vmem:[#allocation3 + $0x2b8] sm:$0xff]  ;;  %v6464_v37 = vcombine.low %v2770_v49, %v2774_v16  ;;  %v6473_v19 = vcombine.high %v2778_v12, %v2782_v2  ;;  %v6922_v16 = vld [vmem:[%s10865_s3 + $0x24] ss:$16 sps:$4 sm:$0xff]  }
 0x2d3   :  { %v6475_v27 = vcombine.high %v2779_v13, %v2783_v9  ;;  %v6474_v61 = vcombine.low %v2779_v13, %v2783_v9  ;;  %v6917_v49 = vld [vmem:[%s10865_s3 + $0x8] ss:$16 sps:$4 sm:$0xff]   ;;  %v6932_v13 = vld [vmem:[%s10865_s3 + $0x60] ss:$16 sps:$4 sm:$0xff]  }
 0x2d4   :  { %v6935_v9 = vld [vmem:[%s10865_s3 + $0x68] ss:$16 sps:$4 sm:$0xff]  }
 0x2d5   :  { %3593 = vmatpush1.bf16.msra.mxu0 %v6408_v32  ;;  %3634 = vmatpush1.bf16.msra.mxu1 %v6410_v10  ;;  %v2790_v32 = vld [vmem:[#allocation3 + $0x2f0] sm:$0xff]  ;;  %v2787_v10 = vld [vmem:[#allocation3 + $0x2d8] sm:$0xff] }
 0x2d6   :  { %3594 = vmatprep.subr.bf16.mxu0 %v6417_v35  ;;  %3635 = vmatprep.subr.bf16.mxu1 %v6419_v41  ;;  %v2791_v35 = vld [vmem:[#allocation3 + $0x2f8] sm:$0xff]  ;;  %v6472_v41 = vcombine.low %v2778_v12, %v2782_v2  ;;  %v6481_v45 = vcombine.high %v2786_v20, %v2790_v32  ;;  %v6934_v12 = vld [vmem:[%s10865_s3 + $0x64] ss:$16 sps:$4 sm:$0xff]  }
 0x2d7   :  { %v6483_v47 = vcombine.high %v2787_v10, %v2791_v35  ;;  %v6482_v58 = vcombine.low %v2787_v10, %v2791_v35  ;;  %v6937_v2 = vld [vmem:[%s10865_s3 + $0x6c] ss:$16 sps:$4 sm:$0xff]   ;;  %v6944_v10 = vld [vmem:[%s10865_s3 + $0xa0] ss:$16 sps:$4 sm:$0xff]   ;;  %v6947_v35 = vld [vmem:[%s10865_s3 + $0xa8] ss:$16 sps:$4 sm:$0xff]  }
 0x2d9   :  { %3595 = vmatpush1.bf16.msra.mxu0 %v6416_v57  ;;  %3636 = vmatpush1.bf16.msra.mxu1 %v6418_v21  ;;  %v2798_v57 = vld [vmem:[#allocation3 + $0x330] sm:$0xff]  ;;  %v2795_v21 = vld [vmem:[#allocation3 + $0x318] sm:$0xff] }
 0x2da   :  { %3596 = vmatprep.subr.bf16.mxu0 %v6425_v31  ;;  %3637 = vmatprep.subr.bf16.mxu1 %v6427_v1  ;;  %v2799_v31 = vld [vmem:[#allocation3 + $0x338] sm:$0xff]  ;;  %v6480_v1 = vcombine.low %v2786_v20, %v2790_v32  ;;  %v6489_v54 = vcombine.high %v2794_v24, %v2798_v57  ;;  %v6946_v20 = vld [vmem:[%s10865_s3 + $0xa4] ss:$16 sps:$4 sm:$0xff]  }
 0x2db   :  { %v6491_v3 = vcombine.high %v2795_v21, %v2799_v31  ;;  %v6490_v28 = vcombine.low %v2795_v21, %v2799_v31  ;;  %v6949_v32 = vld [vmem:[%s10865_s3 + $0xac] ss:$16 sps:$4 sm:$0xff]   ;;  %v6956_v21 = vld [vmem:[%s10865_s3 + $0xe0] ss:$16 sps:$4 sm:$0xff]   ;;  %v6959_v31 = vld [vmem:[%s10865_s3 + $0xe8] ss:$16 sps:$4 sm:$0xff]  }
 0x2dd   :  { %3597 = vmatpush1.bf16.msra.mxu0 %v6424_v55  ;;  %3638 = vmatpush1.bf16.msra.mxu1 %v6426_v48  ;;  %v2806_v55 = vld [vmem:[#allocation3 + $0x370] sm:$0xff]  ;;  %v2803_v48 = vld [vmem:[#allocation3 + $0x358] sm:$0xff] }
 0x2de   :  { %3598 = vmatprep.subr.bf16.mxu0 %v6433_v25  ;;  %3639 = vmatprep.subr.bf16.mxu1 %v6435_v52  ;;  %v2807_v25 = vld [vmem:[#allocation3 + $0x378] sm:$0xff]  ;;  %v6488_v52 = vcombine.low %v2794_v24, %v2798_v57  ;;  %v6497_v59 = vcombine.high %v2802_v7, %v2806_v55  ;;  %v6958_v24 = vld [vmem:[%s10865_s3 + $0xe4] ss:$16 sps:$4 sm:$0xff]  }
 0x2df   :  { %v6499_v50 = vcombine.high %v2803_v48, %v2807_v25  ;;  %v6498_v14 = vcombine.low %v2803_v48, %v2807_v25  ;;  %v6961_v57 = vld [vmem:[%s10865_s3 + $0xec] ss:$16 sps:$4 sm:$0xff]   ;;  %v6968_v48 = vld [vmem:[%s10865_s3 + $0x120] ss:$16 sps:$4 sm:$0xff]   ;;  %v6971_v25 = vld [vmem:[%s10865_s3 + $0x128] ss:$16 sps:$4 sm:$0xff]  }
 0x2e1   :  { %3599 = vmatpush1.bf16.msra.mxu0 %v6432_v30  ;;  %3640 = vmatpush1.bf16.msra.mxu1 %v6434_v8  ;;  %v2814_v30 = vld [vmem:[#allocation3 + $0x3b0] sm:$0xff]  ;;  %v2811_v8 = vld [vmem:[#allocation3 + $0x398] sm:$0xff] }
 0x2e2   :  { %3600 = vmatprep.subr.bf16.mxu0 %v6441_v36  ;;  %3641 = vmatprep.subr.bf16.mxu1 %v6443_v17  ;;  %v2815_v36 = vld [vmem:[#allocation3 + $0x3b8] sm:$0xff]  ;;  %v6496_v17 = vcombine.low %v2802_v7, %v2806_v55  ;;  %v6505_v22 = vcombine.high %v2810_v62, %v2814_v30  ;;  %v6970_v7 = vld [vmem:[%s10865_s3 + $0x124] ss:$16 sps:$4 sm:$0xff]  }
 0x2e3   :  { %v6507_v33 = vcombine.high %v2811_v8, %v2815_v36  ;;  %v6506_v53 = vcombine.low %v2811_v8, %v2815_v36  ;;  %v6973_v55 = vld [vmem:[%s10865_s3 + $0x12c] ss:$16 sps:$4 sm:$0xff]   ;;  %v6980_v8 = vld [vmem:[%s10865_s3 + $0x160] ss:$16 sps:$4 sm:$0xff]   ;;  %v6983_v36 = vld [vmem:[%s10865_s3 + $0x168] ss:$16 sps:$4 sm:$0xff]  }
 0x2e5   :  { %3601 = vmatpush1.bf16.msra.mxu0 %v6440_v40  ;;  %3642 = vmatpush1.bf16.msra.mxu1 %v6442_v42  ;;  %v2822_v40 = vld [vmem:[#allocation3 + $0x3f0] sm:$0xff]  ;;  %v2819_v42 = vld [vmem:[#allocation3 + $0x3d8] sm:$0xff] }
 0x2e6   :  { %3602 = vmatprep.subr.bf16.mxu0 %v6449_v6  ;;  %3643 = vmatprep.subr.bf16.mxu1 %v6451_v11  ;;  %v2823_v6 = vld [vmem:[#allocation3 + $0x3f8] sm:$0xff]  ;;  %v6504_v11 = vcombine.low %v2810_v62, %v2814_v30  ;;  %v6513_v29 = vcombine.high %v2818_v51, %v2822_v40  ;;  %v6512_v26 = vcombine.low %v2818_v51, %v2822_v40  ;;  %v6982_v62 = vld [vmem:[%s10865_s3 + $0x164] ss:$16 sps:$4 sm:$0xff]  }
 0x2e7   :  { %v6515_v43 = vcombine.high %v2819_v42, %v2823_v6  ;;  %v6985_v30 = vld [vmem:[%s10865_s3 + $0x16c] ss:$16 sps:$4 sm:$0xff]   ;;  %v6994_v51 = vld [vmem:[%s10865_s3 + $0x1a4] ss:$16 sps:$4 sm:$0xff]  }
 0x2e8   :  { %v6997_v40 = vld [vmem:[%s10865_s3 + $0x1ac] ss:$16 sps:$4 sm:$0xff]  }
 0x2e9   :  { %3603 = vmatpush1.bf16.msra.mxu0 %v6448_v38  ;;  %3644 = vmatpush1.bf16.msra.mxu1 %v6450_v56  ;;  %v6514_v38 = vcombine.low %v2819_v42, %v2823_v6  ;;  %v6916_v56 = vld [vmem:[%s10865_s3 + $0x4] ss:$16 sps:$4 sm:$0xff]   ;;  %v6992_v42 = vld [vmem:[%s10865_s3 + $0x1a0] ss:$16 sps:$4 sm:$0xff]   ;;  %v6995_v6 = vld [vmem:[%s10865_s3 + $0x1a8] ss:$16 sps:$4 sm:$0xff]  }
 0x2ea   :  { %3604 = vmatprep.subr.bf16.mxu0 %v6457_v46  ;;  %3645 = vmatprep.subr.bf16.mxu1 %v6459_v5  ;;  %v6919_v46 = vld [vmem:[%s10865_s3 + $0xc] ss:$16 sps:$4 sm:$0xff]   ;;  %v6914_v5 = vld [vmem:[%s10865_s3] ss:$16 sps:$4 sm:$0xff]  }
 0x2ed   :  { %3605 = vmatpush1.bf16.msra.mxu0 %v6456_v4  ;;  %3646 = vmatpush1.bf16.msra.mxu1 %v6458_v63  ;;  %v6923_v4 = vld [vmem:[%s10865_s3 + $0x28] ss:$16 sps:$4 sm:$0xff]   ;;  %v6928_v63 = vld [vmem:[%s10865_s3 + $0x44] ss:$16 sps:$4 sm:$0xff]  }
 0x2ee   :  { %3606 = vmatprep.subr.bf16.mxu0 %v6465_v0  ;;  %3647 = vmatprep.subr.bf16.mxu1 %v6467_v23  ;;  %v6926_v0 = vld [vmem:[%s10865_s3 + $0x40] ss:$16 sps:$4 sm:$0xff]   ;;  %v6929_v23 = vld [vmem:[%s10865_s3 + $0x48] ss:$16 sps:$4 sm:$0xff]  }
 0x2f1   :  { %3607 = vmatpush1.bf16.msra.mxu0 %v6464_v37  ;;  %3648 = vmatpush1.bf16.msra.mxu1 %v6466_v44  ;;  %v6940_v37 = vld [vmem:[%s10865_s3 + $0x84] ss:$16 sps:$4 sm:$0xff]   ;;  %v6943_v44 = vld [vmem:[%s10865_s3 + $0x8c] ss:$16 sps:$4 sm:$0xff]  }
 0x2f2   :  { %3608 = vmatprep.subr.bf16.mxu0 %v6473_v19  ;;  %3649 = vmatprep.subr.bf16.mxu1 %v6475_v27  ;;  %v6938_v19 = vld [vmem:[%s10865_s3 + $0x80] ss:$16 sps:$4 sm:$0xff]   ;;  %v6941_v27 = vld [vmem:[%s10865_s3 + $0x88] ss:$16 sps:$4 sm:$0xff]  }
 0x2f5   :  { %3609 = vmatpush1.bf16.msra.mxu0 %v6472_v41  ;;  %3650 = vmatpush1.bf16.msra.mxu1 %v6474_v61  ;;  %v6952_v41 = vld [vmem:[%s10865_s3 + $0xc4] ss:$16 sps:$4 sm:$0xff]   ;;  %v6955_v61 = vld [vmem:[%s10865_s3 + $0xcc] ss:$16 sps:$4 sm:$0xff]  }
 0x2f6   :  { %3610 = vmatprep.subr.bf16.mxu0 %v6481_v45  ;;  %3651 = vmatprep.subr.bf16.mxu1 %v6483_v47  ;;  %v6950_v45 = vld [vmem:[%s10865_s3 + $0xc0] ss:$16 sps:$4 sm:$0xff]   ;;  %v6953_v47 = vld [vmem:[%s10865_s3 + $0xc8] ss:$16 sps:$4 sm:$0xff]  }
 0x2f9   :  { %3611 = vmatpush1.bf16.msra.mxu0 %v6480_v1  ;;  %3652 = vmatpush1.bf16.msra.mxu1 %v6482_v58  ;;  %v6964_v1 = vld [vmem:[%s10865_s3 + $0x104] ss:$16 sps:$4 sm:$0xff]   ;;  %v6967_v58 = vld [vmem:[%s10865_s3 + $0x10c] ss:$16 sps:$4 sm:$0xff]  }
 0x2fa   :  { %3612 = vmatprep.subr.bf16.mxu0 %v6489_v54  ;;  %3653 = vmatprep.subr.bf16.mxu1 %v6491_v3  ;;  %v6962_v54 = vld [vmem:[%s10865_s3 + $0x100] ss:$16 sps:$4 sm:$0xff]   ;;  %v6965_v3 = vld [vmem:[%s10865_s3 + $0x108] ss:$16 sps:$4 sm:$0xff]  }
 0x2fd   :  { %3613 = vmatpush1.bf16.msra.mxu0 %v6488_v52  ;;  %3654 = vmatpush1.bf16.msra.mxu1 %v6490_v28  ;;  %v6976_v52 = vld [vmem:[%s10865_s3 + $0x144] ss:$16 sps:$4 sm:$0xff]   ;;  %v6979_v28 = vld [vmem:[%s10865_s3 + $0x14c] ss:$16 sps:$4 sm:$0xff]  }
 0x2fe   :  { %3614 = vmatprep.subr.bf16.mxu0 %v6497_v59  ;;  %3655 = vmatprep.subr.bf16.mxu1 %v6499_v50  ;;  %v6974_v59 = vld [vmem:[%s10865_s3 + $0x140] ss:$16 sps:$4 sm:$0xff]   ;;  %v6977_v50 = vld [vmem:[%s10865_s3 + $0x148] ss:$16 sps:$4 sm:$0xff]  }
 0x301   :  { %3615 = vmatpush1.bf16.msra.mxu0 %v6496_v17  ;;  %3656 = vmatpush1.bf16.msra.mxu1 %v6498_v14  ;;  %v6988_v17 = vld [vmem:[%s10865_s3 + $0x184] ss:$16 sps:$4 sm:$0xff]   ;;  %v6991_v14 = vld [vmem:[%s10865_s3 + $0x18c] ss:$16 sps:$4 sm:$0xff]  }
 0x302   :  { %3616 = vmatprep.subr.bf16.mxu0 %v6505_v22  ;;  %3657 = vmatprep.subr.bf16.mxu1 %v6507_v33  ;;  %v6986_v22 = vld [vmem:[%s10865_s3 + $0x180] ss:$16 sps:$4 sm:$0xff]   ;;  %v6989_v33 = vld [vmem:[%s10865_s3 + $0x188] ss:$16 sps:$4 sm:$0xff]  }
 0x305   :  { %3617 = vmatpush1.bf16.msra.mxu0 %v6504_v11  ;;  %3658 = vmatpush1.bf16.msra.mxu1 %v6506_v53  ;;  %v7000_v11 = vld [vmem:[%s10865_s3 + $0x1c4] ss:$16 sps:$4 sm:$0xff]   ;;  %v7003_v53 = vld [vmem:[%s10865_s3 + $0x1cc] ss:$16 sps:$4 sm:$0xff]  }
 0x306   :  { %3618 = vmatprep.subr.bf16.mxu0 %v6513_v29  ;;  %3659 = vmatprep.subr.bf16.mxu1 %v6515_v43  ;;  %v6998_v29 = vld [vmem:[%s10865_s3 + $0x1c0] ss:$16 sps:$4 sm:$0xff]   ;;  %v7001_v43 = vld [vmem:[%s10865_s3 + $0x1c8] ss:$16 sps:$4 sm:$0xff]  }
 0x309   :  { %3619 = vmatpush1.bf16.msra.mxu0 %v6512_v26  ;;  %3660 = vmatpush1.bf16.msra.mxu1 %v6514_v38  ;;  %v7006_v26 = vld [vmem:[%s10865_s3 + $0x1e4] ss:$16 sps:$4 sm:$0xff]   ;;  %v7009_v38 = vld [vmem:[%s10865_s3 + $0x1ec] ss:$16 sps:$4 sm:$0xff]  }
 0x30a   :  { %5244 = vmatprep.subr.bf16.mxu0 %v6916_v56  ;;  %5408 = vmatprep.subr.bf16.mxu1 %v6919_v46  ;;  %v7004_v56 = vld [vmem:[%s10865_s3 + $0x1e0] ss:$16 sps:$4 sm:$0xff]   ;;  %v7007_v46 = vld [vmem:[%s10865_s3 + $0x1e8] ss:$16 sps:$4 sm:$0xff]  }
 0x30c   :  { %3621 = vmatmul.mubr.bf16.vlgmr.msra.gmra.mrb[4].mxu0 %v9797_v34  ;;  %3662 = vmatmul.mubr.bf16.vlgmr.msra.gmra.mrb[4].mxu1 %v9797_v34  ;;  %v6931_v34 = vld [vmem:[%s10865_s3 + $0x4c] ss:$16 sps:$4 sm:$0xff]  }
 0x30d   :  { %5245 = vmatpush1.bf16.msra.mxu0 %v6914_v5  ;;  %5409 = vmatpush1.bf16.msra.mxu1 %v6917_v49  ;;  %v7012_v5 = vld [vmem:[%s10865_s3 + $0x204] ss:$16 sps:$4 sm:$0xff]   ;;  %v7015_v49 = vld [vmem:[%s10865_s3 + $0x20c] ss:$16 sps:$4 sm:$0xff]  }
 0x30e   :  { %5246 = vmatprep.subr.bf16.mxu0 %v6922_v16  ;;  %5410 = vmatprep.subr.bf16.mxu1 %v6925_v39  ;;  %v10008_v16 = vsub.s32 0, %v7961_v18  ;;  %v10013_v39 = vld [vmem:[%s10864_s2] sm:$0xff] }
 0x311   :  { %5247 = vmatpush1.bf16.msra.mxu0 %v6920_v60  ;;  %5411 = vmatpush1.bf16.msra.mxu1 %v6923_v4  ;;  %v10016_v60 = vsub.s32 1, %v7961_v18  ;;  %v2840_v4 = vsub.s32 3, %v7961_v18 }
 0x312   :  { %5248 = vmatprep.subr.bf16.mxu0 %v6928_v63  ;;  %5412 = vmatprep.subr.bf16.mxu1 %v6931_v34  ;;  %v2829_v63 = vrot.slane %v10013_v39, %v10008_v16 }
 0x313   :  { %v2833_v34 = vrot.slane %v10013_v39, %v10016_v60 }
 0x315   :  { %5249 = vmatpush1.bf16.msra.mxu0 %v6926_v0  ;;  %5413 = vmatpush1.bf16.msra.mxu1 %v6929_v23  ;;  %v2841_v0 = vrot.slane %v10013_v39, %v2840_v4 }
 0x316   :  { %5250 = vmatprep.subr.bf16.mxu0 %v6934_v12  ;;  %5414 = vmatprep.subr.bf16.mxu1 %v6937_v2 }
 0x319   :  { %5251 = vmatpush1.bf16.msra.mxu0 %v6932_v13  ;;  %5415 = vmatpush1.bf16.msra.mxu1 %v6935_v9 }
 0x31a   :  { %5252 = vmatprep.subr.bf16.mxu0 %v6940_v37  ;;  %5416 = vmatprep.subr.bf16.mxu1 %v6943_v44 }
 0x31d   :  { %5253 = vmatpush1.bf16.msra.mxu0 %v6938_v19  ;;  %5417 = vmatpush1.bf16.msra.mxu1 %v6941_v27 }
 0x31e   :  { %5254 = vmatprep.subr.bf16.mxu0 %v6946_v20  ;;  %5418 = vmatprep.subr.bf16.mxu1 %v6949_v32 }
 0x321   :  { %5255 = vmatpush1.bf16.msra.mxu0 %v6944_v10  ;;  %5419 = vmatpush1.bf16.msra.mxu1 %v6947_v35 }
 0x322   :  { %5256 = vmatprep.subr.bf16.mxu0 %v6952_v41  ;;  %5420 = vmatprep.subr.bf16.mxu1 %v6955_v61 }
 0x325   :  { %5257 = vmatpush1.bf16.msra.mxu0 %v6950_v45  ;;  %5421 = vmatpush1.bf16.msra.mxu1 %v6953_v47  ;;  %v7010_v45 = vld [vmem:[%s10865_s3 + $0x200] ss:$16 sps:$4 sm:$0xff]   ;;  %v7013_v47 = vld [vmem:[%s10865_s3 + $0x208] ss:$16 sps:$4 sm:$0xff]  }
 0x326   :  { %5258 = vmatprep.subr.bf16.mxu0 %v6958_v24  ;;  %5422 = vmatprep.subr.bf16.mxu1 %v6961_v57  ;;  %v7018_v57 = vld [vmem:[%s10865_s3 + $0x224] ss:$16 sps:$4 sm:$0xff]  }
 0x329   :  { %5259 = vmatpush1.bf16.msra.mxu0 %v6956_v21  ;;  %5423 = vmatpush1.bf16.msra.mxu1 %v6959_v31  ;;  %v7021_v21 = vld [vmem:[%s10865_s3 + $0x22c] ss:$16 sps:$4 sm:$0xff]  }
 0x32a   :  { %5260 = vmatprep.subr.bf16.mxu0 %v6964_v1  ;;  %5424 = vmatprep.subr.bf16.mxu1 %v6967_v58  ;;  %v7016_v1 = vld [vmem:[%s10865_s3 + $0x220] ss:$16 sps:$4 sm:$0xff]   ;;  %v7019_v58 = vld [vmem:[%s10865_s3 + $0x228] ss:$16 sps:$4 sm:$0xff]  }
 0x32d   :  { %5261 = vmatpush1.bf16.msra.mxu0 %v6962_v54  ;;  %5425 = vmatpush1.bf16.msra.mxu1 %v6965_v3  ;;  %v7024_v54 = vld [vmem:[%s10865_s3 + $0x244] ss:$16 sps:$4 sm:$0xff]   ;;  %v7027_v3 = vld [vmem:[%s10865_s3 + $0x24c] ss:$16 sps:$4 sm:$0xff]  }
 0x32e   :  { %5262 = vmatprep.subr.bf16.mxu0 %v6970_v7  ;;  %5426 = vmatprep.subr.bf16.mxu1 %v6973_v55  ;;  %v7022_v7 = vld [vmem:[%s10865_s3 + $0x240] ss:$16 sps:$4 sm:$0xff]   ;;  %v7025_v55 = vld [vmem:[%s10865_s3 + $0x248] ss:$16 sps:$4 sm:$0xff]  }
 0x331   :  { %5263 = vmatpush1.bf16.msra.mxu0 %v6968_v48  ;;  %5427 = vmatpush1.bf16.msra.mxu1 %v6971_v25  ;;  %v7030_v48 = vld [vmem:[%s10865_s3 + $0x264] ss:$16 sps:$4 sm:$0xff]   ;;  %v7033_v25 = vld [vmem:[%s10865_s3 + $0x26c] ss:$16 sps:$4 sm:$0xff]  }
 0x332   :  { %5264 = vmatprep.subr.bf16.mxu0 %v6976_v52  ;;  %5428 = vmatprep.subr.bf16.mxu1 %v6979_v28  ;;  %v7028_v52 = vld [vmem:[%s10865_s3 + $0x260] ss:$16 sps:$4 sm:$0xff]   ;;  %v7031_v28 = vld [vmem:[%s10865_s3 + $0x268] ss:$16 sps:$4 sm:$0xff]  }
 0x335   :  { %5265 = vmatpush1.bf16.msra.mxu0 %v6974_v59  ;;  %5429 = vmatpush1.bf16.msra.mxu1 %v6977_v50  ;;  %v7036_v59 = vld [vmem:[%s10865_s3 + $0x284] ss:$16 sps:$4 sm:$0xff]   ;;  %v7039_v50 = vld [vmem:[%s10865_s3 + $0x28c] ss:$16 sps:$4 sm:$0xff]  }
 0x336   :  { %5266 = vmatprep.subr.bf16.mxu0 %v6982_v62  ;;  %5430 = vmatprep.subr.bf16.mxu1 %v6985_v30  ;;  %v7034_v62 = vld [vmem:[%s10865_s3 + $0x280] ss:$16 sps:$4 sm:$0xff]   ;;  %v7037_v30 = vld [vmem:[%s10865_s3 + $0x288] ss:$16 sps:$4 sm:$0xff]  }
 0x339   :  { %5267 = vmatpush1.bf16.msra.mxu0 %v6980_v8  ;;  %5431 = vmatpush1.bf16.msra.mxu1 %v6983_v36  ;;  %v7042_v8 = vld [vmem:[%s10865_s3 + $0x2a4] ss:$16 sps:$4 sm:$0xff]   ;;  %v7045_v36 = vld [vmem:[%s10865_s3 + $0x2ac] ss:$16 sps:$4 sm:$0xff]  }
 0x33a   :  { %5268 = vmatprep.subr.bf16.mxu0 %v6988_v17  ;;  %5432 = vmatprep.subr.bf16.mxu1 %v6991_v14  ;;  %v7040_v17 = vld [vmem:[%s10865_s3 + $0x2a0] ss:$16 sps:$4 sm:$0xff]   ;;  %v7043_v14 = vld [vmem:[%s10865_s3 + $0x2a8] ss:$16 sps:$4 sm:$0xff]  }
 0x33d   :  { %5269 = vmatpush1.bf16.msra.mxu0 %v6986_v22  ;;  %5433 = vmatpush1.bf16.msra.mxu1 %v6989_v33  ;;  %v7048_v22 = vld [vmem:[%s10865_s3 + $0x2c4] ss:$16 sps:$4 sm:$0xff]   ;;  %v7051_v33 = vld [vmem:[%s10865_s3 + $0x2cc] ss:$16 sps:$4 sm:$0xff]  }
 0x33e   :  { %5270 = vmatprep.subr.bf16.mxu0 %v6994_v51  ;;  %5434 = vmatprep.subr.bf16.mxu1 %v6997_v40  ;;  %v7046_v51 = vld [vmem:[%s10865_s3 + $0x2c0] ss:$16 sps:$4 sm:$0xff]   ;;  %v7049_v40 = vld [vmem:[%s10865_s3 + $0x2c8] ss:$16 sps:$4 sm:$0xff]  }
 0x341   :  { %5271 = vmatpush1.bf16.msra.mxu0 %v6992_v42  ;;  %5435 = vmatpush1.bf16.msra.mxu1 %v6995_v6  ;;  %v7054_v42 = vld [vmem:[%s10865_s3 + $0x2e4] ss:$16 sps:$4 sm:$0xff]   ;;  %v7057_v6 = vld [vmem:[%s10865_s3 + $0x2ec] ss:$16 sps:$4 sm:$0xff]  }
 0x342   :  { %5272 = vmatprep.subr.bf16.mxu0 %v7000_v11  ;;  %5436 = vmatprep.subr.bf16.mxu1 %v7003_v53  ;;  %v7052_v11 = vld [vmem:[%s10865_s3 + $0x2e0] ss:$16 sps:$4 sm:$0xff]   ;;  %v7055_v53 = vld [vmem:[%s10865_s3 + $0x2e8] ss:$16 sps:$4 sm:$0xff]  }
 0x345   :  { %5273 = vmatpush1.bf16.msra.mxu0 %v6998_v29  ;;  %5437 = vmatpush1.bf16.msra.mxu1 %v7001_v43  ;;  %v7060_v29 = vld [vmem:[%s10865_s3 + $0x304] ss:$16 sps:$4 sm:$0xff]   ;;  %v7063_v43 = vld [vmem:[%s10865_s3 + $0x30c] ss:$16 sps:$4 sm:$0xff]  }
 0x346   :  { %5274 = vmatprep.subr.bf16.mxu0 %v7006_v26  ;;  %5438 = vmatprep.subr.bf16.mxu1 %v7009_v38  ;;  %v7058_v26 = vld [vmem:[%s10865_s3 + $0x300] ss:$16 sps:$4 sm:$0xff]   ;;  %v7061_v38 = vld [vmem:[%s10865_s3 + $0x308] ss:$16 sps:$4 sm:$0xff]  }
 0x349   :  { %5275 = vmatpush1.bf16.msra.mxu0 %v7004_v56  ;;  %5439 = vmatpush1.bf16.msra.mxu1 %v7007_v46  ;;  %v7066_v56 = vld [vmem:[%s10865_s3 + $0x324] ss:$16 sps:$4 sm:$0xff]   ;;  %v7069_v46 = vld [vmem:[%s10865_s3 + $0x32c] ss:$16 sps:$4 sm:$0xff]  }
 0x34a   :  { %5285 = vmatprep.subr.bf16.mxu0 %v7012_v5  ;;  %5449 = vmatprep.subr.bf16.mxu1 %v7015_v49  ;;  %v7064_v5 = vld [vmem:[%s10865_s3 + $0x320] ss:$16 sps:$4 sm:$0xff]   ;;  %v7067_v49 = vld [vmem:[%s10865_s3 + $0x328] ss:$16 sps:$4 sm:$0xff]  }
 0x39f   :  { %v3540_v23 = vpop.f32.mrb[0].mxu0  ;;  %v10026_v12 = vpop.f32.mrb[0].mxu1 }
 0x3a0   :  { %v3541_v2 = vadd.f32 %v3540_v23, %v2829_v63  ;;  %v3542_v13 = vpop.f32.mrb[1].mxu0  ;;  %v3583_v9 = vpop.f32.mrb[1].mxu1  ;;  %v7072_v63 = vld [vmem:[%s10865_s3 + $0x344] ss:$16 sps:$4 sm:$0xff]   ;;  %v7073_v23 = vld [vmem:[%s10865_s3 + $0x348] ss:$16 sps:$4 sm:$0xff]  }
 0x3a1   :  { %v3543_v37 = vadd.f32 %v3542_v13, %v2833_v34  ;;  %v3584_v44 = vadd.f32 %v3583_v9, %v2841_v0  ;;  %v3544_v19 = vpop.f32.mrb[2].mxu0  ;;  %v3585_v27 = vpop.f32.mrb[2].mxu1  ;;  %v7075_v34 = vld [vmem:[%s10865_s3 + $0x34c] ss:$16 sps:$4 sm:$0xff]   ;;  %v7070_v0 = vld [vmem:[%s10865_s3 + $0x340] ss:$16 sps:$4 sm:$0xff]  }
 0x3a2   :  { %v3670_v20 = vmax.f32 %v3541_v2, 0.0  ;;  %v3545_v32 = vpop.f32.mrb[3].mxu0  ;;  %v3586_v10 = vpop.f32.mrb[3].mxu1  ;;  %v7078_v2 = vld [vmem:[%s10865_s3 + $0x364] ss:$16 sps:$4 sm:$0xff]  }
 0x3a3   :  { %v3671_v35 = vmax.f32 %v3543_v37, 0.0  ;;  %v3673_v41 = vmax.f32 %v3584_v44, 0.0  ;;  %v7081_v13 = vld [vmem:[%s10865_s3 + $0x36c] ss:$16 sps:$4 sm:$0xff]   ;;  %v7076_v9 = vld [vmem:[%s10865_s3 + $0x360] ss:$16 sps:$4 sm:$0xff]  }
 0x3a4   :  { %v3678_v24 = vpack.c.bf16 %v3670_v20, %v3670_v20  ;;  %v7079_v37 = vld [vmem:[%s10865_s3 + $0x368] ss:$16 sps:$4 sm:$0xff]   ;;  %v7084_v44 = vld [vmem:[%s10865_s3 + $0x384] ss:$16 sps:$4 sm:$0xff]   ;;  %v7087_v19 = vld [vmem:[%s10865_s3 + $0x38c] ss:$16 sps:$4 sm:$0xff]  }
 0x3a5   :  { %v3679_v61 = vpack.c.bf16 %v3671_v35, %v3671_v35  ;;  %v3681_v31 = vpack.c.bf16 %v3673_v41, %v3673_v41  ;;  %v7082_v27 = vld [vmem:[%s10865_s3 + $0x380] ss:$16 sps:$4 sm:$0xff]   ;;  %v7085_v20 = vld [vmem:[%s10865_s3 + $0x388] ss:$16 sps:$4 sm:$0xff]   ;;  %v2836_v32 = vsub.s32 2, %v7961_v18 }
 0x3a6   :  { %v7090_v10 = vld [vmem:[%s10865_s3 + $0x3a4] ss:$16 sps:$4 sm:$0xff]   ;;  %v7093_v35 = vld [vmem:[%s10865_s3 + $0x3ac] ss:$16 sps:$4 sm:$0xff]   ;;  %v7088_v41 = vld [vmem:[%s10865_s3 + $0x3a0] ss:$16 sps:$4 sm:$0xff]  }
 0x3a7   :  { %5276 = vmatprep.mubr.bf16.mxu0 %v3679_v61  ;;  %5440 = vmatprep.mubr.bf16.mxu1 %v3679_v61  ;;  %v7091_v61 = vld [vmem:[%s10865_s3 + $0x3a8] ss:$16 sps:$4 sm:$0xff]  }
 0x3a8   :  { %5277 = vmatmul.mubr.bf16.vlgmr.msra.gmra.mrb[8].mxu0 %v3678_v24  ;;  %5441 = vmatmul.mubr.bf16.vlgmr.msra.gmra.mrb[8].mxu1 %v3678_v24  ;;  %v7096_v24 = vld [vmem:[%s10865_s3 + $0x3c4] ss:$16 sps:$4 sm:$0xff]  }
 0x3a9   :  { %5286 = vmatpush1.bf16.msra.mxu0 %v7010_v45  ;;  %5450 = vmatpush1.bf16.msra.mxu1 %v7013_v47  ;;  %v2848_v45 = vsub.s32 5, %v7961_v18  ;;  %v2837_v47 = vrot.slane %v10013_v39, %v2836_v32 }
 0x3aa   :  { %5317 = vmatprep.mubr.bf16.mxu0 %v3681_v31  ;;  %5481 = vmatprep.mubr.bf16.mxu1 %v3681_v31  ;;  %v7094_v31 = vld [vmem:[%s10865_s3 + $0x3c0] ss:$16 sps:$4 sm:$0xff]  }
 0x3ab   :  { %5287 = vmatprep.subr.bf16.mxu0 %v7018_v57  ;;  %5451 = vmatprep.subr.bf16.mxu1 %v7021_v21  ;;  %v7099_v57 = vld [vmem:[%s10865_s3 + $0x3cc] ss:$16 sps:$4 sm:$0xff]   ;;  %v2849_v21 = vrot.slane %v10013_v39, %v2848_v45  ;;  %v7156_v45 = vld [vmem:[%s10865_s3 + $0x504] ss:$16 sps:$4 sm:$0xff]  }
 0x3ad   :  { %5288 = vmatpush1.bf16.msra.mxu0 %v7016_v1  ;;  %5452 = vmatpush1.bf16.msra.mxu1 %v7019_v58  ;;  %v7097_v1 = vld [vmem:[%s10865_s3 + $0x3c8] ss:$16 sps:$4 sm:$0xff]   ;;  %v3582_v58 = vadd.f32 %v10026_v12, %v2837_v47  ;;  %v7100_v12 = vld [vmem:[%s10865_s3 + $0x3e0] ss:$16 sps:$4 sm:$0xff]   ;;  %v7159_v47 = vld [vmem:[%s10865_s3 + $0x50c] ss:$16 sps:$4 sm:$0xff]  }
 0x3ae   :  { %5289 = vmatprep.subr.bf16.mxu0 %v7024_v54  ;;  %5453 = vmatprep.subr.bf16.mxu1 %v7027_v3  ;;  %v7102_v54 = vld [vmem:[%s10865_s3 + $0x3e4] ss:$16 sps:$4 sm:$0xff]   ;;  %v7105_v3 = vld [vmem:[%s10865_s3 + $0x3ec] ss:$16 sps:$4 sm:$0xff]  }
 0x3b1   :  { %5290 = vmatpush1.bf16.msra.mxu0 %v7022_v7  ;;  %5454 = vmatpush1.bf16.msra.mxu1 %v7025_v55 }
 0x3b2   :  { %5291 = vmatprep.subr.bf16.mxu0 %v7030_v48  ;;  %5455 = vmatprep.subr.bf16.mxu1 %v7033_v25 }
 0x3b5   :  { %5292 = vmatpush1.bf16.msra.mxu0 %v7028_v52  ;;  %5456 = vmatpush1.bf16.msra.mxu1 %v7031_v28 }
 0x3b6   :  { %5293 = vmatprep.subr.bf16.mxu0 %v7036_v59  ;;  %5457 = vmatprep.subr.bf16.mxu1 %v7039_v50  ;;  %v7103_v50 = vld [vmem:[%s10865_s3 + $0x3e8] ss:$16 sps:$4 sm:$0xff]  }
 0x3b9   :  { %5294 = vmatpush1.bf16.msra.mxu0 %v7034_v62  ;;  %5458 = vmatpush1.bf16.msra.mxu1 %v7037_v30  ;;  %v7108_v62 = vld [vmem:[%s10865_s3 + $0x404] ss:$16 sps:$4 sm:$0xff]   ;;  %v3672_v30 = vmax.f32 %v3582_v58, 0.0  ;;  %v7163_v58 = vld [vmem:[%s10865_s3 + $0x528] ss:$16 sps:$4 sm:$0xff]  }
 0x3ba   :  { %5295 = vmatprep.subr.bf16.mxu0 %v7042_v8  ;;  %5459 = vmatprep.subr.bf16.mxu1 %v7045_v36 }
 0x3bd   :  { %5296 = vmatpush1.bf16.msra.mxu0 %v7040_v17  ;;  %5460 = vmatpush1.bf16.msra.mxu1 %v7043_v14  ;;  %v7111_v17 = vld [vmem:[%s10865_s3 + $0x40c] ss:$16 sps:$4 sm:$0xff]  }
 0x3be   :  { %5297 = vmatprep.subr.bf16.mxu0 %v7048_v22  ;;  %5461 = vmatprep.subr.bf16.mxu1 %v7051_v33  ;;  %v7106_v22 = vld [vmem:[%s10865_s3 + $0x400] ss:$16 sps:$4 sm:$0xff]   ;;  %v3680_v33 = vpack.c.bf16 %v3672_v30, %v3672_v30  ;;  %v7183_v30 = vld [vmem:[%s10865_s3 + $0x58c] ss:$16 sps:$4 sm:$0xff]  }
 0x3c1   :  { %5298 = vmatpush1.bf16.msra.mxu0 %v7046_v51  ;;  %5462 = vmatpush1.bf16.msra.mxu1 %v7049_v40  ;;  %v7109_v51 = vld [vmem:[%s10865_s3 + $0x408] ss:$16 sps:$4 sm:$0xff]  }
 0x3c2   :  { %5299 = vmatprep.subr.bf16.mxu0 %v7054_v42  ;;  %5463 = vmatprep.subr.bf16.mxu1 %v7057_v6  ;;  %v7114_v42 = vld [vmem:[%s10865_s3 + $0x424] ss:$16 sps:$4 sm:$0xff]   ;;  %v7117_v6 = vld [vmem:[%s10865_s3 + $0x42c] ss:$16 sps:$4 sm:$0xff]  }
 0x3c5   :  { %5300 = vmatpush1.bf16.msra.mxu0 %v7052_v11  ;;  %5464 = vmatpush1.bf16.msra.mxu1 %v7055_v53  ;;  %v7112_v11 = vld [vmem:[%s10865_s3 + $0x420] ss:$16 sps:$4 sm:$0xff]   ;;  %v7115_v53 = vld [vmem:[%s10865_s3 + $0x428] ss:$16 sps:$4 sm:$0xff]  }
 0x3c6   :  { %5301 = vmatprep.subr.bf16.mxu0 %v7060_v29  ;;  %5465 = vmatprep.subr.bf16.mxu1 %v7063_v43  ;;  %v7120_v29 = vld [vmem:[%s10865_s3 + $0x444] ss:$16 sps:$4 sm:$0xff]   ;;  %v7123_v43 = vld [vmem:[%s10865_s3 + $0x44c] ss:$16 sps:$4 sm:$0xff]  }
 0x3c9   :  { %5302 = vmatpush1.bf16.msra.mxu0 %v7058_v26  ;;  %5466 = vmatpush1.bf16.msra.mxu1 %v7061_v38  ;;  %v7118_v26 = vld [vmem:[%s10865_s3 + $0x440] ss:$16 sps:$4 sm:$0xff]   ;;  %v7121_v38 = vld [vmem:[%s10865_s3 + $0x448] ss:$16 sps:$4 sm:$0xff]  }
 0x3ca   :  { %5303 = vmatprep.subr.bf16.mxu0 %v7066_v56  ;;  %5467 = vmatprep.subr.bf16.mxu1 %v7069_v46  ;;  %v7126_v56 = vld [vmem:[%s10865_s3 + $0x464] ss:$16 sps:$4 sm:$0xff]   ;;  %v7129_v46 = vld [vmem:[%s10865_s3 + $0x46c] ss:$16 sps:$4 sm:$0xff]  }
 0x3cd   :  { %5304 = vmatpush1.bf16.msra.mxu0 %v7064_v5  ;;  %5468 = vmatpush1.bf16.msra.mxu1 %v7067_v49  ;;  %v7124_v5 = vld [vmem:[%s10865_s3 + $0x460] ss:$16 sps:$4 sm:$0xff]   ;;  %v7127_v49 = vld [vmem:[%s10865_s3 + $0x468] ss:$16 sps:$4 sm:$0xff]  }
 0x3ce   :  { %5305 = vmatprep.subr.bf16.mxu0 %v7072_v63  ;;  %5469 = vmatprep.subr.bf16.mxu1 %v7075_v34  ;;  %v7132_v63 = vld [vmem:[%s10865_s3 + $0x484] ss:$16 sps:$4 sm:$0xff]   ;;  %v7135_v34 = vld [vmem:[%s10865_s3 + $0x48c] ss:$16 sps:$4 sm:$0xff]  }
 0x3d1   :  { %5306 = vmatpush1.bf16.msra.mxu0 %v7070_v0  ;;  %5470 = vmatpush1.bf16.msra.mxu1 %v7073_v23  ;;  %v7130_v0 = vld [vmem:[%s10865_s3 + $0x480] ss:$16 sps:$4 sm:$0xff]   ;;  %v7133_v23 = vld [vmem:[%s10865_s3 + $0x488] ss:$16 sps:$4 sm:$0xff]  }
 0x3d2   :  { %5307 = vmatprep.subr.bf16.mxu0 %v7078_v2  ;;  %5471 = vmatprep.subr.bf16.mxu1 %v7081_v13  ;;  %v7138_v2 = vld [vmem:[%s10865_s3 + $0x4a4] ss:$16 sps:$4 sm:$0xff]   ;;  %v7141_v13 = vld [vmem:[%s10865_s3 + $0x4ac] ss:$16 sps:$4 sm:$0xff]  }
 0x3d5   :  { %5308 = vmatpush1.bf16.msra.mxu0 %v7076_v9  ;;  %5472 = vmatpush1.bf16.msra.mxu1 %v7079_v37  ;;  %v7136_v9 = vld [vmem:[%s10865_s3 + $0x4a0] ss:$16 sps:$4 sm:$0xff]   ;;  %v7139_v37 = vld [vmem:[%s10865_s3 + $0x4a8] ss:$16 sps:$4 sm:$0xff]  }
 0x3d6   :  { %5309 = vmatprep.subr.bf16.mxu0 %v7084_v44  ;;  %5473 = vmatprep.subr.bf16.mxu1 %v7087_v19  ;;  %v7144_v44 = vld [vmem:[%s10865_s3 + $0x4c4] ss:$16 sps:$4 sm:$0xff]   ;;  %v7147_v19 = vld [vmem:[%s10865_s3 + $0x4cc] ss:$16 sps:$4 sm:$0xff]  }
 0x3d9   :  { %5310 = vmatpush1.bf16.msra.mxu0 %v7082_v27  ;;  %5474 = vmatpush1.bf16.msra.mxu1 %v7085_v20  ;;  %v7142_v27 = vld [vmem:[%s10865_s3 + $0x4c0] ss:$16 sps:$4 sm:$0xff]   ;;  %v7145_v20 = vld [vmem:[%s10865_s3 + $0x4c8] ss:$16 sps:$4 sm:$0xff]  }
 0x3da   :  { %5311 = vmatprep.subr.bf16.mxu0 %v7090_v10  ;;  %5475 = vmatprep.subr.bf16.mxu1 %v7093_v35  ;;  %v7150_v10 = vld [vmem:[%s10865_s3 + $0x4e4] ss:$16 sps:$4 sm:$0xff]   ;;  %v7153_v35 = vld [vmem:[%s10865_s3 + $0x4ec] ss:$16 sps:$4 sm:$0xff]  }
 0x3dd   :  { %5312 = vmatpush1.bf16.msra.mxu0 %v7088_v41  ;;  %5476 = vmatpush1.bf16.msra.mxu1 %v7091_v61  ;;  %v7148_v41 = vld [vmem:[%s10865_s3 + $0x4e0] ss:$16 sps:$4 sm:$0xff]   ;;  %v7151_v61 = vld [vmem:[%s10865_s3 + $0x4e8] ss:$16 sps:$4 sm:$0xff]  }
 0x3de   :  { %5313 = vmatprep.subr.bf16.mxu0 %v7096_v24  ;;  %5477 = vmatprep.subr.bf16.mxu1 %v7099_v57  ;;  %v7154_v24 = vld [vmem:[%s10865_s3 + $0x500] ss:$16 sps:$4 sm:$0xff]   ;;  %v7157_v57 = vld [vmem:[%s10865_s3 + $0x508] ss:$16 sps:$4 sm:$0xff]  }
 0x3df   :  { %v10215_v7 = vpop.f32.mrb[4].mxu0  ;;  %v10217_v55 = vpop.f32.mrb[4].mxu1 }
 0x3e0   :  { %v3624_v48 = vpop.f32.mrb[5].mxu0  ;;  %v10219_v25 = vpop.f32.mrb[5].mxu1 }
 0x3e1   :  { %v3625_v52 = vadd.f32 %v3624_v48, %v2849_v21  ;;  %v3626_v28 = vpop.f32.mrb[6].mxu0  ;;  %v3667_v59 = vpop.f32.mrb[6].mxu1  ;;  %5314 = vmatpush1.bf16.msra.mxu0 %v7094_v31  ;;  %5478 = vmatpush1.bf16.msra.mxu1 %v7097_v1  ;;  %v7162_v21 = vld [vmem:[%s10865_s3 + $0x524] ss:$16 sps:$4 sm:$0xff]   ;;  %v7165_v31 = vld [vmem:[%s10865_s3 + $0x52c] ss:$16 sps:$4 sm:$0xff]  }
 0x3e2   :  { %v3627_v8 = vpop.f32.mrb[7].mxu0  ;;  %v3668_v36 = vpop.f32.mrb[7].mxu1  ;;  %5315 = vmatprep.subr.bf16.mxu0 %v7102_v54  ;;  %5479 = vmatprep.subr.bf16.mxu1 %v7105_v3  ;;  %v7160_v1 = vld [vmem:[%s10865_s3 + $0x520] ss:$16 sps:$4 sm:$0xff]   ;;  %v7168_v54 = vld [vmem:[%s10865_s3 + $0x544] ss:$16 sps:$4 sm:$0xff]  }
 0x3e3   :  { %v3675_v14 = vmax.f32 %v3625_v52, 0.0  ;;  %v7171_v3 = vld [vmem:[%s10865_s3 + $0x54c] ss:$16 sps:$4 sm:$0xff]   ;;  %v7166_v48 = vld [vmem:[%s10865_s3 + $0x540] ss:$16 sps:$4 sm:$0xff]   ;;  %v2844_v36 = vsub.s32 4, %v7961_v18 }
 0x3e4   :  { %v7174_v52 = vld [vmem:[%s10865_s3 + $0x564] ss:$16 sps:$4 sm:$0xff]   ;;  %v7177_v28 = vld [vmem:[%s10865_s3 + $0x56c] ss:$16 sps:$4 sm:$0xff]   ;;  %v7172_v59 = vld [vmem:[%s10865_s3 + $0x560] ss:$16 sps:$4 sm:$0xff]  }
 0x3e5   :  { %5316 = vmatpush1.bf16.msra.mxu0 %v7100_v12  ;;  %5480 = vmatpush1.bf16.msra.mxu1 %v7103_v50  ;;  %v3683_v40 = vpack.c.bf16 %v3675_v14, %v3675_v14  ;;  %v7169_v12 = vld [vmem:[%s10865_s3 + $0x548] ss:$16 sps:$4 sm:$0xff]   ;;  %v7178_v8 = vld [vmem:[%s10865_s3 + $0x580] ss:$16 sps:$4 sm:$0xff]   ;;  %v7186_v14 = vld [vmem:[%s10865_s3 + $0x5a4] ss:$16 sps:$4 sm:$0xff]  }
 0x3e6   :  { %5326 = vmatprep.subr.bf16.mxu0 %v7108_v62  ;;  %5490 = vmatprep.subr.bf16.mxu1 %v7111_v17  ;;  %v7175_v50 = vld [vmem:[%s10865_s3 + $0x568] ss:$16 sps:$4 sm:$0xff]   ;;  %v7180_v62 = vld [vmem:[%s10865_s3 + $0x584] ss:$16 sps:$4 sm:$0xff]  }
 0x3e7   :  { %v7181_v17 = vld [vmem:[%s10865_s3 + $0x588] ss:$16 sps:$4 sm:$0xff]  }
 0x3e8   :  { %5318 = vmatmul.mubr.bf16.vlgmr.msra.gmra.mrb[8].mxu0 %v3680_v33  ;;  %5482 = vmatmul.mubr.bf16.vlgmr.msra.gmra.mrb[8].mxu1 %v3680_v33  ;;  %v2856_v33 = vsub.s32 7, %v7961_v18 }
 0x3e9   :  { %5327 = vmatpush1.bf16.msra.mxu0 %v7106_v22  ;;  %5358 = vmatprep.mubr.bf16.mxu0 %v3683_v40  ;;  %v7189_v22 = vld [vmem:[%s10865_s3 + $0x5ac] ss:$16 sps:$4 sm:$0xff]  }
 0x3ea   :  { %5491 = vmatpush1.bf16.msra.mxu1 %v7109_v51  ;;  %5522 = vmatprep.mubr.bf16.mxu1 %v3683_v40  ;;  %v7184_v51 = vld [vmem:[%s10865_s3 + $0x5a0] ss:$16 sps:$4 sm:$0xff]   ;;  %v2845_v40 = vrot.slane %v10013_v39, %v2844_v36  ;;  %v7255_v36 = vld [vmem:[%s10865_s3 + $0x70c] ss:$16 sps:$4 sm:$0xff]  }
 0x3eb   :  { %5328 = vmatprep.subr.bf16.mxu0 %v7114_v42  ;;  %5492 = vmatprep.subr.bf16.mxu1 %v7117_v6  ;;  %v7187_v42 = vld [vmem:[%s10865_s3 + $0x5a8] ss:$16 sps:$4 sm:$0xff]   ;;  %v7192_v6 = vld [vmem:[%s10865_s3 + $0x5c4] ss:$16 sps:$4 sm:$0xff]  }
 0x3ed   :  { %5329 = vmatpush1.bf16.msra.mxu0 %v7112_v11  ;;  %v7195_v11 = vld [vmem:[%s10865_s3 + $0x5cc] ss:$16 sps:$4 sm:$0xff]  }
 0x3ee   :  { %5493 = vmatpush1.bf16.msra.mxu1 %v7115_v53  ;;  %5330 = vmatprep.subr.bf16.mxu0 %v7120_v29  ;;  %v2857_v53 = vrot.slane %v10013_v39, %v2856_v33  ;;  %v7190_v29 = vld [vmem:[%s10865_s3 + $0x5c0] ss:$16 sps:$4 sm:$0xff]   ;;  %v7261_v33 = vld [vmem:[%s10865_s3 + $0x72c] ss:$16 sps:$4 sm:$0xff]  }
 0x3ef   :  { %5494 = vmatprep.subr.bf16.mxu1 %v7123_v43  ;;  %v3623_v43 = vadd.f32 %v10215_v7, %v2845_v40  ;;  %v7196_v7 = vld [vmem:[%s10865_s3 + $0x5e0] ss:$16 sps:$4 sm:$0xff]   ;;  %v7259_v40 = vld [vmem:[%s10865_s3 + $0x728] ss:$16 sps:$4 sm:$0xff]  }
 0x3f1   :  { %5331 = vmatpush1.bf16.msra.mxu0 %v7118_v26  ;;  %v7193_v26 = vld [vmem:[%s10865_s3 + $0x5c8] ss:$16 sps:$4 sm:$0xff]  }
 0x3f2   :  { %5495 = vmatpush1.bf16.msra.mxu1 %v7121_v38  ;;  %5332 = vmatprep.subr.bf16.mxu0 %v7126_v56  ;;  %v7198_v38 = vld [vmem:[%s10865_s3 + $0x5e4] ss:$16 sps:$4 sm:$0xff]   ;;  %v7201_v56 = vld [vmem:[%s10865_s3 + $0x5ec] ss:$16 sps:$4 sm:$0xff]  }
 0x3f3   :  { %5496 = vmatprep.subr.bf16.mxu1 %v7129_v46  ;;  %v3666_v46 = vadd.f32 %v10219_v25, %v2857_v53  ;;  %v7207_v25 = vld [vmem:[%s10865_s3 + $0x60c] ss:$16 sps:$4 sm:$0xff]   ;;  %v7265_v53 = vld [vmem:[%s10865_s3 + $0x748] ss:$16 sps:$4 sm:$0xff]  }
 0x3f5   :  { %5333 = vmatpush1.bf16.msra.mxu0 %v7124_v5  ;;  %v3674_v5 = vmax.f32 %v3623_v43, 0.0  ;;  %v7273_v43 = vld [vmem:[%s10865_s3 + $0x76c] ss:$16 sps:$4 sm:$0xff]  }
 0x3f6   :  { %5497 = vmatpush1.bf16.msra.mxu1 %v7127_v49  ;;  %5334 = vmatprep.subr.bf16.mxu0 %v7132_v63  ;;  %v7199_v49 = vld [vmem:[%s10865_s3 + $0x5e8] ss:$16 sps:$4 sm:$0xff]   ;;  %v7204_v63 = vld [vmem:[%s10865_s3 + $0x604] ss:$16 sps:$4 sm:$0xff]  }
 0x3f7   :  { %5498 = vmatprep.subr.bf16.mxu1 %v7135_v34  ;;  %v3677_v34 = vmax.f32 %v3666_v46, 0.0  ;;  %v7279_v46 = vld [vmem:[%s10865_s3 + $0x78c] ss:$16 sps:$4 sm:$0xff]  }
 0x3f9   :  { %5335 = vmatpush1.bf16.msra.mxu0 %v7130_v0  ;;  %v7202_v0 = vld [vmem:[%s10865_s3 + $0x600] ss:$16 sps:$4 sm:$0xff]  }
 0x3fa   :  { %5499 = vmatpush1.bf16.msra.mxu1 %v7133_v23  ;;  %5336 = vmatprep.subr.bf16.mxu0 %v7138_v2  ;;  %v3682_v23 = vpack.c.bf16 %v3674_v5, %v3674_v5  ;;  %v7205_v2 = vld [vmem:[%s10865_s3 + $0x608] ss:$16 sps:$4 sm:$0xff]   ;;  %v2852_v5 = vsub.s32 6, %v7961_v18 }
 0x3fb   :  { %5500 = vmatprep.subr.bf16.mxu1 %v7141_v13  ;;  %v7210_v13 = vld [vmem:[%s10865_s3 + $0x624] ss:$16 sps:$4 sm:$0xff]   ;;  %v7391_v18 = vld [vmem:[%s10867_s5 + $0x1f0] ss:$8 sps:$4 sm:$0xff]  }
 0x3fd   :  { %5337 = vmatpush1.bf16.msra.mxu0 %v7136_v9  ;;  %v3685_v9 = vpack.c.bf16 %v3677_v34, %v3677_v34  ;;  %v7280_v34 = vld [vmem:[%s10865_s3 + $0x7a0] ss:$16 sps:$4 sm:$0xff]  }
 0x3fe   :  { %5501 = vmatpush1.bf16.msra.mxu1 %v7139_v37  ;;  %5338 = vmatprep.subr.bf16.mxu0 %v7144_v44  ;;  %v7213_v37 = vld [vmem:[%s10865_s3 + $0x62c] ss:$16 sps:$4 sm:$0xff]   ;;  %v7208_v44 = vld [vmem:[%s10865_s3 + $0x620] ss:$16 sps:$4 sm:$0xff]  }
 0x3ff   :  { %5502 = vmatprep.subr.bf16.mxu1 %v7147_v19  ;;  %v7211_v19 = vld [vmem:[%s10865_s3 + $0x628] ss:$16 sps:$4 sm:$0xff]  }
 0x401   :  { %5339 = vmatpush1.bf16.msra.mxu0 %v7142_v27  ;;  %v7216_v27 = vld [vmem:[%s10865_s3 + $0x644] ss:$16 sps:$4 sm:$0xff]  }
 0x402   :  { %5503 = vmatpush1.bf16.msra.mxu1 %v7145_v20  ;;  %5340 = vmatprep.subr.bf16.mxu0 %v7150_v10  ;;  %v7219_v20 = vld [vmem:[%s10865_s3 + $0x64c] ss:$16 sps:$4 sm:$0xff]   ;;  %v7214_v10 = vld [vmem:[%s10865_s3 + $0x640] ss:$16 sps:$4 sm:$0xff]  }
 0x403   :  { %5504 = vmatprep.subr.bf16.mxu1 %v7153_v35  ;;  %v7217_v35 = vld [vmem:[%s10865_s3 + $0x648] ss:$16 sps:$4 sm:$0xff]  }
 0x405   :  { %5341 = vmatpush1.bf16.msra.mxu0 %v7148_v41  ;;  %v7222_v41 = vld [vmem:[%s10865_s3 + $0x664] ss:$16 sps:$4 sm:$0xff]  }
 0x406   :  { %5505 = vmatpush1.bf16.msra.mxu1 %v7151_v61  ;;  %5342 = vmatprep.subr.bf16.mxu0 %v7156_v45  ;;  %v7225_v61 = vld [vmem:[%s10865_s3 + $0x66c] ss:$16 sps:$4 sm:$0xff]   ;;  %v7220_v45 = vld [vmem:[%s10865_s3 + $0x660] ss:$16 sps:$4 sm:$0xff]  }
 0x407   :  { %5506 = vmatprep.subr.bf16.mxu1 %v7159_v47  ;;  %v7223_v47 = vld [vmem:[%s10865_s3 + $0x668] ss:$16 sps:$4 sm:$0xff]  }
 0x409   :  { %5343 = vmatpush1.bf16.msra.mxu0 %v7154_v24  ;;  %v7228_v24 = vld [vmem:[%s10865_s3 + $0x684] ss:$16 sps:$4 sm:$0xff]  }
 0x40a   :  { %5507 = vmatpush1.bf16.msra.mxu1 %v7157_v57  ;;  %5344 = vmatprep.subr.bf16.mxu0 %v7162_v21  ;;  %v7231_v57 = vld [vmem:[%s10865_s3 + $0x68c] ss:$16 sps:$4 sm:$0xff]   ;;  %v7226_v21 = vld [vmem:[%s10865_s3 + $0x680] ss:$16 sps:$4 sm:$0xff]  }
 0x40b   :  { %5508 = vmatprep.subr.bf16.mxu1 %v7165_v31  ;;  %v7229_v31 = vld [vmem:[%s10865_s3 + $0x688] ss:$16 sps:$4 sm:$0xff]  }
 0x40d   :  { %5345 = vmatpush1.bf16.msra.mxu0 %v7160_v1  ;;  %v7234_v1 = vld [vmem:[%s10865_s3 + $0x6a4] ss:$16 sps:$4 sm:$0xff]  }
 0x40e   :  { %5509 = vmatpush1.bf16.msra.mxu1 %v7163_v58  ;;  %5346 = vmatprep.subr.bf16.mxu0 %v7168_v54  ;;  %v7237_v58 = vld [vmem:[%s10865_s3 + $0x6ac] ss:$16 sps:$4 sm:$0xff]   ;;  %v7232_v54 = vld [vmem:[%s10865_s3 + $0x6a0] ss:$16 sps:$4 sm:$0xff]  }
 0x40f   :  { %5510 = vmatprep.subr.bf16.mxu1 %v7171_v3  ;;  %v7235_v3 = vld [vmem:[%s10865_s3 + $0x6a8] ss:$16 sps:$4 sm:$0xff]  }
 0x411   :  { %5347 = vmatpush1.bf16.msra.mxu0 %v7166_v48  ;;  %v7240_v48 = vld [vmem:[%s10865_s3 + $0x6c4] ss:$16 sps:$4 sm:$0xff]  }
 0x412   :  { %5511 = vmatpush1.bf16.msra.mxu1 %v7169_v12  ;;  %5348 = vmatprep.subr.bf16.mxu0 %v7174_v52  ;;  %v7243_v12 = vld [vmem:[%s10865_s3 + $0x6cc] ss:$16 sps:$4 sm:$0xff]   ;;  %v7238_v52 = vld [vmem:[%s10865_s3 + $0x6c0] ss:$16 sps:$4 sm:$0xff]  }
 0x413   :  { %5512 = vmatprep.subr.bf16.mxu1 %v7177_v28  ;;  %v7241_v28 = vld [vmem:[%s10865_s3 + $0x6c8] ss:$16 sps:$4 sm:$0xff]  }
 0x415   :  { %5349 = vmatpush1.bf16.msra.mxu0 %v7172_v59  ;;  %v7246_v59 = vld [vmem:[%s10865_s3 + $0x6e4] ss:$16 sps:$4 sm:$0xff]  }
 0x416   :  { %5513 = vmatpush1.bf16.msra.mxu1 %v7175_v50  ;;  %5350 = vmatprep.subr.bf16.mxu0 %v7180_v62  ;;  %v7249_v50 = vld [vmem:[%s10865_s3 + $0x6ec] ss:$16 sps:$4 sm:$0xff]   ;;  %v7244_v62 = vld [vmem:[%s10865_s3 + $0x6e0] ss:$16 sps:$4 sm:$0xff]  }
 0x417   :  { %5514 = vmatprep.subr.bf16.mxu1 %v7183_v30  ;;  %v7247_v30 = vld [vmem:[%s10865_s3 + $0x6e8] ss:$16 sps:$4 sm:$0xff]  }
 0x419   :  { %5351 = vmatpush1.bf16.msra.mxu0 %v7178_v8  ;;  %v7252_v8 = vld [vmem:[%s10865_s3 + $0x704] ss:$16 sps:$4 sm:$0xff]  }
 0x41a   :  { %5515 = vmatpush1.bf16.msra.mxu1 %v7181_v17  ;;  %5352 = vmatprep.subr.bf16.mxu0 %v7186_v14  ;;  %v7250_v17 = vld [vmem:[%s10865_s3 + $0x700] ss:$16 sps:$4 sm:$0xff]   ;;  %v7253_v14 = vld [vmem:[%s10865_s3 + $0x708] ss:$16 sps:$4 sm:$0xff]  }
 0x41b   :  { %5516 = vmatprep.subr.bf16.mxu1 %v7189_v22  ;;  %v7258_v22 = vld [vmem:[%s10865_s3 + $0x724] ss:$16 sps:$4 sm:$0xff]  }
 0x41d   :  { %5353 = vmatpush1.bf16.msra.mxu0 %v7184_v51  ;;  %v7256_v51 = vld [vmem:[%s10865_s3 + $0x720] ss:$16 sps:$4 sm:$0xff]  }
 0x41e   :  { %5517 = vmatpush1.bf16.msra.mxu1 %v7187_v42  ;;  %5354 = vmatprep.subr.bf16.mxu0 %v7192_v6  ;;  %v7264_v42 = vld [vmem:[%s10865_s3 + $0x744] ss:$16 sps:$4 sm:$0xff]   ;;  %v7267_v6 = vld [vmem:[%s10865_s3 + $0x74c] ss:$16 sps:$4 sm:$0xff]  }
 0x41f   :  { %5518 = vmatprep.subr.bf16.mxu1 %v7195_v11  ;;  %v7262_v11 = vld [vmem:[%s10865_s3 + $0x740] ss:$16 sps:$4 sm:$0xff]  }
 0x421   :  { %5355 = vmatpush1.bf16.msra.mxu0 %v7190_v29  ;;  %v7270_v29 = vld [vmem:[%s10865_s3 + $0x764] ss:$16 sps:$4 sm:$0xff]  }
 0x422   :  { %5519 = vmatpush1.bf16.msra.mxu1 %v7193_v26  ;;  %5356 = vmatprep.subr.bf16.mxu0 %v7198_v38  ;;  %v7268_v26 = vld [vmem:[%s10865_s3 + $0x760] ss:$16 sps:$4 sm:$0xff]   ;;  %v7271_v38 = vld [vmem:[%s10865_s3 + $0x768] ss:$16 sps:$4 sm:$0xff]  }
 0x423   :  { %5520 = vmatprep.subr.bf16.mxu1 %v7201_v56  ;;  %v7276_v56 = vld [vmem:[%s10865_s3 + $0x784] ss:$16 sps:$4 sm:$0xff]  }
 0x425   :  { %5357 = vmatpush1.bf16.msra.mxu0 %v7196_v7  ;;  %v7274_v7 = vld [vmem:[%s10865_s3 + $0x780] ss:$16 sps:$4 sm:$0xff]  }
 0x426   :  { %5521 = vmatpush1.bf16.msra.mxu1 %v7199_v49  ;;  %5367 = vmatprep.subr.bf16.mxu0 %v7204_v63  ;;  %v7277_v49 = vld [vmem:[%s10865_s3 + $0x788] ss:$16 sps:$4 sm:$0xff]   ;;  %v7282_v63 = vld [vmem:[%s10865_s3 + $0x7a4] ss:$16 sps:$4 sm:$0xff]  }
 0x427   :  { %5531 = vmatprep.subr.bf16.mxu1 %v7207_v25  ;;  %v7285_v25 = vld [vmem:[%s10865_s3 + $0x7ac] ss:$16 sps:$4 sm:$0xff]  }
 0x428   :  { %5359 = vmatmul.mubr.bf16.vlgmr.msra.gmra.mrb[8].mxu0 %v3682_v23 }
 0x429   :  { %5523 = vmatmul.mubr.bf16.vlgmr.msra.gmra.mrb[8].mxu1 %v3682_v23  ;;  %5368 = vmatpush1.bf16.msra.mxu0 %v7202_v0  ;;  %v2853_v0 = vrot.slane %v10013_v39, %v2852_v5  ;;  %v7283_v23 = vld [vmem:[%s10865_s3 + $0x7a8] ss:$16 sps:$4 sm:$0xff]   ;;  %v7286_v39 = vld [vmem:[%s10865_s3 + $0x7c0] ss:$16 sps:$4 sm:$0xff]   ;;  %v7403_v5 = vld [vmem:[#allocation8 + $0x30] ss:$8 sps:$4 sm:$0xff]  }
 0x42a   :  { %5399 = vmatprep.mubr.bf16.mxu0 %v3685_v9  ;;  %5532 = vmatpush1.bf16.msra.mxu1 %v7205_v2  ;;  %v7288_v2 = vld [vmem:[%s10865_s3 + $0x7c4] ss:$16 sps:$4 sm:$0xff]  }
 0x42b   :  { %5563 = vmatprep.mubr.bf16.mxu1 %v3685_v9  ;;  %5369 = vmatprep.subr.bf16.mxu0 %v7210_v13  ;;  %v7291_v13 = vld [vmem:[%s10865_s3 + $0x7cc] ss:$16 sps:$4 sm:$0xff]   ;;  %v3664_v9 = vadd.f32 %v10217_v55, %v2853_v0  ;;  %v7292_v55 = vld [vmem:[%s10865_s3 + $0x7e0] ss:$16 sps:$4 sm:$0xff]  }
 0x42c   :  { %5533 = vmatprep.subr.bf16.mxu1 %v7213_v37  ;;  %v7289_v37 = vld [vmem:[%s10865_s3 + $0x7c8] ss:$16 sps:$4 sm:$0xff]  }
 0x42d   :  { %5370 = vmatpush1.bf16.msra.mxu0 %v7208_v44  ;;  %v7294_v44 = vld [vmem:[%s10865_s3 + $0x7e4] ss:$16 sps:$4 sm:$0xff]   ;;  %v7414_v0 = vld [vmem:[#allocation8 + $0x64] ss:$8 sps:$4 sm:$0xff]  }
 0x42e   :  { %5534 = vmatpush1.bf16.msra.mxu1 %v7211_v19  ;;  %5371 = vmatprep.subr.bf16.mxu0 %v7216_v27  ;;  %v7297_v19 = vld [vmem:[%s10865_s3 + $0x7ec] ss:$16 sps:$4 sm:$0xff]   ;;  %v3676_v27 = vmax.f32 %v3664_v9, 0.0 }
 0x42f   :  { %5535 = vmatprep.subr.bf16.mxu1 %v7219_v20  ;;  %v7295_v20 = vld [vmem:[%s10865_s3 + $0x7e8] ss:$16 sps:$4 sm:$0xff]   ;;  %v7418_v9 = vld [vmem:[#allocation8 + $0x80] ss:$8 sps:$4 sm:$0xff]  }
 0x431   :  { %5372 = vmatpush1.bf16.msra.mxu0 %v7214_v10  ;;  %v7300_v10 = vld [vmem:[%s10867_s5 + $0x4] ss:$8 sps:$4 sm:$0xff]  }
 0x432   :  { %5536 = vmatpush1.bf16.msra.mxu1 %v7217_v35  ;;  %5373 = vmatprep.subr.bf16.mxu0 %v7222_v41  ;;  %v7298_v35 = vld [vmem:[%s10867_s5] ss:$8 sps:$4 sm:$0xff]   ;;  %v3684_v41 = vpack.c.bf16 %v3676_v27, %v3676_v27 }
 0x433   :  { %5537 = vmatprep.subr.bf16.mxu1 %v7225_v61  ;;  %v7303_v61 = vld [vmem:[%s10867_s5 + $0x14] ss:$8 sps:$4 sm:$0xff]   ;;  %v7429_v27 = vld [vmem:[#allocation8 + $0xb4] ss:$8 sps:$4 sm:$0xff]  }
 0x435   :  { %5374 = vmatpush1.bf16.msra.mxu0 %v7220_v45  ;;  %v7301_v45 = vld [vmem:[%s10867_s5 + $0x10] ss:$8 sps:$4 sm:$0xff]  }
 0x436   :  { %5538 = vmatpush1.bf16.msra.mxu1 %v7223_v47  ;;  %5375 = vmatprep.subr.bf16.mxu0 %v7228_v24  ;;  %v7306_v47 = vld [vmem:[%s10867_s5 + $0x24] ss:$8 sps:$4 sm:$0xff]   ;;  %v7304_v24 = vld [vmem:[%s10867_s5 + $0x20] ss:$8 sps:$4 sm:$0xff]  }
 0x437   :  { %5539 = vmatprep.subr.bf16.mxu1 %v7231_v57  ;;  %v7309_v57 = vld [vmem:[%s10867_s5 + $0x34] ss:$8 sps:$4 sm:$0xff]  }
 0x439   :  { %5376 = vmatpush1.bf16.msra.mxu0 %v7226_v21  ;;  %v7307_v21 = vld [vmem:[%s10867_s5 + $0x30] ss:$8 sps:$4 sm:$0xff]  }
 0x43a   :  { %5540 = vmatpush1.bf16.msra.mxu1 %v7229_v31  ;;  %5377 = vmatprep.subr.bf16.mxu0 %v7234_v1  ;;  %v7312_v31 = vld [vmem:[%s10867_s5 + $0x44] ss:$8 sps:$4 sm:$0xff]   ;;  %v7310_v1 = vld [vmem:[%s10867_s5 + $0x40] ss:$8 sps:$4 sm:$0xff]  }
 0x43b   :  { %5541 = vmatprep.subr.bf16.mxu1 %v7237_v58  ;;  %v7315_v58 = vld [vmem:[%s10867_s5 + $0x54] ss:$8 sps:$4 sm:$0xff]  }
 0x43d   :  { %5378 = vmatpush1.bf16.msra.mxu0 %v7232_v54  ;;  %v7313_v54 = vld [vmem:[%s10867_s5 + $0x50] ss:$8 sps:$4 sm:$0xff]  }
 0x43e   :  { %5542 = vmatpush1.bf16.msra.mxu1 %v7235_v3  ;;  %5379 = vmatprep.subr.bf16.mxu0 %v7240_v48  ;;  %v7318_v3 = vld [vmem:[%s10867_s5 + $0x64] ss:$8 sps:$4 sm:$0xff]   ;;  %v7316_v48 = vld [vmem:[%s10867_s5 + $0x60] ss:$8 sps:$4 sm:$0xff]  }
 0x43f   :  { %5543 = vmatprep.subr.bf16.mxu1 %v7243_v12  ;;  %v7321_v12 = vld [vmem:[%s10867_s5 + $0x74] ss:$8 sps:$4 sm:$0xff]  }
 0x441   :  { %5380 = vmatpush1.bf16.msra.mxu0 %v7238_v52  ;;  %v7319_v52 = vld [vmem:[%s10867_s5 + $0x70] ss:$8 sps:$4 sm:$0xff]  }
 0x442   :  { %5544 = vmatpush1.bf16.msra.mxu1 %v7241_v28  ;;  %5381 = vmatprep.subr.bf16.mxu0 %v7246_v59  ;;  %v7324_v28 = vld [vmem:[%s10867_s5 + $0x84] ss:$8 sps:$4 sm:$0xff]   ;;  %v7322_v59 = vld [vmem:[%s10867_s5 + $0x80] ss:$8 sps:$4 sm:$0xff]  }
 0x443   :  { %5545 = vmatprep.subr.bf16.mxu1 %v7249_v50  ;;  %v7327_v50 = vld [vmem:[%s10867_s5 + $0x94] ss:$8 sps:$4 sm:$0xff]  }
 0x445   :  { %5382 = vmatpush1.bf16.msra.mxu0 %v7244_v62  ;;  %v7325_v62 = vld [vmem:[%s10867_s5 + $0x90] ss:$8 sps:$4 sm:$0xff]  }
 0x446   :  { %5546 = vmatpush1.bf16.msra.mxu1 %v7247_v30  ;;  %5383 = vmatprep.subr.bf16.mxu0 %v7252_v8  ;;  %v7330_v30 = vld [vmem:[%s10867_s5 + $0xa4] ss:$8 sps:$4 sm:$0xff]   ;;  %v7328_v8 = vld [vmem:[%s10867_s5 + $0xa0] ss:$8 sps:$4 sm:$0xff]  }
 0x447   :  { %5547 = vmatprep.subr.bf16.mxu1 %v7255_v36  ;;  %v7333_v36 = vld [vmem:[%s10867_s5 + $0xb4] ss:$8 sps:$4 sm:$0xff]  }
 0x449   :  { %5384 = vmatpush1.bf16.msra.mxu0 %v7250_v17  ;;  %v7331_v17 = vld [vmem:[%s10867_s5 + $0xb0] ss:$8 sps:$4 sm:$0xff]  }
 0x44a   :  { %5548 = vmatpush1.bf16.msra.mxu1 %v7253_v14  ;;  %5385 = vmatprep.subr.bf16.mxu0 %v7258_v22  ;;  %v7336_v14 = vld [vmem:[%s10867_s5 + $0xc4] ss:$8 sps:$4 sm:$0xff]   ;;  %v7334_v22 = vld [vmem:[%s10867_s5 + $0xc0] ss:$8 sps:$4 sm:$0xff]  }
 0x44b   :  { %5549 = vmatprep.subr.bf16.mxu1 %v7261_v33  ;;  %v7339_v33 = vld [vmem:[%s10867_s5 + $0xd4] ss:$8 sps:$4 sm:$0xff]  }
 0x44d   :  { %5386 = vmatpush1.bf16.msra.mxu0 %v7256_v51  ;;  %v7337_v51 = vld [vmem:[%s10867_s5 + $0xd0] ss:$8 sps:$4 sm:$0xff]  }
 0x44e   :  { %5550 = vmatpush1.bf16.msra.mxu1 %v7259_v40  ;;  %5387 = vmatprep.subr.bf16.mxu0 %v7264_v42  ;;  %v7342_v40 = vld [vmem:[%s10867_s5 + $0xe4] ss:$8 sps:$4 sm:$0xff]   ;;  %v7340_v42 = vld [vmem:[%s10867_s5 + $0xe0] ss:$8 sps:$4 sm:$0xff]  }
 0x44f   :  { %5551 = vmatprep.subr.bf16.mxu1 %v7267_v6  ;;  %v7345_v6 = vld [vmem:[%s10867_s5 + $0xf4] ss:$8 sps:$4 sm:$0xff]  }
 0x451   :  { %5388 = vmatpush1.bf16.msra.mxu0 %v7262_v11  ;;  %v7343_v11 = vld [vmem:[%s10867_s5 + $0xf0] ss:$8 sps:$4 sm:$0xff]  }
 0x452   :  { %5552 = vmatpush1.bf16.msra.mxu1 %v7265_v53  ;;  %5389 = vmatprep.subr.bf16.mxu0 %v7270_v29  ;;  %v7348_v53 = vld [vmem:[%s10867_s5 + $0x104] ss:$8 sps:$4 sm:$0xff]  }
 0x453   :  { %5553 = vmatprep.subr.bf16.mxu1 %v7273_v43  ;;  %v7394_v29 = vld [vmem:[#allocation8] ss:$8 sps:$4 sm:$0xff]   ;;  %v7396_v43 = vld [vmem:[#allocation8 + $0x4] ss:$8 sps:$4 sm:$0xff]  }
 0x455   :  { %5390 = vmatpush1.bf16.msra.mxu0 %v7268_v26  ;;  %v7399_v26 = vld [vmem:[#allocation8 + $0x14] ss:$8 sps:$4 sm:$0xff]  }
 0x456   :  { %5554 = vmatpush1.bf16.msra.mxu1 %v7271_v38  ;;  %5391 = vmatprep.subr.bf16.mxu0 %v7276_v56  ;;  %v7397_v38 = vld [vmem:[#allocation8 + $0x10] ss:$8 sps:$4 sm:$0xff]   ;;  %v7402_v56 = vld [vmem:[#allocation8 + $0x24] ss:$8 sps:$4 sm:$0xff]  }
 0x457   :  { %5555 = vmatprep.subr.bf16.mxu1 %v7279_v46  ;;  %v7400_v46 = vld [vmem:[#allocation8 + $0x20] ss:$8 sps:$4 sm:$0xff]  }
 0x459   :  { %5392 = vmatpush1.bf16.msra.mxu0 %v7274_v7  ;;  %v7405_v7 = vld [vmem:[#allocation8 + $0x34] ss:$8 sps:$4 sm:$0xff]  }
 0x45a   :  { %5556 = vmatpush1.bf16.msra.mxu1 %v7277_v49  ;;  %5393 = vmatprep.subr.bf16.mxu0 %v7282_v63  ;;  %v7408_v49 = vld [vmem:[#allocation8 + $0x44] ss:$8 sps:$4 sm:$0xff]   ;;  %v7406_v63 = vld [vmem:[#allocation8 + $0x40] ss:$8 sps:$4 sm:$0xff]  }
 0x45b   :  { %5557 = vmatprep.subr.bf16.mxu1 %v7285_v25  ;;  %v7411_v25 = vld [vmem:[#allocation8 + $0x54] ss:$8 sps:$4 sm:$0xff]  }
 0x45d   :  { %5394 = vmatpush1.bf16.msra.mxu0 %v7280_v34  ;;  %v7409_v34 = vld [vmem:[#allocation8 + $0x50] ss:$8 sps:$4 sm:$0xff]  }
 0x45e   :  { %5558 = vmatpush1.bf16.msra.mxu1 %v7283_v23  ;;  %5395 = vmatprep.subr.bf16.mxu0 %v7288_v2  ;;  %v7412_v23 = vld [vmem:[#allocation8 + $0x60] ss:$8 sps:$4 sm:$0xff]   ;;  %v7417_v2 = vld [vmem:[#allocation8 + $0x74] ss:$8 sps:$4 sm:$0xff]  }
 0x45f   :  { %5559 = vmatprep.subr.bf16.mxu1 %v7291_v13  ;;  %v7415_v13 = vld [vmem:[#allocation8 + $0x70] ss:$8 sps:$4 sm:$0xff]  }
 0x461   :  { %5396 = vmatpush1.bf16.msra.mxu0 %v7286_v39  ;;  %v7420_v39 = vld [vmem:[#allocation8 + $0x84] ss:$8 sps:$4 sm:$0xff]  }
 0x462   :  { %5560 = vmatpush1.bf16.msra.mxu1 %v7289_v37  ;;  %5397 = vmatprep.subr.bf16.mxu0 %v7294_v44  ;;  %v7423_v37 = vld [vmem:[#allocation8 + $0x94] ss:$8 sps:$4 sm:$0xff]   ;;  %v7421_v44 = vld [vmem:[#allocation8 + $0x90] ss:$8 sps:$4 sm:$0xff]  }
 0x463   :  { %5561 = vmatprep.subr.bf16.mxu1 %v7297_v19  ;;  %v7426_v19 = vld [vmem:[#allocation8 + $0xa4] ss:$8 sps:$4 sm:$0xff]  }
 0x465   :  { %5398 = vmatpush1.bf16.msra.mxu0 %v7292_v55  ;;  %v7424_v55 = vld [vmem:[#allocation8 + $0xa0] ss:$8 sps:$4 sm:$0xff]  }
 0x466   :  { %5562 = vmatpush1.bf16.msra.mxu1 %v7295_v20  ;;  %5976 = vmatprep.subr.bf16.mxu0 %v7300_v10  ;;  %v7427_v20 = vld [vmem:[#allocation8 + $0xb0] ss:$8 sps:$4 sm:$0xff]   ;;  %v7432_v10 = vld [vmem:[#allocation8 + $0xc4] ss:$8 sps:$4 sm:$0xff]  }
 0x467   :  { %6266 = vmatprep.subr.bf16.mxu1 %v7396_v43  ;;  %v7366_v43 = vld [vmem:[%s10867_s5 + $0x164] ss:$8 sps:$4 sm:$0xff]  }
 0x468   :  { %5400 = vmatmul.mubr.bf16.vlgmr.msra.gmra.mrb[8].mxu0 %v3684_v41 }
 0x469   :  { %5564 = vmatmul.mubr.bf16.vlgmr.msra.gmra.mrb[8].mxu1 %v3684_v41  ;;  %5977 = vmatpush1.bf16.msra.mxu0 %v7298_v35  ;;  %v7430_v35 = vld [vmem:[#allocation8 + $0xc0] ss:$8 sps:$4 sm:$0xff]   ;;  %v7435_v41 = vld [vmem:[#allocation8 + $0xd4] ss:$8 sps:$4 sm:$0xff]  }
 0x46a   :  { %5978 = vmatprep.subr.bf16.mxu0 %v7303_v61  ;;  %6267 = vmatpush1.bf16.msra.mxu1 %v7394_v29  ;;  %v10719_v61 = vld [vmem:[#allocation6] sm:$0xf]  ;;  %v7361_v29 = vld [vmem:[%s10867_s5 + $0x150] ss:$8 sps:$4 sm:$0xff]  }
 0x46b   :  { %6268 = vmatprep.subr.bf16.mxu1 %v7399_v26  ;;  %v7364_v26 = vld [vmem:[%s10867_s5 + $0x160] ss:$8 sps:$4 sm:$0xff]  }
 0x46d   :  { %5979 = vmatpush1.bf16.msra.mxu0 %v7301_v45  ;;  %v7433_v45 = vld [vmem:[#allocation8 + $0xd0] ss:$8 sps:$4 sm:$0xff]  }
 0x46e   :  { %5980 = vmatprep.subr.bf16.mxu0 %v7306_v47  ;;  %6269 = vmatpush1.bf16.msra.mxu1 %v7397_v38  ;;  %v3947_v47 = vrot.slane %v10719_v61, %v10008_v16  ;;  %v7369_v38 = vld [vmem:[%s10867_s5 + $0x174] ss:$8 sps:$4 sm:$0xff]  }
 0x46f   :  { %6270 = vmatprep.subr.bf16.mxu1 %v7402_v56  ;;  %v7367_v56 = vld [vmem:[%s10867_s5 + $0x170] ss:$8 sps:$4 sm:$0xff]  }
 0x471   :  { %5981 = vmatpush1.bf16.msra.mxu0 %v7304_v24  ;;  %v3951_v24 = vrot.slane %v10719_v61, %v10016_v60 }
 0x472   :  { %5982 = vmatprep.subr.bf16.mxu0 %v7309_v57  ;;  %6271 = vmatpush1.bf16.msra.mxu1 %v7400_v46  ;;  %v3959_v57 = vrot.slane %v10719_v61, %v2840_v4  ;;  %v7346_v4 = vld [vmem:[%s10867_s5 + $0x100] ss:$8 sps:$4 sm:$0xff]   ;;  %v7372_v46 = vld [vmem:[%s10867_s5 + $0x184] ss:$8 sps:$4 sm:$0xff]  }
 0x473   :  { %6272 = vmatprep.subr.bf16.mxu1 %v7405_v7  ;;  %v7370_v7 = vld [vmem:[%s10867_s5 + $0x180] ss:$8 sps:$4 sm:$0xff]  }
 0x475   :  { %5983 = vmatpush1.bf16.msra.mxu0 %v7307_v21 }
 0x476   :  { %5984 = vmatprep.subr.bf16.mxu0 %v7312_v31  ;;  %6273 = vmatpush1.bf16.msra.mxu1 %v7403_v5  ;;  %v7375_v5 = vld [vmem:[%s10867_s5 + $0x194] ss:$8 sps:$4 sm:$0xff]  }
 0x477   :  { %6274 = vmatprep.subr.bf16.mxu1 %v7408_v49  ;;  %v7373_v49 = vld [vmem:[%s10867_s5 + $0x190] ss:$8 sps:$4 sm:$0xff]  }
 0x479   :  { %5985 = vmatpush1.bf16.msra.mxu0 %v7310_v1 }
 0x47a   :  { %5986 = vmatprep.subr.bf16.mxu0 %v7315_v58  ;;  %6275 = vmatpush1.bf16.msra.mxu1 %v7406_v63  ;;  %v7378_v63 = vld [vmem:[%s10867_s5 + $0x1a4] ss:$8 sps:$4 sm:$0xff]  }
 0x47b   :  { %6276 = vmatprep.subr.bf16.mxu1 %v7411_v25  ;;  %v7376_v25 = vld [vmem:[%s10867_s5 + $0x1a0] ss:$8 sps:$4 sm:$0xff]  }
 0x47d   :  { %5987 = vmatpush1.bf16.msra.mxu0 %v7313_v54 }
 0x47e   :  { %5988 = vmatprep.subr.bf16.mxu0 %v7318_v3  ;;  %6277 = vmatpush1.bf16.msra.mxu1 %v7409_v34  ;;  %v7381_v34 = vld [vmem:[%s10867_s5 + $0x1b4] ss:$8 sps:$4 sm:$0xff]  }
 0x47f   :  { %6278 = vmatprep.subr.bf16.mxu1 %v7414_v0  ;;  %v7379_v0 = vld [vmem:[%s10867_s5 + $0x1b0] ss:$8 sps:$4 sm:$0xff]  }
 0x481   :  { %5989 = vmatpush1.bf16.msra.mxu0 %v7316_v48 }
 0x482   :  { %5990 = vmatprep.subr.bf16.mxu0 %v7321_v12  ;;  %6279 = vmatpush1.bf16.msra.mxu1 %v7412_v23  ;;  %v7384_v23 = vld [vmem:[%s10867_s5 + $0x1c4] ss:$8 sps:$4 sm:$0xff]  }
 0x483   :  { %6280 = vmatprep.subr.bf16.mxu1 %v7417_v2  ;;  %v7382_v2 = vld [vmem:[%s10867_s5 + $0x1c0] ss:$8 sps:$4 sm:$0xff]  }
 0x485   :  { %5991 = vmatpush1.bf16.msra.mxu0 %v7319_v52 }
 0x486   :  { %5992 = vmatprep.subr.bf16.mxu0 %v7324_v28  ;;  %6281 = vmatpush1.bf16.msra.mxu1 %v7415_v13  ;;  %v7387_v13 = vld [vmem:[%s10867_s5 + $0x1d4] ss:$8 sps:$4 sm:$0xff]  }
 0x487   :  { %6282 = vmatprep.subr.bf16.mxu1 %v7420_v39  ;;  %v7385_v39 = vld [vmem:[%s10867_s5 + $0x1d0] ss:$8 sps:$4 sm:$0xff]  }
 0x489   :  { %5993 = vmatpush1.bf16.msra.mxu0 %v7322_v59 }
 0x48a   :  { %5994 = vmatprep.subr.bf16.mxu0 %v7327_v50  ;;  %6283 = vmatpush1.bf16.msra.mxu1 %v7418_v9  ;;  %v3955_v9 = vrot.slane %v10719_v61, %v2836_v32  ;;  %v5644_v61 = vld [vmem:[%s10868_s6] sm:$0x3] }
 0x48b   :  { %6284 = vmatprep.subr.bf16.mxu1 %v7423_v37  ;;  %v7390_v37 = vld [vmem:[%s10867_s5 + $0x1e4] ss:$8 sps:$4 sm:$0xff]  }
 0x48d   :  { %5995 = vmatpush1.bf16.msra.mxu0 %v7325_v62 }
 0x48e   :  { %5996 = vmatprep.subr.bf16.mxu0 %v7330_v30  ;;  %6285 = vmatpush1.bf16.msra.mxu1 %v7421_v44  ;;  %v7388_v44 = vld [vmem:[%s10867_s5 + $0x1e0] ss:$8 sps:$4 sm:$0xff]  }
 0x48f   :  { %6286 = vmatprep.subr.bf16.mxu1 %v7426_v19 }
 0x491   :  { %5997 = vmatpush1.bf16.msra.mxu0 %v7328_v8 }
 0x492   :  { %5998 = vmatprep.subr.bf16.mxu0 %v7333_v36  ;;  %6287 = vmatpush1.bf16.msra.mxu1 %v7424_v55  ;;  %v7393_v55 = vld [vmem:[%s10867_s5 + $0x1f4] ss:$8 sps:$4 sm:$0xff]  }
 0x493   :  { %6288 = vmatprep.subr.bf16.mxu1 %v7429_v27 }
 0x495   :  { %5999 = vmatpush1.bf16.msra.mxu0 %v7331_v17  ;;  %v7351_v17 = vld [vmem:[%s10867_s5 + $0x114] ss:$8 sps:$4 sm:$0xff]  }
 0x496   :  { %6000 = vmatprep.subr.bf16.mxu0 %v7336_v14  ;;  %6289 = vmatpush1.bf16.msra.mxu1 %v7427_v20  ;;  %v7438_v20 = vld [vmem:[#allocation8 + $0xe4] ss:$8 sps:$4 sm:$0xff]  }
 0x497   :  { %6290 = vmatprep.subr.bf16.mxu1 %v7432_v10  ;;  %v7436_v10 = vld [vmem:[#allocation8 + $0xe0] ss:$8 sps:$4 sm:$0xff]  }
 0x499   :  { %6001 = vmatpush1.bf16.msra.mxu0 %v7334_v22  ;;  %v7349_v22 = vld [vmem:[%s10867_s5 + $0x110] ss:$8 sps:$4 sm:$0xff]  }
 0x49a   :  { %6002 = vmatprep.subr.bf16.mxu0 %v7339_v33  ;;  %6291 = vmatpush1.bf16.msra.mxu1 %v7430_v35  ;;  %v7354_v33 = vld [vmem:[%s10867_s5 + $0x124] ss:$8 sps:$4 sm:$0xff]   ;;  %v7441_v35 = vld [vmem:[#allocation8 + $0xf4] ss:$8 sps:$4 sm:$0xff]  }
 0x49b   :  { %6292 = vmatprep.subr.bf16.mxu1 %v7435_v41  ;;  %v7439_v41 = vld [vmem:[#allocation8 + $0xf0] ss:$8 sps:$4 sm:$0xff]  }
 0x49d   :  { %6003 = vmatpush1.bf16.msra.mxu0 %v7337_v51  ;;  %v7352_v51 = vld [vmem:[%s10867_s5 + $0x120] ss:$8 sps:$4 sm:$0xff]  }
 0x49e   :  { %6004 = vmatprep.subr.bf16.mxu0 %v7342_v40  ;;  %6293 = vmatpush1.bf16.msra.mxu1 %v7433_v45  ;;  %v7357_v40 = vld [vmem:[%s10867_s5 + $0x134] ss:$8 sps:$4 sm:$0xff]   ;;  %v5649_v45 = vrot.slane %v5644_v61, %v10008_v16 }
 0x49f   :  { %6294 = vmatprep.subr.bf16.mxu1 %v7438_v20 }
 0x4a1   :  { %6005 = vmatpush1.bf16.msra.mxu0 %v7340_v42  ;;  %v7355_v42 = vld [vmem:[%s10867_s5 + $0x130] ss:$8 sps:$4 sm:$0xff]  }
 0x4a2   :  { %6006 = vmatprep.subr.bf16.mxu0 %v7345_v6  ;;  %v7360_v6 = vld [vmem:[%s10867_s5 + $0x144] ss:$8 sps:$4 sm:$0xff]   ;;  %6295 = vmatpush1.bf16.msra.mxu1 %v7436_v10 }
 0x4a3   :  { %6296 = vmatprep.subr.bf16.mxu1 %v7441_v35 }
 0x4a5   :  { %6007 = vmatpush1.bf16.msra.mxu0 %v7343_v11  ;;  %v7358_v11 = vld [vmem:[%s10867_s5 + $0x140] ss:$8 sps:$4 sm:$0xff]  }
 0x4a6   :  { %6017 = vmatprep.subr.bf16.mxu0 %v7348_v53  ;;  %v7363_v53 = vld [vmem:[%s10867_s5 + $0x154] ss:$8 sps:$4 sm:$0xff]   ;;  %6297 = vmatpush1.bf16.msra.mxu1 %v7439_v41  ;;  %s7571_s5 = smov [#allocation10]  }
 0x4a7   :  { %s6374_s11 = sshll.u32 %s7571_s5, 4  ;;  %s6375_s11 = int_to_ptr.vmem [resolvable:$true] %s6374_s11 }
 0x4a8   :  { %s7512_s6 = scalar_lea.vmem %s6375_s11, 256  ;;  %p7517_p11 = scmp.lt.s32.totalorder %s6375_s11, %s6375_s11 }
 0x4a9   :  { %p7513_p10 = scmp.ne.s32.totalorder %s6375_s11, %s7512_s6  ;;  %p7518_p12 = scmp.lt.s32.totalorder %s7512_s6, %s7512_s6 }
 0x4ab   :  { %p7519_p13 = por %p7518_p12, %p7517_p11 }
 0x4ad   :  { %p7520_p0 = pnand %p7519_p13, %p7513_p10 }
 0x53b   :  { %v5401_v21 = vpop.f32.mrb[8].mxu0 }
 0x53c   :  { %v6871_v31 = vadd.f32 %v5401_v21, %v3947_v47  ;;  %v10728_v1 = vpop.f32.mrb[8].mxu1  ;;  %v5403_v58 = vpop.f32.mrb[9].mxu0  ;;  %v5653_v47 = vrot.slane %v5644_v61, %v10016_v60 }
 0x53d   :  { %v6872_v54 = vadd.f32 %v5403_v58, %v3951_v24  ;;  %v5567_v3 = vpop.f32.mrb[9].mxu1  ;;  %v5405_v48 = vpop.f32.mrb[10].mxu0  ;;  %v6873_v19 = vadd.f32 %v10728_v1, %v3955_v9 }
 0x53e   :  { %v5572_v12 = vmax.f32 %v6871_v31, 0.0  ;;  %v6874_v52 = vadd.f32 %v5567_v3, %v3959_v57  ;;  %v5569_v28 = vpop.f32.mrb[10].mxu1  ;;  %v5406_v59 = vpop.f32.mrb[11].mxu0 }
 0x53f   :  { %v5573_v50 = vmax.f32 %v6872_v54, 0.0  ;;  %v5570_v62 = vpop.f32.mrb[11].mxu1  ;;  %v5574_v32 = vmax.f32 %v6873_v19, 0.0 }
 0x540   :  { %v5575_v30 = vmax.f32 %v6874_v52, 0.0  ;;  %v5576_v36 = vpack.c.bf16 %v5572_v12, %v5572_v12 }
 0x541   :  { %v5577_v8 = vpack.c.bf16 %v5573_v50, %v5573_v50  ;;  %v5578_v27 = vpack.c.bf16 %v5574_v32, %v5574_v32 }
 0x542   :  { %v5579_v14 = vpack.c.bf16 %v5575_v30, %v5575_v30 }
 0x543   :  { %6008 = vmatprep.mubr.bf16.mxu0 %v5577_v8 }
 0x544   :  { %6009 = vmatmul.mubr.bf16.vlgmr.msra.gmra.mrb[12].mxu0 %v5576_v36 }
 0x545   :  { %6018 = vmatpush1.bf16.msra.mxu0 %v7346_v4  ;;  %6049 = vmatprep.mubr.bf16.mxu0 %v5579_v14 }
 0x546   :  { %6019 = vmatprep.subr.bf16.mxu0 %v7351_v17 }
 0x549   :  { %6020 = vmatpush1.bf16.msra.mxu0 %v7349_v22 }
 0x54a   :  { %6021 = vmatprep.subr.bf16.mxu0 %v7354_v33 }
 0x54d   :  { %6022 = vmatpush1.bf16.msra.mxu0 %v7352_v51 }
 0x54e   :  { %6023 = vmatprep.subr.bf16.mxu0 %v7357_v40 }
 0x551   :  { %6024 = vmatpush1.bf16.msra.mxu0 %v7355_v42 }
 0x552   :  { %6025 = vmatprep.subr.bf16.mxu0 %v7360_v6 }
 0x555   :  { %6026 = vmatpush1.bf16.msra.mxu0 %v7358_v11 }
 0x556   :  { %6027 = vmatprep.subr.bf16.mxu0 %v7363_v53 }
 0x559   :  { %6028 = vmatpush1.bf16.msra.mxu0 %v7361_v29 }
 0x55a   :  { %6029 = vmatprep.subr.bf16.mxu0 %v7366_v43 }
 0x55d   :  { %6030 = vmatpush1.bf16.msra.mxu0 %v7364_v26 }
 0x55e   :  { %6031 = vmatprep.subr.bf16.mxu0 %v7369_v38 }
 0x561   :  { %6032 = vmatpush1.bf16.msra.mxu0 %v7367_v56 }
 0x562   :  { %6033 = vmatprep.subr.bf16.mxu0 %v7372_v46 }
 0x565   :  { %6034 = vmatpush1.bf16.msra.mxu0 %v7370_v7 }
 0x566   :  { %6035 = vmatprep.subr.bf16.mxu0 %v7375_v5 }
 0x569   :  { %6036 = vmatpush1.bf16.msra.mxu0 %v7373_v49 }
 0x56a   :  { %6037 = vmatprep.subr.bf16.mxu0 %v7378_v63 }
 0x56d   :  { %6038 = vmatpush1.bf16.msra.mxu0 %v7376_v25 }
 0x56e   :  { %6039 = vmatprep.subr.bf16.mxu0 %v7381_v34 }
 0x571   :  { %6040 = vmatpush1.bf16.msra.mxu0 %v7379_v0 }
 0x572   :  { %6041 = vmatprep.subr.bf16.mxu0 %v7384_v23 }
 0x575   :  { %6042 = vmatpush1.bf16.msra.mxu0 %v7382_v2 }
 0x576   :  { %6043 = vmatprep.subr.bf16.mxu0 %v7387_v13 }
 0x579   :  { %6044 = vmatpush1.bf16.msra.mxu0 %v7385_v39 }
 0x57a   :  { %6045 = vmatprep.subr.bf16.mxu0 %v7390_v37 }
 0x57d   :  { %6046 = vmatpush1.bf16.msra.mxu0 %v7388_v44 }
 0x57e   :  { %6047 = vmatprep.subr.bf16.mxu0 %v7393_v55 }
 0x581   :  { %6048 = vmatpush1.bf16.msra.mxu0 %v7391_v18 }
 0x584   :  { %6050 = vmatmul.mubr.bf16.vlgmr.msra.gmra.mrb[12].mxu0 %v5578_v27 }
 0x657   :  { %v6051_v24 = vpop.f32.mrb[12].mxu0 }
 0x658   :  { %v6875_v57 = vadd.f32 %v6051_v24, %v5649_v45  ;;  %v6053_v21 = vpop.f32.mrb[13].mxu0 }
 0x659   :  { %v6876_v31 = vadd.f32 %v6053_v21, %v5653_v47  ;;  %v6055_v1 = vpop.f32.mrb[14].mxu0 }
 0x65a   :  { %v6058_v58 = vmax.f32 %v6875_v57, 0.0  ;;  %v6056_v54 = vpop.f32.mrb[15].mxu0 }
 0x65b   :  { %v6059_v3 = vmax.f32 %v6876_v31, 0.0 }
 0x65c   :  { %v6060_v12 = vpack.c.bf16 %v6058_v58, %v6058_v58 }
 0x65d   :  { %v6061_v48 = vpack.c.bf16 %v6059_v3, %v6059_v3 }
 0x65f   :  { %6298 = vmatprep.mubr.bf16.mxu1 %v6061_v48 }
 0x660   :  { %6299 = vmatmul.mubr.bf16.vlgmr.msra.gmra.mrb[12].mxu1 %v6060_v12 }
 0x661   :  { %7523 = shalt.err (!%p7520_p0)
}
 0x662   :  { %s7524_s15 = scalar_lea.hbm %s10872_s10, 256 }
 0x663   :  { %p7525_p1 = scmp.ne.s32.totalorder %s10872_s10, %s7524_s15  ;;  %p7528_p2 = scmp.lt.u32.totalorder %s7524_s15, %s10872_s10 }
 0x665   :  { %p7530_p3 = pnand %p7528_p2, %p7525_p1 }
 0x667   :  { %7533 = shalt.err (!%p7530_p3)
}
 0x668   :  { %6377 = dma.vmem_to_hbm [thread:$0]  %s6375_s11, 256, %s10872_s10, [#allocation11]   ;;  %v6094_v52 = vld [vmem:[%s10870_s8] sm:$0x3]  ;;  %v6325_v33 = vand.u32 7, %v7957_v15 }
 0x669   :  { %v6099_v28 = vrot.slane %v6094_v52, %v10008_v16  ;;  %v6103_v59 = vrot.slane %v6094_v52, %v10016_v60  ;;  %s7572_s10 = smov [#allocation9]  }
 0x66a   :  { %s6364_s8 = sshll.u32 %s7572_s10, 4  ;;  %vm6339_vm7 = vcmp.ge.s32.totalorder %v6325_v33, 7  ;;  %s6365_s8 = int_to_ptr.vmem [resolvable:$true] %s6364_s8 }
 0x66b   :  { %s7534_s20 = scalar_lea.vmem %s6365_s8, 256  ;;  %p7539_p5 = scmp.lt.s32.totalorder %s6365_s8, %s6365_s8 }
 0x66c   :  { %p7535_p4 = scmp.ne.s32.totalorder %s6365_s8, %s7534_s20  ;;  %p7540_p6 = scmp.lt.s32.totalorder %s7534_s20, %s7534_s20 }
 0x66e   :  { %p7541_p7 = por %p7540_p6, %p7539_p5 }
 0x670   :  { %p7542_p8 = pnand %p7541_p7, %p7535_p4 }
 0x733   :  { %v6300_v50 = vpop.f32.mrb[12].mxu1 }
 0x734   :  { %v6301_v62 = vadd.f32 %v6300_v50, %v6099_v28  ;;  %v6302_v30 = vpop.f32.mrb[13].mxu1 }
 0x735   :  { %v6303_v8 = vadd.f32 %v6302_v30, %v6103_v59  ;;  %v6304_v4 = vpop.f32.mrb[14].mxu1 }
 0x736   :  { %6356 = vst [vmem:[#allocation9] sm:$0xff] %v6301_v62  ;;  %v6305_v36 = vpop.f32.mrb[15].mxu1 }
 0x737   :  { %v6870_v17 = vmul.f32 -1.442695, %v6303_v8 }
 0x739   :  { %7442 = vpow2.f32 %v6870_v17 }
 0x743   :  { %v7443_v14 = vpop.eup %7442 }
 0x744   :  { %v6349_v22 = vadd.f32 1.0, %v7443_v14 }
 0x746   :  { %7444 = vrcp.f32 %v6349_v22 }
 0x750   :  { %v7445_v16 = vpop.eup %7444 }
 0x751   :  { %v6355_v60 = vsel %vm6339_vm7, %v7445_v16, %v6303_v8 }
 0x752   :  { %6357 = vst [vmem:[#allocation9 + $0x8] sm:$0xff] %v6355_v60 }
 0x753   :  { %7545 = shalt.err (!%p7542_p8)
}
 0x754   :  { %s7546_s23 = scalar_lea.hbm %s10871_s9, 256 }
 0x755   :  { %p7547_p9 = scmp.ne.s32.totalorder %s10871_s9, %s7546_s23  ;;  %p7550_p10 = scmp.lt.u32.totalorder %s7546_s23, %s10871_s9 }
 0x757   :  { %p7552_p11 = pnand %p7550_p10, %p7547_p9 }
 0x759   :  { %7555 = shalt.err (!%p7552_p11)
}
 0x75a   :  { %6367 = dma.vmem_to_hbm [thread:$0]  %s6365_s8, 256, %s10871_s9, [#allocation5]  }
 0x75b   :  { %7560 = dma.done.wait [#allocation5], 256  }
 0x75c   :  { %7561 = vsyncadd [#allocation5], 4294967040 }
 0x75d   :  { %7562 = dma.done.wait [#allocation11], 256  }
 0x75e   :  { %7563 = vsyncadd [#allocation11], 4294967040 }
 0x75f   :  { %6384 = vsyncpa [#allocation4], 1 }
 0x760   :  { %6385 = vsyncpa [#allocation7], 1 }
 0x761   :  { %6386 = vsyncpa [#allocation5], 1 }
 0x762   :  { %6387 = vsyncpa [#allocation11], 1 }

</bundles_post_ra>
